<compile_context>
chip_gen: v7x
topology: tpu7x:2x2x1
jax: 0.10.0
libtpu: 0.0.40
codegen_flags: <defaults>
</compile_context>

<pallas_src>
import functools

import jax
import jax.numpy as jnp
from jax.experimental import pallas as pl
from jax.experimental.pallas import tpu as pltpu


def _fused_cnnmlp_kernel(x_ref, w1_ref, b1_ref, w2_ref, b2_ref, o_ref,
                         xpad_ref, hpad_ref, cols_ref,
                         *, H, W, CIN, HID, COUT):
    """One batch element: conv3x3(3->HID) + ReLU + conv3x3(HID->COUT), 'same' pad.

    x_ref   : (1, H, W, CIN)        input tile (VMEM, f32)
    w1_ref  : (3, 3, CIN, HID)      conv1 weights (bf16)
    b1_ref  : (1, HID)              conv1 bias (f32)
    w2_ref  : (9*HID, COUT)         conv2 weights, im2col-flattened (bf16)
    b2_ref  : (1, COUT)             conv2 bias (f32)
    o_ref   : (1, H, W, COUT)       output tile (f32)
    xpad_ref: (H+2, W+2, CIN)       zero-padded input scratch (f32)
    hpad_ref: (H+2, W+2, HID)       zero-padded hidden scratch (f32)
    cols_ref: (H*W, 9*HID)          im2col scratch for conv2 (bf16)
    """
    # Re-zero the padded scratches every step (borders must be zero; interior is
    # fully overwritten below). Cheap VMEM stores; safe under "parallel" grid
    # sharding where each core owns its own scratch.
    xpad_ref[...] = jnp.zeros_like(xpad_ref)
    hpad_ref[...] = jnp.zeros_like(hpad_ref)

    # Stage input into the padded scratch interior (padding done in VMEM, not HBM).
    xpad_ref[1:1 + H, 1:1 + W, :] = x_ref[0]

    # ---- conv1: 3x3, CIN -> HID, same padding, + bias + ReLU -----------------
    # K is tiny (3 per tap, 27 total) so the simple 9-tap accumulation is fine.
    acc1 = jnp.zeros((H * W, HID), dtype=jnp.float32)
    for ky in range(3):
        for kx in range(3):
            patch = xpad_ref[ky:ky + H, kx:kx + W, :].reshape(H * W, CIN)
            acc1 += jnp.dot(patch.astype(jnp.bfloat16), w1_ref[ky, kx],
                            preferred_element_type=jnp.float32)
    h = jnp.maximum(acc1 + b1_ref[...], 0.0)
    hpad_ref[1:1 + H, 1:1 + W, :] = h.reshape(H, W, HID)

    # ---- conv2: im2col -> single big-K MXU matmul ----------------------------
    # Build (H*W, 9*HID) columns in VMEM (all 9*HID lanes are written each step),
    # then one (H*W, 288) @ (288, COUT) bf16 matmul with f32 accumulation.
    for t in range(9):
        ky, kx = t // 3, t % 3
        patch2 = hpad_ref[ky:ky + H, kx:kx + W, :].reshape(H * W, HID)
        cols_ref[:, t * HID:(t + 1) * HID] = patch2.astype(jnp.bfloat16)

    out = jnp.dot(cols_ref[...], w2_ref[...],
                  preferred_element_type=jnp.float32)
    out = out + b2_ref[...]
    o_ref[0] = out.reshape(H, W, COUT).astype(o_ref.dtype)


def deep_feature_forward(x_nhwc, params):
    """DeepFeatureModule.forward: NHWC in -> NHWC out, fused conv-relu-conv."""
    N, H, W, CIN = x_nhwc.shape
    HID = params["w1"].shape[-1]
    COUT = params["w2"].shape[-1]

    # Weights: bf16 MXU operands; conv2 weights pre-flattened to im2col layout
    # (tap-major, channel-minor) matching the in-kernel column ordering.
    w1 = params["w1"].astype(jnp.bfloat16)                         # (3,3,CIN,HID)
    w2 = params["w2"].astype(jnp.bfloat16).reshape(9 * HID, COUT)  # (9*HID,COUT)
    b1 = params["b1"].astype(jnp.float32)
    b2 = params["b2"].astype(jnp.float32)

    kernel = functools.partial(_fused_cnnmlp_kernel,
                               H=H, W=W, CIN=CIN, HID=HID, COUT=COUT)
    return pl.pallas_call(
        kernel,
        out_shape=jax.ShapeDtypeStruct((N, H, W, COUT), x_nhwc.dtype),
        grid=(N,),
        in_specs=[
            pl.BlockSpec((1, H, W, CIN), lambda n: (n, 0, 0, 0)),
            pl.BlockSpec((3, 3, CIN, HID), lambda n: (0, 0, 0, 0)),
            pl.BlockSpec((1, HID), lambda n: (0, 0)),
            pl.BlockSpec((9 * HID, COUT), lambda n: (0, 0)),
            pl.BlockSpec((1, COUT), lambda n: (0, 0)),
        ],
        out_specs=pl.BlockSpec((1, H, W, COUT), lambda n: (n, 0, 0, 0)),
        scratch_shapes=[
            pltpu.VMEM((H + 2, W + 2, CIN), jnp.float32),   # padded input
            pltpu.VMEM((H + 2, W + 2, HID), jnp.float32),   # padded hidden (stays on-chip)
            pltpu.VMEM((H * W, 9 * HID), jnp.bfloat16),     # im2col columns for conv2
        ],
        compiler_params=pltpu.CompilerParams(
            dimension_semantics=("parallel",)),
    )(x_nhwc, w1, b1, w2, b2)


def init_params(key, in_channels=3, hidden_channels=32, out_channels=128):
    k1, k2, k3, k4 = jax.random.split(key, 4)
    scale1 = 1.0 / jnp.sqrt(in_channels * 9.0)
    scale2 = 1.0 / jnp.sqrt(hidden_channels * 9.0)
    return {
        "w1": jax.random.normal(k1, (3, 3, in_channels, hidden_channels),
                                jnp.float32) * scale1,
        "b1": jax.random.normal(k2, (1, hidden_channels), jnp.float32) * 0.01,
        "w2": jax.random.normal(k3, (3, 3, hidden_channels, out_channels),
                                jnp.float32) * scale2,
        "b2": jax.random.normal(k4, (1, out_channels), jnp.float32) * 0.01,
    }


def _reference(x_nhwc, params):
    """Pure-JAX reference (lax conv) with the same bf16 operand quantization."""
    def q(a):  # quantize operands to bf16, compute in f32 (products are exact)
        return a.astype(jnp.bfloat16).astype(jnp.float32)

    def conv(x, w):
        return jax.lax.conv_general_dilated(
            x, w, window_strides=(1, 1), padding="SAME",
            dimension_numbers=("NHWC", "HWIO", "NHWC"))

    h = jax.nn.relu(conv(q(x_nhwc), q(params["w1"]))
                    + params["b1"].reshape(1, 1, 1, -1))
    y = conv(q(h), q(params["w2"])) + params["b2"].reshape(1, 1, 1, -1)
    return y


if __name__ == "__main__":
    key = jax.random.PRNGKey(0)
    k_x, k_p = jax.random.split(key)

    # Small-but-representative shapes: batch=2, 16x16 spatial, in_channels=3
    # (fixed by the module), hidden=32, out=128 (module default).
    N, H, W, CIN = 2, 16, 16, 3
    HIDDEN, OUT = 32, 128

    x = jax.random.normal(k_x, (N, H, W, CIN), jnp.float32)  # NHWC, like module input
    params = init_params(k_p, CIN, HIDDEN, OUT)

    y = deep_feature_forward(x, params)
    y = jax.block_until_ready(y)

    assert y.shape == (N, H, W, OUT), y.shape

    y_ref = _reference(x, params)
    assert jnp.allclose(y, y_ref, atol=2e-3, rtol=2e-3), (
        float(jnp.max(jnp.abs(y - y_ref))))

    print("KERNEL_OK")
</pallas_src>

<mosaic_0001>
module attributes {stable_mosaic.version = 11 : i64} {
  func.func @_fused_cnnmlp_kernel(%arg0: i32, %arg1: memref<1x16x16x3xf32, #tpu.memory_space<vmem>>, %arg2: memref<3x3x3x32xbf16, #tpu.memory_space<vmem>>, %arg3: memref<1x32xf32, #tpu.memory_space<vmem>>, %arg4: memref<288x128xbf16, #tpu.memory_space<vmem>>, %arg5: memref<1x128xf32, #tpu.memory_space<vmem>>, %arg6: memref<1x16x16x128xf32, #tpu.memory_space<vmem>>, %arg7: memref<18x18x3xf32, #tpu.memory_space<vmem>>, %arg8: memref<18x18x32xf32, #tpu.memory_space<vmem>>, %arg9: memref<256x288xbf16, #tpu.memory_space<vmem>>) attributes {dimension_semantics = [#tpu.dimension_semantics<parallel>], iteration_bounds = array<i64: 2>, scalar_prefetch = 0 : i64, scratch_operands = 3 : i64, tpu.core_type = #tpu.core_type<tc>, window_params = [{transform_indices = @transform_0, window_bounds = array<i64: 1, 16, 16, 3>}, {pipeline_mode = #tpu.pipeline_mode<synchronous>, transform_indices = @transform_1, window_bounds = array<i64: 3, 3, 3, 32>}, {pipeline_mode = #tpu.pipeline_mode<synchronous>, transform_indices = @transform_2, window_bounds = array<i64: 1, 32>}, {pipeline_mode = #tpu.pipeline_mode<synchronous>, transform_indices = @transform_3, window_bounds = array<i64: 288, 128>}, {pipeline_mode = #tpu.pipeline_mode<synchronous>, transform_indices = @transform_4, window_bounds = array<i64: 1, 128>}, {transform_indices = @transform_5, window_bounds = array<i64: 1, 16, 16, 128>}]} {
    %cst = arith.constant 0.000000e+00 : f32
    %0 = vector.broadcast %cst : f32 to vector<18x18x3xf32>
    %c0 = arith.constant 0 : index
    %c0_0 = arith.constant 0 : index
    %c0_1 = arith.constant 0 : index
    %1 = vector.load %arg7[%c0, %c0_0, %c0_1] : memref<18x18x3xf32, #tpu.memory_space<vmem>>, vector<18x18x3xf32>
    tpu.vector_store %arg7[%c0, %c0_0, %c0_1], %0 {strides = array<i32>} : memref<18x18x3xf32, #tpu.memory_space<vmem>>, vector<18x18x3xf32>,
    %cst_2 = arith.constant 0.000000e+00 : f32
    %2 = vector.broadcast %cst_2 : f32 to vector<18x18x32xf32>
    %c0_3 = arith.constant 0 : index
    %c0_4 = arith.constant 0 : index
    %c0_5 = arith.constant 0 : index
    %3 = vector.load %arg8[%c0_3, %c0_4, %c0_5] : memref<18x18x32xf32, #tpu.memory_space<vmem>>, vector<18x18x32xf32>
    tpu.vector_store %arg8[%c0_3, %c0_4, %c0_5], %2 {strides = array<i32>} : memref<18x18x32xf32, #tpu.memory_space<vmem>>, vector<18x18x32xf32>,
    %c0_6 = arith.constant 0 : index
    %c0_7 = arith.constant 0 : index
    %c0_8 = arith.constant 0 : index
    %c0_9 = arith.constant 0 : index
    %4 = vector.load %arg1[%c0_6, %c0_7, %c0_8, %c0_9] : memref<1x16x16x3xf32, #tpu.memory_space<vmem>>, vector<1x16x16x3xf32>
    %5 = vector.shape_cast %4 : vector<1x16x16x3xf32> to vector<16x16x3xf32>
    %c1 = arith.constant 1 : index
    %c1_10 = arith.constant 1 : index
    %c0_11 = arith.constant 0 : index
    %6 = vector.load %arg7[%c1, %c1_10, %c0_11] : memref<18x18x3xf32, #tpu.memory_space<vmem>>, vector<16x16x3xf32>
    tpu.vector_store %arg7[%c1, %c1_10, %c0_11], %5 {strides = array<i32>} : memref<18x18x3xf32, #tpu.memory_space<vmem>>, vector<16x16x3xf32>,
    %cst_12 = arith.constant 0.000000e+00 : f32
    %7 = vector.broadcast %cst_12 : f32 to vector<256x32xf32>
    %c0_13 = arith.constant 0 : index
    %c0_14 = arith.constant 0 : index
    %c0_15 = arith.constant 0 : index
    %8 = vector.load %arg7[%c0_13, %c0_14, %c0_15] : memref<18x18x3xf32, #tpu.memory_space<vmem>>, vector<16x16x3xf32>
    %9 = vector.shape_cast %8 : vector<16x16x3xf32> to vector<256x3xf32>
    %10 = arith.truncf %9 : vector<256x3xf32> to vector<256x3xbf16>
    %c0_16 = arith.constant 0 : index
    %c0_17 = arith.constant 0 : index
    %c0_18 = arith.constant 0 : index
    %c0_19 = arith.constant 0 : index
    %11 = vector.load %arg2[%c0_16, %c0_17, %c0_18, %c0_19] : memref<3x3x3x32xbf16, #tpu.memory_space<vmem>>, vector<1x1x3x32xbf16>
    %12 = vector.shape_cast %11 : vector<1x1x3x32xbf16> to vector<3x32xbf16>
    %cst_20 = arith.constant dense<0.000000e+00> : vector<256x32xf32>
    %13 = tpu.matmul %10, %12, %cst_20 {dimension_numbers = #tpu.dot_dimension_numbers<[1], [0], [0], [1], [0, 0, 1, 1], [], []>} : vector<256x3xbf16>, vector<3x32xbf16>, vector<256x32xf32> -> vector<256x32xf32>
    %14 = arith.addf %7, %13 : vector<256x32xf32>
    %c0_21 = arith.constant 0 : index
    %c1_22 = arith.constant 1 : index
    %c0_23 = arith.constant 0 : index
    %15 = vector.load %arg7[%c0_21, %c1_22, %c0_23] : memref<18x18x3xf32, #tpu.memory_space<vmem>>, vector<16x16x3xf32>
    %16 = vector.shape_cast %15 : vector<16x16x3xf32> to vector<256x3xf32>
    %17 = arith.truncf %16 : vector<256x3xf32> to vector<256x3xbf16>
    %c0_24 = arith.constant 0 : index
    %c1_25 = arith.constant 1 : index
    %c0_26 = arith.constant 0 : index
    %c0_27 = arith.constant 0 : index
    %18 = vector.load %arg2[%c0_24, %c1_25, %c0_26, %c0_27] : memref<3x3x3x32xbf16, #tpu.memory_space<vmem>>, vector<1x1x3x32xbf16>
    %19 = vector.shape_cast %18 : vector<1x1x3x32xbf16> to vector<3x32xbf16>
    %cst_28 = arith.constant dense<0.000000e+00> : vector<256x32xf32>
    %20 = tpu.matmul %17, %19, %cst_28 {dimension_numbers = #tpu.dot_dimension_numbers<[1], [0], [0], [1], [0, 0, 1, 1], [], []>} : vector<256x3xbf16>, vector<3x32xbf16>, vector<256x32xf32> -> vector<256x32xf32>
    %21 = arith.addf %14, %20 : vector<256x32xf32>
    %c0_29 = arith.constant 0 : index
    %c2 = arith.constant 2 : index
    %c0_30 = arith.constant 0 : index
    %22 = vector.load %arg7[%c0_29, %c2, %c0_30] : memref<18x18x3xf32, #tpu.memory_space<vmem>>, vector<16x16x3xf32>
    %23 = vector.shape_cast %22 : vector<16x16x3xf32> to vector<256x3xf32>
    %24 = arith.truncf %23 : vector<256x3xf32> to vector<256x3xbf16>
    %c0_31 = arith.constant 0 : index
    %c2_32 = arith.constant 2 : index
    %c0_33 = arith.constant 0 : index
    %c0_34 = arith.constant 0 : index
    %25 = vector.load %arg2[%c0_31, %c2_32, %c0_33, %c0_34] : memref<3x3x3x32xbf16, #tpu.memory_space<vmem>>, vector<1x1x3x32xbf16>
    %26 = vector.shape_cast %25 : vector<1x1x3x32xbf16> to vector<3x32xbf16>
    %cst_35 = arith.constant dense<0.000000e+00> : vector<256x32xf32>
    %27 = tpu.matmul %24, %26, %cst_35 {dimension_numbers = #tpu.dot_dimension_numbers<[1], [0], [0], [1], [0, 0, 1, 1], [], []>} : vector<256x3xbf16>, vector<3x32xbf16>, vector<256x32xf32> -> vector<256x32xf32>
    %28 = arith.addf %21, %27 : vector<256x32xf32>
    %c1_36 = arith.constant 1 : index
    %c0_37 = arith.constant 0 : index
    %c0_38 = arith.constant 0 : index
    %29 = vector.load %arg7[%c1_36, %c0_37, %c0_38] : memref<18x18x3xf32, #tpu.memory_space<vmem>>, vector<16x16x3xf32>
    %30 = vector.shape_cast %29 : vector<16x16x3xf32> to vector<256x3xf32>
    %31 = arith.truncf %30 : vector<256x3xf32> to vector<256x3xbf16>
    %c1_39 = arith.constant 1 : index
    %c0_40 = arith.constant 0 : index
    %c0_41 = arith.constant 0 : index
    %c0_42 = arith.constant 0 : index
    %32 = vector.load %arg2[%c1_39, %c0_40, %c0_41, %c0_42] : memref<3x3x3x32xbf16, #tpu.memory_space<vmem>>, vector<1x1x3x32xbf16>
    %33 = vector.shape_cast %32 : vector<1x1x3x32xbf16> to vector<3x32xbf16>
    %cst_43 = arith.constant dense<0.000000e+00> : vector<256x32xf32>
    %34 = tpu.matmul %31, %33, %cst_43 {dimension_numbers = #tpu.dot_dimension_numbers<[1], [0], [0], [1], [0, 0, 1, 1], [], []>} : vector<256x3xbf16>, vector<3x32xbf16>, vector<256x32xf32> -> vector<256x32xf32>
    %35 = arith.addf %28, %34 : vector<256x32xf32>
    %c1_44 = arith.constant 1 : index
    %c1_45 = arith.constant 1 : index
    %c0_46 = arith.constant 0 : index
    %36 = vector.load %arg7[%c1_44, %c1_45, %c0_46] : memref<18x18x3xf32, #tpu.memory_space<vmem>>, vector<16x16x3xf32>
    %37 = vector.shape_cast %36 : vector<16x16x3xf32> to vector<256x3xf32>
    %38 = arith.truncf %37 : vector<256x3xf32> to vector<256x3xbf16>
    %c1_47 = arith.constant 1 : index
    %c1_48 = arith.constant 1 : index
    %c0_49 = arith.constant 0 : index
    %c0_50 = arith.constant 0 : index
    %39 = vector.load %arg2[%c1_47, %c1_48, %c0_49, %c0_50] : memref<3x3x3x32xbf16, #tpu.memory_space<vmem>>, vector<1x1x3x32xbf16>
    %40 = vector.shape_cast %39 : vector<1x1x3x32xbf16> to vector<3x32xbf16>
    %cst_51 = arith.constant dense<0.000000e+00> : vector<256x32xf32>
    %41 = tpu.matmul %38, %40, %cst_51 {dimension_numbers = #tpu.dot_dimension_numbers<[1], [0], [0], [1], [0, 0, 1, 1], [], []>} : vector<256x3xbf16>, vector<3x32xbf16>, vector<256x32xf32> -> vector<256x32xf32>
    %42 = arith.addf %35, %41 : vector<256x32xf32>
    %c1_52 = arith.constant 1 : index
    %c2_53 = arith.constant 2 : index
    %c0_54 = arith.constant 0 : index
    %43 = vector.load %arg7[%c1_52, %c2_53, %c0_54] : memref<18x18x3xf32, #tpu.memory_space<vmem>>, vector<16x16x3xf32>
    %44 = vector.shape_cast %43 : vector<16x16x3xf32> to vector<256x3xf32>
    %45 = arith.truncf %44 : vector<256x3xf32> to vector<256x3xbf16>
    %c1_55 = arith.constant 1 : index
    %c2_56 = arith.constant 2 : index
    %c0_57 = arith.constant 0 : index
    %c0_58 = arith.constant 0 : index
    %46 = vector.load %arg2[%c1_55, %c2_56, %c0_57, %c0_58] : memref<3x3x3x32xbf16, #tpu.memory_space<vmem>>, vector<1x1x3x32xbf16>
    %47 = vector.shape_cast %46 : vector<1x1x3x32xbf16> to vector<3x32xbf16>
    %cst_59 = arith.constant dense<0.000000e+00> : vector<256x32xf32>
    %48 = tpu.matmul %45, %47, %cst_59 {dimension_numbers = #tpu.dot_dimension_numbers<[1], [0], [0], [1], [0, 0, 1, 1], [], []>} : vector<256x3xbf16>, vector<3x32xbf16>, vector<256x32xf32> -> vector<256x32xf32>
    %49 = arith.addf %42, %48 : vector<256x32xf32>
    %c2_60 = arith.constant 2 : index
    %c0_61 = arith.constant 0 : index
    %c0_62 = arith.constant 0 : index
    %50 = vector.load %arg7[%c2_60, %c0_61, %c0_62] : memref<18x18x3xf32, #tpu.memory_space<vmem>>, vector<16x16x3xf32>
    %51 = vector.shape_cast %50 : vector<16x16x3xf32> to vector<256x3xf32>
    %52 = arith.truncf %51 : vector<256x3xf32> to vector<256x3xbf16>
    %c2_63 = arith.constant 2 : index
    %c0_64 = arith.constant 0 : index
    %c0_65 = arith.constant 0 : index
    %c0_66 = arith.constant 0 : index
    %53 = vector.load %arg2[%c2_63, %c0_64, %c0_65, %c0_66] : memref<3x3x3x32xbf16, #tpu.memory_space<vmem>>, vector<1x1x3x32xbf16>
    %54 = vector.shape_cast %53 : vector<1x1x3x32xbf16> to vector<3x32xbf16>
    %cst_67 = arith.constant dense<0.000000e+00> : vector<256x32xf32>
    %55 = tpu.matmul %52, %54, %cst_67 {dimension_numbers = #tpu.dot_dimension_numbers<[1], [0], [0], [1], [0, 0, 1, 1], [], []>} : vector<256x3xbf16>, vector<3x32xbf16>, vector<256x32xf32> -> vector<256x32xf32>
    %56 = arith.addf %49, %55 : vector<256x32xf32>
    %c2_68 = arith.constant 2 : index
    %c1_69 = arith.constant 1 : index
    %c0_70 = arith.constant 0 : index
    %57 = vector.load %arg7[%c2_68, %c1_69, %c0_70] : memref<18x18x3xf32, #tpu.memory_space<vmem>>, vector<16x16x3xf32>
    %58 = vector.shape_cast %57 : vector<16x16x3xf32> to vector<256x3xf32>
    %59 = arith.truncf %58 : vector<256x3xf32> to vector<256x3xbf16>
    %c2_71 = arith.constant 2 : index
    %c1_72 = arith.constant 1 : index
    %c0_73 = arith.constant 0 : index
    %c0_74 = arith.constant 0 : index
    %60 = vector.load %arg2[%c2_71, %c1_72, %c0_73, %c0_74] : memref<3x3x3x32xbf16, #tpu.memory_space<vmem>>, vector<1x1x3x32xbf16>
    %61 = vector.shape_cast %60 : vector<1x1x3x32xbf16> to vector<3x32xbf16>
    %cst_75 = arith.constant dense<0.000000e+00> : vector<256x32xf32>
    %62 = tpu.matmul %59, %61, %cst_75 {dimension_numbers = #tpu.dot_dimension_numbers<[1], [0], [0], [1], [0, 0, 1, 1], [], []>} : vector<256x3xbf16>, vector<3x32xbf16>, vector<256x32xf32> -> vector<256x32xf32>
    %63 = arith.addf %56, %62 : vector<256x32xf32>
    %c2_76 = arith.constant 2 : index
    %c2_77 = arith.constant 2 : index
    %c0_78 = arith.constant 0 : index
    %64 = vector.load %arg7[%c2_76, %c2_77, %c0_78] : memref<18x18x3xf32, #tpu.memory_space<vmem>>, vector<16x16x3xf32>
    %65 = vector.shape_cast %64 : vector<16x16x3xf32> to vector<256x3xf32>
    %66 = arith.truncf %65 : vector<256x3xf32> to vector<256x3xbf16>
    %c2_79 = arith.constant 2 : index
    %c2_80 = arith.constant 2 : index
    %c0_81 = arith.constant 0 : index
    %c0_82 = arith.constant 0 : index
    %67 = vector.load %arg2[%c2_79, %c2_80, %c0_81, %c0_82] : memref<3x3x3x32xbf16, #tpu.memory_space<vmem>>, vector<1x1x3x32xbf16>
    %68 = vector.shape_cast %67 : vector<1x1x3x32xbf16> to vector<3x32xbf16>
    %cst_83 = arith.constant dense<0.000000e+00> : vector<256x32xf32>
    %69 = tpu.matmul %66, %68, %cst_83 {dimension_numbers = #tpu.dot_dimension_numbers<[1], [0], [0], [1], [0, 0, 1, 1], [], []>} : vector<256x3xbf16>, vector<3x32xbf16>, vector<256x32xf32> -> vector<256x32xf32>
    %70 = arith.addf %63, %69 : vector<256x32xf32>
    %c0_84 = arith.constant 0 : index
    %c0_85 = arith.constant 0 : index
    %71 = vector.load %arg3[%c0_84, %c0_85] : memref<1x32xf32, #tpu.memory_space<vmem>>, vector<1x32xf32>
    %72 = vector.broadcast %71 : vector<1x32xf32> to vector<256x32xf32>
    %73 = arith.addf %70, %72 : vector<256x32xf32>
    %cst_86 = arith.constant 0.000000e+00 : f32
    %74 = vector.broadcast %cst_86 : f32 to vector<256x32xf32>
    %75 = arith.maximumf %73, %74 : vector<256x32xf32>
    %76 = vector.shape_cast %75 : vector<256x32xf32> to vector<16x16x32xf32>
    %c1_87 = arith.constant 1 : index
    %c1_88 = arith.constant 1 : index
    %c0_89 = arith.constant 0 : index
    %77 = vector.load %arg8[%c1_87, %c1_88, %c0_89] : memref<18x18x32xf32, #tpu.memory_space<vmem>>, vector<16x16x32xf32>
    tpu.vector_store %arg8[%c1_87, %c1_88, %c0_89], %76 {strides = array<i32>} : memref<18x18x32xf32, #tpu.memory_space<vmem>>, vector<16x16x32xf32>,
    %c0_90 = arith.constant 0 : index
    %c0_91 = arith.constant 0 : index
    %c0_92 = arith.constant 0 : index
    %78 = vector.load %arg8[%c0_90, %c0_91, %c0_92] : memref<18x18x32xf32, #tpu.memory_space<vmem>>, vector<16x16x32xf32>
    %79 = vector.shape_cast %78 : vector<16x16x32xf32> to vector<256x32xf32>
    %80 = arith.truncf %79 : vector<256x32xf32> to vector<256x32xbf16>
    %c0_93 = arith.constant 0 : index
    %c0_94 = arith.constant 0 : index
    %81 = vector.load %arg9[%c0_93, %c0_94] : memref<256x288xbf16, #tpu.memory_space<vmem>>, vector<256x32xbf16>
    tpu.vector_store %arg9[%c0_93, %c0_94], %80 {strides = array<i32>} : memref<256x288xbf16, #tpu.memory_space<vmem>>, vector<256x32xbf16>,
    %c0_95 = arith.constant 0 : index
    %c1_96 = arith.constant 1 : index
    %c0_97 = arith.constant 0 : index
    %82 = vector.load %arg8[%c0_95, %c1_96, %c0_97] : memref<18x18x32xf32, #tpu.memory_space<vmem>>, vector<16x16x32xf32>
    %83 = vector.shape_cast %82 : vector<16x16x32xf32> to vector<256x32xf32>
    %84 = arith.truncf %83 : vector<256x32xf32> to vector<256x32xbf16>
    %c0_98 = arith.constant 0 : index
    %c32 = arith.constant 32 : index
    %85 = vector.load %arg9[%c0_98, %c32] : memref<256x288xbf16, #tpu.memory_space<vmem>>, vector<256x32xbf16>
    tpu.vector_store %arg9[%c0_98, %c32], %84 {strides = array<i32>} : memref<256x288xbf16, #tpu.memory_space<vmem>>, vector<256x32xbf16>,
    %c0_99 = arith.constant 0 : index
    %c2_100 = arith.constant 2 : index
    %c0_101 = arith.constant 0 : index
    %86 = vector.load %arg8[%c0_99, %c2_100, %c0_101] : memref<18x18x32xf32, #tpu.memory_space<vmem>>, vector<16x16x32xf32>
    %87 = vector.shape_cast %86 : vector<16x16x32xf32> to vector<256x32xf32>
    %88 = arith.truncf %87 : vector<256x32xf32> to vector<256x32xbf16>
    %c0_102 = arith.constant 0 : index
    %c64 = arith.constant 64 : index
    %89 = vector.load %arg9[%c0_102, %c64] : memref<256x288xbf16, #tpu.memory_space<vmem>>, vector<256x32xbf16>
    tpu.vector_store %arg9[%c0_102, %c64], %88 {strides = array<i32>} : memref<256x288xbf16, #tpu.memory_space<vmem>>, vector<256x32xbf16>,
    %c1_103 = arith.constant 1 : index
    %c0_104 = arith.constant 0 : index
    %c0_105 = arith.constant 0 : index
    %90 = vector.load %arg8[%c1_103, %c0_104, %c0_105] : memref<18x18x32xf32, #tpu.memory_space<vmem>>, vector<16x16x32xf32>
    %91 = vector.shape_cast %90 : vector<16x16x32xf32> to vector<256x32xf32>
    %92 = arith.truncf %91 : vector<256x32xf32> to vector<256x32xbf16>
    %c0_106 = arith.constant 0 : index
    %c96 = arith.constant 96 : index
    %93 = vector.load %arg9[%c0_106, %c96] : memref<256x288xbf16, #tpu.memory_space<vmem>>, vector<256x32xbf16>
    tpu.vector_store %arg9[%c0_106, %c96], %92 {strides = array<i32>} : memref<256x288xbf16, #tpu.memory_space<vmem>>, vector<256x32xbf16>,
    %c1_107 = arith.constant 1 : index
    %c1_108 = arith.constant 1 : index
    %c0_109 = arith.constant 0 : index
    %94 = vector.load %arg8[%c1_107, %c1_108, %c0_109] : memref<18x18x32xf32, #tpu.memory_space<vmem>>, vector<16x16x32xf32>
    %95 = vector.shape_cast %94 : vector<16x16x32xf32> to vector<256x32xf32>
    %96 = arith.truncf %95 : vector<256x32xf32> to vector<256x32xbf16>
    %c0_110 = arith.constant 0 : index
    %c128 = arith.constant 128 : index
    %97 = vector.load %arg9[%c0_110, %c128] : memref<256x288xbf16, #tpu.memory_space<vmem>>, vector<256x32xbf16>
    tpu.vector_store %arg9[%c0_110, %c128], %96 {strides = array<i32>} : memref<256x288xbf16, #tpu.memory_space<vmem>>, vector<256x32xbf16>,
    %c1_111 = arith.constant 1 : index
    %c2_112 = arith.constant 2 : index
    %c0_113 = arith.constant 0 : index
    %98 = vector.load %arg8[%c1_111, %c2_112, %c0_113] : memref<18x18x32xf32, #tpu.memory_space<vmem>>, vector<16x16x32xf32>
    %99 = vector.shape_cast %98 : vector<16x16x32xf32> to vector<256x32xf32>
    %100 = arith.truncf %99 : vector<256x32xf32> to vector<256x32xbf16>
    %c0_114 = arith.constant 0 : index
    %c160 = arith.constant 160 : index
    %101 = vector.load %arg9[%c0_114, %c160] : memref<256x288xbf16, #tpu.memory_space<vmem>>, vector<256x32xbf16>
    tpu.vector_store %arg9[%c0_114, %c160], %100 {strides = array<i32>} : memref<256x288xbf16, #tpu.memory_space<vmem>>, vector<256x32xbf16>,
    %c2_115 = arith.constant 2 : index
    %c0_116 = arith.constant 0 : index
    %c0_117 = arith.constant 0 : index
    %102 = vector.load %arg8[%c2_115, %c0_116, %c0_117] : memref<18x18x32xf32, #tpu.memory_space<vmem>>, vector<16x16x32xf32>
    %103 = vector.shape_cast %102 : vector<16x16x32xf32> to vector<256x32xf32>
    %104 = arith.truncf %103 : vector<256x32xf32> to vector<256x32xbf16>
    %c0_118 = arith.constant 0 : index
    %c192 = arith.constant 192 : index
    %105 = vector.load %arg9[%c0_118, %c192] : memref<256x288xbf16, #tpu.memory_space<vmem>>, vector<256x32xbf16>
    tpu.vector_store %arg9[%c0_118, %c192], %104 {strides = array<i32>} : memref<256x288xbf16, #tpu.memory_space<vmem>>, vector<256x32xbf16>,
    %c2_119 = arith.constant 2 : index
    %c1_120 = arith.constant 1 : index
    %c0_121 = arith.constant 0 : index
    %106 = vector.load %arg8[%c2_119, %c1_120, %c0_121] : memref<18x18x32xf32, #tpu.memory_space<vmem>>, vector<16x16x32xf32>
    %107 = vector.shape_cast %106 : vector<16x16x32xf32> to vector<256x32xf32>
    %108 = arith.truncf %107 : vector<256x32xf32> to vector<256x32xbf16>
    %c0_122 = arith.constant 0 : index
    %c224 = arith.constant 224 : index
    %109 = vector.load %arg9[%c0_122, %c224] : memref<256x288xbf16, #tpu.memory_space<vmem>>, vector<256x32xbf16>
    tpu.vector_store %arg9[%c0_122, %c224], %108 {strides = array<i32>} : memref<256x288xbf16, #tpu.memory_space<vmem>>, vector<256x32xbf16>,
    %c2_123 = arith.constant 2 : index
    %c2_124 = arith.constant 2 : index
    %c0_125 = arith.constant 0 : index
    %110 = vector.load %arg8[%c2_123, %c2_124, %c0_125] : memref<18x18x32xf32, #tpu.memory_space<vmem>>, vector<16x16x32xf32>
    %111 = vector.shape_cast %110 : vector<16x16x32xf32> to vector<256x32xf32>
    %112 = arith.truncf %111 : vector<256x32xf32> to vector<256x32xbf16>
    %c0_126 = arith.constant 0 : index
    %c256 = arith.constant 256 : index
    %113 = vector.load %arg9[%c0_126, %c256] : memref<256x288xbf16, #tpu.memory_space<vmem>>, vector<256x32xbf16>
    tpu.vector_store %arg9[%c0_126, %c256], %112 {strides = array<i32>} : memref<256x288xbf16, #tpu.memory_space<vmem>>, vector<256x32xbf16>,
    %c0_127 = arith.constant 0 : index
    %c0_128 = arith.constant 0 : index
    %114 = vector.load %arg9[%c0_127, %c0_128] : memref<256x288xbf16, #tpu.memory_space<vmem>>, vector<256x288xbf16>
    %c0_129 = arith.constant 0 : index
    %c0_130 = arith.constant 0 : index
    %115 = vector.load %arg4[%c0_129, %c0_130] : memref<288x128xbf16, #tpu.memory_space<vmem>>, vector<288x128xbf16>
    %cst_131 = arith.constant dense<0.000000e+00> : vector<256x128xf32>
    %116 = tpu.matmul %114, %115, %cst_131 {dimension_numbers = #tpu.dot_dimension_numbers<[1], [0], [0], [1], [0, 0, 1, 1], [], []>} : vector<256x288xbf16>, vector<288x128xbf16>, vector<256x128xf32> -> vector<256x128xf32>
    %c0_132 = arith.constant 0 : index
    %c0_133 = arith.constant 0 : index
    %117 = vector.load %arg5[%c0_132, %c0_133] : memref<1x128xf32, #tpu.memory_space<vmem>>, vector<1x128xf32>
    %118 = vector.broadcast %117 : vector<1x128xf32> to vector<256x128xf32>
    %119 = arith.addf %116, %118 : vector<256x128xf32>
    %120 = vector.shape_cast %119 : vector<256x128xf32> to vector<16x16x128xf32>
    %c0_134 = arith.constant 0 : index
    %c0_135 = arith.constant 0 : index
    %c0_136 = arith.constant 0 : index
    %c0_137 = arith.constant 0 : index
    %121 = vector.load %arg6[%c0_134, %c0_135, %c0_136, %c0_137] : memref<1x16x16x128xf32, #tpu.memory_space<vmem>>, vector<1x16x16x128xf32>
    %122 = vector.shape_cast %121 : vector<1x16x16x128xf32> to vector<16x16x128xf32>
    %123 = vector.shape_cast %120 : vector<16x16x128xf32> to vector<1x16x16x128xf32>
    tpu.vector_store %arg6[%c0_134, %c0_135, %c0_136, %c0_137], %123 {strides = array<i32>} : memref<1x16x16x128xf32, #tpu.memory_space<vmem>>, vector<1x16x16x128xf32>,
    return
  }
  func.func @transform_0(%arg0: i32) -> (i32, i32, i32, i32) {
    %c0_i32 = arith.constant 0 : i32
    %c0_i32_0 = arith.constant 0 : i32
    %c0_i32_1 = arith.constant 0 : i32
    %c0_i32_2 = arith.constant 0 : i32
    return %arg0, %c0_i32, %c0_i32_0, %c0_i32_1 : i32, i32, i32, i32
  }
  func.func @transform_1(%arg0: i32) -> (i32, i32, i32, i32) {
    %c0_i32 = arith.constant 0 : i32
    %c0_i32_0 = arith.constant 0 : i32
    %c0_i32_1 = arith.constant 0 : i32
    %c0_i32_2 = arith.constant 0 : i32
    %c0_i32_3 = arith.constant 0 : i32
    return %c0_i32, %c0_i32_0, %c0_i32_1, %c0_i32_2 : i32, i32, i32, i32
  }
  func.func @transform_2(%arg0: i32) -> (i32, i32) {
    %c0_i32 = arith.constant 0 : i32
    %c0_i32_0 = arith.constant 0 : i32
    %c0_i32_1 = arith.constant 0 : i32
    return %c0_i32, %c0_i32_0 : i32, i32
  }
  func.func @transform_3(%arg0: i32) -> (i32, i32) {
    %c0_i32 = arith.constant 0 : i32
    %c0_i32_0 = arith.constant 0 : i32
    %c0_i32_1 = arith.constant 0 : i32
    return %c0_i32, %c0_i32_0 : i32, i32
  }
  func.func @transform_4(%arg0: i32) -> (i32, i32) {
    %c0_i32 = arith.constant 0 : i32
    %c0_i32_0 = arith.constant 0 : i32
    %c0_i32_1 = arith.constant 0 : i32
    return %c0_i32, %c0_i32_0 : i32, i32
  }
  func.func @transform_5(%arg0: i32) -> (i32, i32, i32, i32) {
    %c0_i32 = arith.constant 0 : i32
    %c0_i32_0 = arith.constant 0 : i32
    %c0_i32_1 = arith.constant 0 : i32
    %c0_i32_2 = arith.constant 0 : i32
    return %arg0, %c0_i32, %c0_i32_0, %c0_i32_1 : i32, i32, i32, i32
  }
}

</mosaic_0001>

<bundles_post_ra>
// kernel: tpu_custom_call.1
= control target key start
LH: loop header
LB: loop body
LE: loop exit
PB: predicated region body
PF: predicated region fallthrough
CT: control target
= control target key end

     0   :  { %10 = vsyncpa [#allocation6], 0  ;;  %s7634_s0 = inlined_call_operand.vmem [shape: f32[2,16,16,3], index: 0, kind: input, shape index: {}]   ;;  %s7635_s1 = inlined_call_operand.vmem [shape: bf16[3,3,3,32], index: 1, kind: input, shape index: {}]   ;;  %s7636_s2 = inlined_call_operand.vmem [shape: f32[1,32], index: 2, kind: input, shape index: {}]   ;;  %s7637_s3 = inlined_call_operand.vmem [shape: bf16[288,128], index: 3, kind: input, shape index: {}]   ;;  %s7638_s4 = inlined_call_operand.vmem [shape: f32[1,128], index: 4, kind: input, shape index: {}]   ;;  %s7639_s5 = inlined_call_operand.hbm [shape: f32[2,16,16,128], index: 5, kind: output, shape index: {}]  }
   0x1   :  { %12 = vsyncpa [#allocation6 + $0x1], 0  ;;  %s5981_s18 = smov 0   ;;  %s5983_s19 = smov 0  }
   0x2   :  { %s5985_s20 = smov 0   ;;  %s5987_s21 = smov 0  }
   0x3 LB: > { %s6002_s22 = sadd.s32 4294967295, %s5941_s21   ;;  %s4732_s23 = sadd.s32 4294967294, %s5941_s21   ;;  %s5941_s21 = sphi %s5987_s21, %s7645_s21   ;;  %s5937_s20 = sphi %s5985_s20, %s7644_s20   ;;  %s5933_s19 = sphi %s5983_s19, %s7643_s19   ;;  %s5929_s18 = sphi %s5981_s18, %s7642_s18  }
   0x4   : > { %s6006_s24 = sadd.s32 1, %s5941_s21   ;;  %s135_s25 = sadd.s32 1, %s5937_s20 }
   0x5   : > { %s132_s26 = ssub.s32 %s5941_s21, %s6006_s24  ;;  %p145_p0 = scmp.ne.s32.totalorder %s5937_s20, %s5933_s19 }
   0x6   : > { %p133_p1 = scmp.eq.s32.totalorder %s132_s26, 0  ;;  %p146_p2 = scmp.eq.s32.totalorder %s6002_s22, 1 }
   0x7   : > { %p151_p3 = scmp.ne.s32.totalorder %s5933_s19, %s5929_s18  ;;  %p152_p4 = scmp.eq.s32.totalorder %s4732_s23, 1 }
   0x8   : > { %s6017_s27 = scalar_select %p133_p1, %s5937_s20, %s135_s25  }
   0x9   : > { %p6019_p5 = por %p146_p2, %p145_p0  ;;  %p6023_p6 = por %p152_p4, %p151_p3 }
   0xa   : > { %p4735_p7 = scmp.ge.s32.totalorder %s5941_s21, 1  ;;  %p190_p8 = scmp.lt.s32.totalorder %s5941_s21, 3 }
   0xc   : > { %p191_p9 = pnand %p4735_p7, %p190_p8 }
   0xd   : > { %vm548_vm0 = vcmask (!%p191_p9), 1040384   ;;  %vm549_vm1 = vcmask (!%p191_p9), 1041408   ;;  %v6032_v0 = vld [vmem:[%s7635_s1 + $0x6] sm:$0x3] (!%p191_p9)  ;;  %p218_p10 = scmp.lt.s32.totalorder (!%p191_p9), %s6002_s22, 1  ;;  %v5943_v1 = vmov (!%p191_p9), 65535  }
   0xe   : > { %194 = sbr.rel (%p191_p9) target bundleno = 1208 (0x4b8), region = 40  ;;  %v550_v2 = vsel (!%p191_p9), %vm548_vm0, 4294967295, %v5943_v1  ;;  %vm224_vm2 = vcmask (!%p191_p9), 23552   ;;  %vm227_vm3 = vcmask (!%p191_p9), 17408   ;;  %v4806_v3 = vld [vmem:[%s7635_s1 + $0x8] sm:$0x3] (!%p191_p9) }
   0xf   : > { %v6038_v4 = vsel (!%p191_p9), %vm549_vm1, %v550_v2, 0  ;;  %v5944_v5 = vmov (!%p191_p9), 0.0   ;;  %v4739_v6 = vld [vmem:[%s7635_s1 + $0x2] sm:$0x3] (!%p191_p9)  ;;  %v4823_v28 = vld [vmem:[%s7635_s1 + $0xa] sm:$0x3] (!%p191_p9) }
  0x10   : > { %229 = vst.msk [vmem:[#allocation2 + $0x18] sm:$0xff] (!%p191_p9), %vm224_vm2, %v5944_v5  ;;  %230 = vst.msk [vmem:[#allocation2 + $0x20] sm:$0xff] (!%p191_p9), %vm224_vm2, %v5944_v5  ;;  %v1321_v7 = vand.u32 (!%p191_p9), %v6032_v0, %v6038_v4  ;;  %v6157_v8 = vand.u32 (!%p191_p9), %v4806_v3, %v6038_v4  ;;  %v553_v9 = vand.u32 (!%p191_p9), %v4739_v6, %v6038_v4  ;;  %vm280_vm4 = vcmask (!%p191_p9), 261120   ;;  %s5946_s13 = smov (!%p191_p9), 32   ;;  %s5947_s8 = smov (!%p191_p9), 96  }
  0x11   : > { %231 = vst.msk [vmem:[#allocation2 + $0x28] sm:$0x3] (!%p191_p9), %vm227_vm3, %v5944_v5  ;;  %228 = vst.msk [vmem:[#allocation2 + $0x10] sm:$0x3] (!%p191_p9), %vm227_vm3, %v5944_v5  ;;  %v6225_v44 = vand.u32 (!%p191_p9), %v4823_v28, %v6038_v4  ;;  %vm283_vm5 = vcmask (!%p191_p9), 254976   ;;  %vm3267_vm6 = vcmask (!%p191_p9), 523520  }
  0x12   : > { %225 = vst.msk [vmem:[#allocation2] sm:$0xff] (!%p191_p9), %vm224_vm2, %v5944_v5  ;;  %226 = vst.msk [vmem:[#allocation2 + $0x8] sm:$0xff] (!%p191_p9), %vm224_vm2, %v5944_v5  ;;  %5319 = vmatprep.subr.bf16.mxu0 (!%p191_p9), %v1321_v7  ;;  %5217 = vmatprep.subr.bf16.mxu1 (!%p191_p9), %v553_v9  ;;  %vm3396_vm7 = vcmask (!%p191_p9), 785920   ;;  %vm3525_vm8 = vcmask (!%p191_p9), 1048320   ;;  %s4933_s14 = sshll.u32 (!%p191_p9), %s6002_s22, 12  ;;  %s5948_s26 = smov (!%p191_p9), [#allocation5]  }
  0x13   : > { %232 = vst.msk [vmem:[#allocation2 + $0x30] sm:$0xff] (!%p191_p9), %vm224_vm2, %v5944_v5  ;;  %233 = vst.msk [vmem:[#allocation2 + $0x38] sm:$0xff] (!%p191_p9), %vm224_vm2, %v5944_v5  ;;  %5320 = vmatpush3.bf16.msra.mxu0 (!%p191_p9), %v1321_v7  ;;  %5218 = vmatpush3.bf16.msra.mxu1 (!%p191_p9), %v553_v9  ;;  %s5883_s30 = sshll.u32 (!%p191_p9), %s5948_s26, 4  ;;  %s5884_s30 = int_to_ptr.vmem [resolvable:$false] %s5883_s30 }
  0x14   : > { %234 = vst.msk [vmem:[#allocation2 + $0x40] sm:$0x3] (!%p191_p9), %vm227_vm3, %v5944_v5  ;;  %237 = vst.msk [vmem:[#allocation2 + $0x58] sm:$0x3] (!%p191_p9), %vm227_vm3, %v5944_v5  ;;  %5353 = vmatprep.subr.bf16.mxu0 (!%p191_p9), %v6157_v8  ;;  %s5885_s6 = scalar_lea.vmem (!%p191_p9), %s5884_s30, 8192 }
  0x15   : > { %s6041_s9 = scalar_select %p218_p10, %s6002_s22, 1  ;;  %235 = vst.msk [vmem:[#allocation2 + $0x48] sm:$0xff] %vm224_vm2, %v5944_v5  ;;  %236 = vst.msk [vmem:[#allocation2 + $0x50] sm:$0xff] %vm224_vm2, %v5944_v5 }
  0x16   : > { %238 = vst.msk [vmem:[#allocation2 + $0x60] sm:$0xff] %vm224_vm2, %v5944_v5  ;;  %239 = vst.msk [vmem:[#allocation2 + $0x68] sm:$0xff] %vm224_vm2, %v5944_v5  ;;  %s7584_s22 = scalar_lea.hbm %s7639_s5, %s4933_s14 }
  0x17   : > { %240 = vst.msk [vmem:[#allocation2 + $0x70] sm:$0x3] %vm227_vm3, %v5944_v5  ;;  %243 = vst.msk [vmem:[#allocation2 + $0x88] sm:$0x3] %vm227_vm3, %v5944_v5  ;;  %s4932_s12 = sshll.u32 %s6041_s9, 8 }
  0x18   : > { %241 = vst.msk [vmem:[#allocation2 + $0x78] sm:$0xff] %vm224_vm2, %v5944_v5  ;;  %242 = vst.msk [vmem:[#allocation2 + $0x80] sm:$0xff] %vm224_vm2, %v5944_v5  ;;  %s6164_s15 = scalar_lea.vmem %s7634_s0, %s4932_s12  ;;  %s5945_s12 = smov 64  }
  0x19   : > { %244 = vst.msk [vmem:[#allocation2 + $0x90] sm:$0xff] %vm224_vm2, %v5944_v5  ;;  %245 = vst.msk [vmem:[#allocation2 + $0x98] sm:$0xff] %vm224_vm2, %v5944_v5  ;;  %v336_v10 = vld [vmem:[%s6164_s15] sm:$0xff]  ;;  %v337_v11 = vld [vmem:[%s6164_s15 + $0x8] sm:$0xff] }
  0x1a   : > { %246 = vst.msk [vmem:[#allocation2 + $0xa0] sm:$0x3] %vm227_vm3, %v5944_v5  ;;  %249 = vst.msk [vmem:[#allocation2 + $0xb8] sm:$0x3] %vm227_vm3, %v5944_v5  ;;  %v338_v12 = vld [vmem:[%s6164_s15 + $0x10] sm:$0xff]  ;;  %v339_v13 = vld [vmem:[%s6164_s15 + $0x18] sm:$0xff] }
  0x1b   : > { %247 = vst.msk [vmem:[#allocation2 + $0xa8] sm:$0xff] %vm224_vm2, %v5944_v5  ;;  %248 = vst.msk [vmem:[#allocation2 + $0xb0] sm:$0xff] %vm224_vm2, %v5944_v5  ;;  %v340_v14 = vld [vmem:[%s6164_s15 + $0x20] sm:$0xff]  ;;  %v341_v15 = vld [vmem:[%s6164_s15 + $0x28] sm:$0xff] }
  0x1c   : > { %250 = vst.msk [vmem:[#allocation2 + $0xc0] sm:$0xff] %vm224_vm2, %v5944_v5  ;;  %251 = vst.msk [vmem:[#allocation2 + $0xc8] sm:$0xff] %vm224_vm2, %v5944_v5  ;;  %v342_v16 = vld [vmem:[%s6164_s15 + $0x30] sm:$0xff]  ;;  %v343_v17 = vld [vmem:[%s6164_s15 + $0x38] sm:$0xff] }
  0x1d   : > { %252 = vst.msk [vmem:[#allocation2 + $0xd0] sm:$0x3] %vm227_vm3, %v5944_v5  ;;  %255 = vst.msk [vmem:[#allocation2 + $0xe8] sm:$0x3] %vm227_vm3, %v5944_v5  ;;  %v344_v18 = vld [vmem:[%s6164_s15 + $0x40] sm:$0xff]  ;;  %v345_v19 = vld [vmem:[%s6164_s15 + $0x48] sm:$0xff] }
  0x1e   : > { %253 = vst.msk [vmem:[#allocation2 + $0xd8] sm:$0xff] %vm224_vm2, %v5944_v5  ;;  %254 = vst.msk [vmem:[#allocation2 + $0xe0] sm:$0xff] %vm224_vm2, %v5944_v5  ;;  %v346_v20 = vld [vmem:[%s6164_s15 + $0x50] sm:$0xff]  ;;  %v347_v21 = vld [vmem:[%s6164_s15 + $0x58] sm:$0xff] }
  0x1f   : > { %256 = vst.msk [vmem:[#allocation2 + $0xf0] sm:$0xff] %vm224_vm2, %v5944_v5  ;;  %257 = vst.msk [vmem:[#allocation2 + $0xf8] sm:$0xff] %vm224_vm2, %v5944_v5  ;;  %v348_v22 = vld [vmem:[%s6164_s15 + $0x60] sm:$0xff]  ;;  %v349_v23 = vld [vmem:[%s6164_s15 + $0x68] sm:$0xff] }
  0x20   : > { %258 = vst.msk [vmem:[#allocation2 + $0x100] sm:$0x3] %vm227_vm3, %v5944_v5  ;;  %261 = vst.msk [vmem:[#allocation2 + $0x118] sm:$0x3] %vm227_vm3, %v5944_v5  ;;  %v350_v24 = vld [vmem:[%s6164_s15 + $0x70] sm:$0xff]  ;;  %v351_v25 = vld [vmem:[%s6164_s15 + $0x78] sm:$0xff] }
  0x21   : > { %259 = vst.msk [vmem:[#allocation2 + $0x108] sm:$0xff] %vm224_vm2, %v5944_v5  ;;  %260 = vst.msk [vmem:[#allocation2 + $0x110] sm:$0xff] %vm224_vm2, %v5944_v5  ;;  %v352_v26 = vld [vmem:[%s6164_s15 + $0x80] sm:$0xff]  ;;  %v353_v27 = vld [vmem:[%s6164_s15 + $0x88] sm:$0xff] }
  0x22   : > { %262 = vst.msk [vmem:[#allocation2 + $0x120] sm:$0xff] %vm224_vm2, %v5944_v5  ;;  %263 = vst.msk [vmem:[#allocation2 + $0x128] sm:$0xff] %vm224_vm2, %v5944_v5  ;;  %v354_v29 = vld [vmem:[%s6164_s15 + $0x90] sm:$0xff]  ;;  %v355_v30 = vld [vmem:[%s6164_s15 + $0x98] sm:$0xff] }
  0x23   : > { %264 = vst.msk [vmem:[#allocation2 + $0x130] sm:$0x3] %vm227_vm3, %v5944_v5  ;;  %267 = vst.msk [vmem:[#allocation2 + $0x148] sm:$0x3] %vm227_vm3, %v5944_v5  ;;  %v356_v31 = vld [vmem:[%s6164_s15 + $0xa0] sm:$0xff]  ;;  %v357_v32 = vld [vmem:[%s6164_s15 + $0xa8] sm:$0xff] }
  0x24   : > { %265 = vst.msk [vmem:[#allocation2 + $0x138] sm:$0xff] %vm224_vm2, %v5944_v5  ;;  %266 = vst.msk [vmem:[#allocation2 + $0x140] sm:$0xff] %vm224_vm2, %v5944_v5  ;;  %v358_v33 = vld [vmem:[%s6164_s15 + $0xb0] sm:$0xff]  ;;  %v359_v34 = vld [vmem:[%s6164_s15 + $0xb8] sm:$0xff] }
  0x25   : > { %268 = vst.msk [vmem:[#allocation2 + $0x150] sm:$0xff] %vm224_vm2, %v5944_v5  ;;  %269 = vst.msk [vmem:[#allocation2 + $0x158] sm:$0xff] %vm224_vm2, %v5944_v5  ;;  %v360_v50 = vld [vmem:[%s6164_s15 + $0xc0] sm:$0xff]  ;;  %v361_v51 = vld [vmem:[%s6164_s15 + $0xc8] sm:$0xff] }
  0x26   : > { %270 = vst.msk [vmem:[#allocation2 + $0x160] sm:$0x3] %vm227_vm3, %v5944_v5  ;;  %273 = vst.msk [vmem:[#allocation2 + $0x178] sm:$0x3] %vm227_vm3, %v5944_v5  ;;  %v362_v52 = vld [vmem:[%s6164_s15 + $0xd0] sm:$0xff]  ;;  %v363_v54 = vld [vmem:[%s6164_s15 + $0xd8] sm:$0xff] }
  0x27   : > { %271 = vst.msk [vmem:[#allocation2 + $0x168] sm:$0xff] %vm224_vm2, %v5944_v5  ;;  %272 = vst.msk [vmem:[#allocation2 + $0x170] sm:$0xff] %vm224_vm2, %v5944_v5  ;;  %v364_v55 = vld [vmem:[%s6164_s15 + $0xe0] sm:$0xff]  ;;  %v365_v56 = vld [vmem:[%s6164_s15 + $0xe8] sm:$0xff] }
  0x28   : > { %274 = vst.msk [vmem:[#allocation2 + $0x180] sm:$0xff] %vm224_vm2, %v5944_v5  ;;  %275 = vst.msk [vmem:[#allocation2 + $0x188] sm:$0xff] %vm224_vm2, %v5944_v5  ;;  %v366_v57 = vld [vmem:[%s6164_s15 + $0xf0] sm:$0xff]  ;;  %v367_v58 = vld [vmem:[%s6164_s15 + $0xf8] sm:$0xff] }
  0x29   : > { %276 = vst.msk [vmem:[#allocation2 + $0x190] sm:$0x3] %vm227_vm3, %v5944_v5  ;;  %279 = vst.msk [vmem:[#allocation2 + $0x1a8] sm:$0x3] %vm227_vm3, %v5944_v5  ;;  %v450_v59 = vld [vmem:[#allocation2 + $0x1] sm:$0xff]  ;;  %v451_v60 = vld [vmem:[#allocation2 + $0x9] sm:$0xff] }
  0x2a   : > { %277 = vst.msk [vmem:[#allocation2 + $0x198] sm:$0xff] %vm224_vm2, %v5944_v5  ;;  %278 = vst.msk [vmem:[#allocation2 + $0x1a0] sm:$0xff] %vm224_vm2, %v5944_v5  ;;  %v482_v63 = vpack.c.bf16 %v451_v60, %v450_v59 }
  0x2b   : > { %369 = vst.msk [vmem:[#allocation2 + $0x19] sm:$0xff] %vm224_vm2, %v336_v10  ;;  %370 = vst.msk [vmem:[#allocation2 + $0x21] sm:$0xff] %vm224_vm2, %v337_v11 }
  0x2c   : > { %371 = vst.msk [vmem:[#allocation2 + $0x31] sm:$0xff] %vm224_vm2, %v338_v12  ;;  %372 = vst.msk [vmem:[#allocation2 + $0x39] sm:$0xff] %vm224_vm2, %v339_v13  ;;  %5219 = vmatprep.mubr.msk.bf16.mxu1 %vm224_vm2, %v482_v63 }
  0x2d   : > { %373 = vst.msk [vmem:[#allocation2 + $0x49] sm:$0xff] %vm224_vm2, %v340_v14  ;;  %374 = vst.msk [vmem:[#allocation2 + $0x51] sm:$0xff] %vm224_vm2, %v341_v15 }
  0x2e   : > { %375 = vst.msk [vmem:[#allocation2 + $0x61] sm:$0xff] %vm224_vm2, %v342_v16  ;;  %376 = vst.msk [vmem:[#allocation2 + $0x69] sm:$0xff] %vm224_vm2, %v343_v17 }
  0x2f   : > { %377 = vst.msk [vmem:[#allocation2 + $0x79] sm:$0xff] %vm224_vm2, %v344_v18  ;;  %378 = vst.msk [vmem:[#allocation2 + $0x81] sm:$0xff] %vm224_vm2, %v345_v19 }
  0x30   : > { %379 = vst.msk [vmem:[#allocation2 + $0x91] sm:$0xff] %vm224_vm2, %v346_v20  ;;  %380 = vst.msk [vmem:[#allocation2 + $0x99] sm:$0xff] %vm224_vm2, %v347_v21 }
  0x31   : > { %381 = vst.msk [vmem:[#allocation2 + $0xa9] sm:$0xff] %vm224_vm2, %v348_v22  ;;  %382 = vst.msk [vmem:[#allocation2 + $0xb1] sm:$0xff] %vm224_vm2, %v349_v23 }
  0x32   : > { %383 = vst.msk [vmem:[#allocation2 + $0xc1] sm:$0xff] %vm224_vm2, %v350_v24  ;;  %384 = vst.msk [vmem:[#allocation2 + $0xc9] sm:$0xff] %vm224_vm2, %v351_v25  ;;  %v1222_v35 = vld [vmem:[#allocation2 + $0x18] sm:$0xff]  ;;  %v1223_v36 = vld [vmem:[#allocation2 + $0x20] sm:$0xff] }
  0x33   : > { %385 = vst.msk [vmem:[#allocation2 + $0xd9] sm:$0xff] %vm224_vm2, %v352_v26  ;;  %386 = vst.msk [vmem:[#allocation2 + $0xe1] sm:$0xff] %vm224_vm2, %v353_v27  ;;  %v1224_v37 = vld [vmem:[#allocation2 + $0x30] sm:$0xff]  ;;  %v6218_v38 = vpack.c.bf16 %v1223_v36, %v1222_v35  ;;  %v1225_v39 = vld [vmem:[#allocation2 + $0x38] sm:$0xff] }
  0x34   : > { %387 = vst.msk [vmem:[#allocation2 + $0xf1] sm:$0xff] %vm224_vm2, %v354_v29  ;;  %388 = vst.msk [vmem:[#allocation2 + $0xf9] sm:$0xff] %vm224_vm2, %v355_v30  ;;  %v1226_v40 = vld [vmem:[#allocation2 + $0x48] sm:$0xff]  ;;  %v1227_v41 = vld [vmem:[#allocation2 + $0x50] sm:$0xff]  ;;  %v6220_v42 = vpack.c.bf16 %v1225_v39, %v1224_v37 }
  0x35   : > { %389 = vst.msk [vmem:[#allocation2 + $0x109] sm:$0xff] %vm224_vm2, %v356_v31  ;;  %390 = vst.msk [vmem:[#allocation2 + $0x111] sm:$0xff] %vm224_vm2, %v357_v32  ;;  %v6222_v43 = vpack.c.bf16 %v1227_v41, %v1226_v40  ;;  %5321 = vmatprep.mubr.msk.bf16.mxu0 %vm224_vm2, %v6218_v38  ;;  %v1228_v45 = vld [vmem:[#allocation2 + $0x60] sm:$0xff]  ;;  %v1229_v46 = vld [vmem:[#allocation2 + $0x68] sm:$0xff] }
  0x36   : > { %391 = vst.msk [vmem:[#allocation2 + $0x121] sm:$0xff] %vm224_vm2, %v358_v33  ;;  %392 = vst.msk [vmem:[#allocation2 + $0x129] sm:$0xff] %vm224_vm2, %v359_v34  ;;  %5322 = vmatmul.mubr.msk.bf16.vlgmr.msra.gmra.mrb[0].mxu0 %vm224_vm2, %v6220_v42  ;;  %v1230_v47 = vld [vmem:[#allocation2 + $0x78] sm:$0xff]  ;;  %v1231_v48 = vld [vmem:[#allocation2 + $0x80] sm:$0xff]  ;;  %v6235_v49 = vpack.c.bf16 %v1229_v46, %v1228_v45 }
  0x37   : > { %5354 = vmatpush3.bf16.msra.mxu0 %v6157_v8  ;;  %5325 = vmatprep.mubr.msk.bf16.mxu0 %vm224_vm2, %v6222_v43  ;;  %v6240_v53 = vpack.c.bf16 %v1231_v48, %v1230_v47  ;;  %393 = vst.msk [vmem:[#allocation2 + $0x139] sm:$0xff] %vm224_vm2, %v360_v50  ;;  %394 = vst.msk [vmem:[#allocation2 + $0x141] sm:$0xff] %vm224_vm2, %v361_v51  ;;  %v452_v61 = vld [vmem:[#allocation2 + $0x19] sm:$0xff]  ;;  %v453_v62 = vld [vmem:[#allocation2 + $0x21] sm:$0xff] }
  0x38   : > { %5387 = vmatprep.subr.bf16.mxu0 %v6225_v44  ;;  %395 = vst.msk [vmem:[#allocation2 + $0x151] sm:$0xff] %vm224_vm2, %v362_v52  ;;  %396 = vst.msk [vmem:[#allocation2 + $0x159] sm:$0xff] %vm224_vm2, %v363_v54  ;;  %v6257_v0 = vpack.c.bf16 %v453_v62, %v452_v61  ;;  %v1518_v1 = vld [vmem:[#allocation2 + $0x31] sm:$0xff]  ;;  %v1519_v2 = vld [vmem:[#allocation2 + $0x39] sm:$0xff] }
  0x39   : > { %397 = vst.msk [vmem:[#allocation2 + $0x169] sm:$0xff] %vm224_vm2, %v364_v55  ;;  %398 = vst.msk [vmem:[#allocation2 + $0x171] sm:$0xff] %vm224_vm2, %v365_v56  ;;  %v1232_v3 = vld [vmem:[#allocation2 + $0x90] sm:$0xff]  ;;  %v1233_v6 = vld [vmem:[#allocation2 + $0x98] sm:$0xff]  ;;  %v6262_v9 = vpack.c.bf16 %v1519_v2, %v1518_v1 }
  0x3a   : > { %399 = vst.msk [vmem:[#allocation2 + $0x181] sm:$0xff] %vm224_vm2, %v366_v57  ;;  %400 = vst.msk [vmem:[#allocation2 + $0x189] sm:$0xff] %vm224_vm2, %v367_v58  ;;  %v1234_v7 = vld [vmem:[#allocation2 + $0xa8] sm:$0xff]  ;;  %v1235_v8 = vld [vmem:[#allocation2 + $0xb0] sm:$0xff]  ;;  %5220 = vmatmul.mubr.msk.bf16.vlgmr.msra.gmra.mrb[0].mxu1 %vm224_vm2, %v6257_v0  ;;  %v6266_v10 = vpack.c.bf16 %v1233_v6, %v1232_v3 }
  0x3b   : > { %5223 = vmatprep.mubr.msk.bf16.mxu1 %vm224_vm2, %v6262_v9  ;;  %v456_v11 = vld [vmem:[#allocation2 + $0x49] sm:$0xff]  ;;  %v457_v12 = vld [vmem:[#allocation2 + $0x51] sm:$0xff]  ;;  %v6270_v13 = vpack.c.bf16 %v1235_v8, %v1234_v7  ;;  %v1522_v15 = vld [vmem:[#allocation2 + $0x61] sm:$0xff]  ;;  %288 = vst.msk [vmem:[#allocation3 + $0x30] sm:$0xff] %vm280_vm4, %v5944_v5 }
  0x3c   : > { %v6272_v14 = vpack.c.bf16 %v457_v12, %v456_v11  ;;  %v1523_v16 = vld [vmem:[#allocation2 + $0x69] sm:$0xff]  ;;  %v1236_v17 = vld [vmem:[#allocation2 + $0xc0] sm:$0xff]  ;;  %v1238_v19 = vld [vmem:[#allocation2 + $0xd8] sm:$0xff]  ;;  %289 = vst.msk [vmem:[#allocation3 + $0x38] sm:$0xff] %vm280_vm4, %v5944_v5 }
  0x3d   : > { %v1237_v18 = vld [vmem:[#allocation2 + $0xc8] sm:$0xff]  ;;  %v1239_v20 = vld [vmem:[#allocation2 + $0xe0] sm:$0xff]  ;;  %v6278_v21 = vpack.c.bf16 %v1523_v16, %v1522_v15  ;;  %v1526_v29 = vld [vmem:[#allocation2 + $0x91] sm:$0xff]  ;;  %281 = vst.msk [vmem:[#allocation3] sm:$0xff] %vm280_vm4, %v5944_v5 }
  0x3e   : > { %5326 = vmatmul.mubr.msk.bf16.gmra.mrb[4].mxu0 %vm224_vm2, %v6235_v49  ;;  %v6282_v22 = vpack.c.bf16 %v1237_v18, %v1236_v17  ;;  %v460_v23 = vld [vmem:[#allocation2 + $0x79] sm:$0xff]  ;;  %v461_v24 = vld [vmem:[#allocation2 + $0x81] sm:$0xff]  ;;  %v6289_v26 = vpack.c.bf16 %v1239_v20, %v1238_v19  ;;  %v1240_v31 = vld [vmem:[#allocation2 + $0xf0] sm:$0xff]  ;;  %282 = vst.msk [vmem:[#allocation3 + $0x8] sm:$0xff] %vm280_vm4, %v5944_v5 }
  0x3f   : > { %5329 = vmatprep.mubr.msk.bf16.mxu0 %vm224_vm2, %v6240_v53  ;;  %v449_v25 = vld [vmem:[%s7635_s1] sm:$0x3]  ;;  %v6292_v28 = vpack.c.bf16 %v461_v24, %v460_v23  ;;  %v1241_v32 = vld [vmem:[#allocation2 + $0xf8] sm:$0xff]  ;;  %v1242_v33 = vld [vmem:[#allocation2 + $0x108] sm:$0xff]  ;;  %285 = vst.msk [vmem:[#allocation3 + $0x18] sm:$0xff] %vm280_vm4, %v5944_v5 }
  0x40   : > { %v765_v27 = vand.u32 %v6038_v4, %v449_v25  ;;  %v1527_v30 = vld [vmem:[#allocation2 + $0x99] sm:$0xff]  ;;  %v1243_v34 = vld [vmem:[#allocation2 + $0x110] sm:$0xff]  ;;  %v6302_v36 = vpack.c.bf16 %v1241_v32, %v1240_v31  ;;  %v1530_v41 = vld [vmem:[#allocation2 + $0xc1] sm:$0xff]  ;;  %286 = vst.msk [vmem:[#allocation3 + $0x20] sm:$0xff] %vm280_vm4, %v5944_v5 }
  0x41   : > { %v6298_v35 = vpack.c.bf16 %v1527_v30, %v1526_v29  ;;  %v464_v37 = vld [vmem:[#allocation2 + $0xa9] sm:$0xff]  ;;  %v465_v39 = vld [vmem:[#allocation2 + $0xb1] sm:$0xff]  ;;  %v6306_v40 = vpack.c.bf16 %v1243_v34, %v1242_v33  ;;  %v1244_v47 = vld [vmem:[#allocation2 + $0x120] sm:$0xff]  ;;  %291 = vst.msk [vmem:[#allocation3 + $0x48] sm:$0xff] %vm280_vm4, %v5944_v5 }
  0x42   : > { %5224 = vmatmul.mubr.msk.bf16.gmra.mrb[4].mxu1 %vm224_vm2, %v6272_v14  ;;  %5251 = vmatprep.subr.bf16.mxu1 %v765_v27  ;;  %v1531_v45 = vld [vmem:[#allocation2 + $0xc9] sm:$0xff]  ;;  %v6308_v46 = vpack.c.bf16 %v465_v39, %v464_v37  ;;  %v1246_v50 = vld [vmem:[#allocation2 + $0x138] sm:$0xff]  ;;  %v1247_v51 = vld [vmem:[#allocation2 + $0x140] sm:$0xff]  ;;  %292 = vst.msk [vmem:[#allocation3 + $0x50] sm:$0xff] %vm280_vm4, %v5944_v5 }
  0x43   : > { %5227 = vmatprep.mubr.msk.bf16.mxu1 %vm224_vm2, %v6278_v21  ;;  %5252 = vmatpush3.bf16.msra.mxu1 %v765_v27  ;;  %v1245_v48 = vld [vmem:[#allocation2 + $0x128] sm:$0xff]  ;;  %v6314_v52 = vpack.c.bf16 %v1531_v45, %v1530_v41  ;;  %v468_v54 = vld [vmem:[#allocation2 + $0xd9] sm:$0xff]  ;;  %v6322_v57 = vpack.c.bf16 %v1247_v51, %v1246_v50  ;;  %v1534_v59 = vld [vmem:[#allocation2 + $0xf1] sm:$0xff]  ;;  %294 = vst.msk [vmem:[#allocation3 + $0x60] sm:$0xff] %vm280_vm4, %v5944_v5 }
  0x44   : > { %v469_v55 = vld [vmem:[#allocation2 + $0xe1] sm:$0xff]  ;;  %v6318_v56 = vpack.c.bf16 %v1245_v48, %v1244_v47  ;;  %v1535_v60 = vld [vmem:[#allocation2 + $0xf9] sm:$0xff]  ;;  %v1248_v61 = vld [vmem:[#allocation2 + $0x150] sm:$0xff]  ;;  %295 = vst.msk [vmem:[#allocation3 + $0x68] sm:$0xff] %vm280_vm4, %v5944_v5 }
  0x45   : > { %v6324_v58 = vpack.c.bf16 %v469_v55, %v468_v54  ;;  %v1249_v62 = vld [vmem:[#allocation2 + $0x158] sm:$0xff]  ;;  %v1250_v63 = vld [vmem:[#allocation2 + $0x168] sm:$0xff]  ;;  %v1251_v1 = vld [vmem:[#allocation2 + $0x170] sm:$0xff]  ;;  %v6330_v2 = vpack.c.bf16 %v1535_v60, %v1534_v59  ;;  %297 = vst.msk [vmem:[#allocation3 + $0x78] sm:$0xff] %vm280_vm4, %v5944_v5 }
  0x46   : > { %5330 = vmatmul.mubr.msk.bf16.gmra.mrb[8].mxu0 %vm224_vm2, %v6266_v10  ;;  %v6334_v3 = vpack.c.bf16 %v1249_v62, %v1248_v61  ;;  %v472_v6 = vld [vmem:[#allocation2 + $0x109] sm:$0xff]  ;;  %v473_v7 = vld [vmem:[#allocation2 + $0x111] sm:$0xff]  ;;  %v6338_v8 = vpack.c.bf16 %v1251_v1, %v1250_v63  ;;  %v1538_v12 = vld [vmem:[#allocation2 + $0x121] sm:$0xff]  ;;  %298 = vst.msk [vmem:[#allocation3 + $0x80] sm:$0xff] %vm280_vm4, %v5944_v5 }
  0x47   : > { %5333 = vmatprep.mubr.msk.bf16.mxu0 %vm224_vm2, %v6270_v13  ;;  %v6340_v11 = vpack.c.bf16 %v473_v7, %v472_v6  ;;  %v1539_v15 = vld [vmem:[#allocation2 + $0x129] sm:$0xff]  ;;  %v1252_v16 = vld [vmem:[#allocation2 + $0x180] sm:$0xff]  ;;  %v1542_v27 = vld [vmem:[#allocation2 + $0x151] sm:$0xff]  ;;  %300 = vst.msk [vmem:[#allocation3 + $0x90] sm:$0xff] %vm280_vm4, %v5944_v5 }
  0x48   : > { %v1253_v17 = vld [vmem:[#allocation2 + $0x188] sm:$0xff]  ;;  %v6346_v18 = vpack.c.bf16 %v1539_v15, %v1538_v12  ;;  %v476_v20 = vld [vmem:[#allocation2 + $0x139] sm:$0xff]  ;;  %v4772_v24 = vld [vmem:[%s7635_s1 + $0x4] sm:$0x3]  ;;  %301 = vst.msk [vmem:[#allocation3 + $0x98] sm:$0xff] %vm280_vm4, %v5944_v5 }
  0x49   : > { %v6350_v19 = vpack.c.bf16 %v1253_v17, %v1252_v16  ;;  %v477_v23 = vld [vmem:[#allocation2 + $0x141] sm:$0xff]  ;;  %v1543_v29 = vld [vmem:[#allocation2 + $0x159] sm:$0xff]  ;;  %v1027_v30 = vand.u32 %v4772_v24, %v6038_v4  ;;  %v4840_v32 = vld [vmem:[%s7635_s1 + $0xc] sm:$0x3]  ;;  %303 = vst.msk [vmem:[#allocation3 + $0xa8] sm:$0xff] %vm280_vm4, %v5944_v5 }
  0x4a   : > { %5228 = vmatmul.mubr.msk.bf16.gmra.mrb[8].mxu1 %vm224_vm2, %v6292_v28  ;;  %v6357_v25 = vpack.c.bf16 %v477_v23, %v476_v20  ;;  %v6364_v31 = vpack.c.bf16 %v1543_v29, %v1542_v27  ;;  %v480_v33 = vld [vmem:[#allocation2 + $0x169] sm:$0xff]  ;;  %v481_v34 = vld [vmem:[#allocation2 + $0x171] sm:$0xff]  ;;  %v401_v37 = vld [vmem:[#allocation2] sm:$0xff]  ;;  %v2204_v41 = vand.u32 %v4840_v32, %v6038_v4  ;;  %304 = vst.msk [vmem:[#allocation3 + $0xb0] sm:$0xff] %vm280_vm4, %v5944_v5 }
  0x4b   : > { %5231 = vmatprep.mubr.msk.bf16.mxu1 %vm224_vm2, %v6298_v35  ;;  %5285 = vmatprep.subr.bf16.mxu1 %v1027_v30  ;;  %v402_v39 = vld [vmem:[#allocation2 + $0x8] sm:$0xff]  ;;  %v1810_v47 = vld [vmem:[#allocation2 + $0x1a] sm:$0xff]  ;;  %v1812_v54 = vld [vmem:[#allocation2 + $0x32] sm:$0xff]  ;;  %306 = vst.msk [vmem:[#allocation3 + $0xc0] sm:$0xff] %vm280_vm4, %v5944_v5 }
  0x4c   : > { %v433_v45 = vpack.c.bf16 %v402_v39, %v401_v37  ;;  %v1811_v48 = vld [vmem:[#allocation2 + $0x22] sm:$0xff]  ;;  %v1813_v55 = vld [vmem:[#allocation2 + $0x3a] sm:$0xff]  ;;  %v1814_v59 = vld [vmem:[#allocation2 + $0x4a] sm:$0xff]  ;;  %307 = vst.msk [vmem:[#allocation3 + $0xc8] sm:$0xff] %vm280_vm4, %v5944_v5 }
  0x4d   : > { %v1842_v51 = vpack.c.bf16 %v1811_v48, %v1810_v47  ;;  %v1815_v60 = vld [vmem:[#allocation2 + $0x52] sm:$0xff]  ;;  %v4857_v61 = vld [vmem:[%s7635_s1 + $0xe] sm:$0x3]  ;;  %v6442_v62 = vpack.c.bf16 %v1813_v55, %v1812_v54  ;;  %v928_v1 = vld [vmem:[#allocation2 + $0x2] sm:$0xff]  ;;  %309 = vst.msk [vmem:[#allocation3 + $0xd8] sm:$0xff] %vm280_vm4, %v5944_v5 }
  0x4e   : > { %5334 = vmatmul.mubr.msk.bf16.gmra.mrb[12].mxu0 %vm224_vm2, %v6282_v22  ;;  %v6446_v63 = vpack.c.bf16 %v1815_v60, %v1814_v59  ;;  %v929_v6 = vld [vmem:[#allocation2 + $0xa] sm:$0xff]  ;;  %v6449_v7 = vand.u32 %v4857_v61, %v6038_v4  ;;  %v1816_v15 = vld [vmem:[#allocation2 + $0x62] sm:$0xff]  ;;  %v1818_v17 = vld [vmem:[#allocation2 + $0x7a] sm:$0xff]  ;;  %310 = vst.msk [vmem:[#allocation3 + $0xe0] sm:$0xff] %vm280_vm4, %v5944_v5 }
  0x4f   : > { %5337 = vmatprep.mubr.msk.bf16.mxu0 %vm224_vm2, %v6289_v26  ;;  %v960_v12 = vpack.c.bf16 %v929_v6, %v928_v1  ;;  %v1817_v16 = vld [vmem:[#allocation2 + $0x6a] sm:$0xff]  ;;  %v1819_v20 = vld [vmem:[#allocation2 + $0x82] sm:$0xff]  ;;  %v1820_v27 = vld [vmem:[#allocation2 + $0x92] sm:$0xff]  ;;  %312 = vst.msk [vmem:[#allocation3 + $0xf0] sm:$0xff] %vm280_vm4, %v5944_v5 }
  0x50   : > { %v6458_v23 = vpack.c.bf16 %v1817_v16, %v1816_v15  ;;  %v6461_v24 = vpack.c.bf16 %v1819_v20, %v1818_v17  ;;  %v1821_v29 = vld [vmem:[#allocation2 + $0x9a] sm:$0xff]  ;;  %v1823_v32 = vld [vmem:[#allocation2 + $0xb2] sm:$0xff]  ;;  %v1824_v37 = vld [vmem:[#allocation2 + $0xc2] sm:$0xff]  ;;  %313 = vst.msk [vmem:[#allocation3 + $0xf8] sm:$0xff] %vm280_vm4, %v5944_v5 }
  0x51   : > { %v1825_v39 = vld [vmem:[#allocation2 + $0xca] sm:$0xff]  ;;  %v1828_v47 = vld [vmem:[#allocation2 + $0xf2] sm:$0xff]  ;;  %v1829_v48 = vld [vmem:[#allocation2 + $0xfa] sm:$0xff]  ;;  %315 = vst.msk [vmem:[#allocation3 + $0x108] sm:$0xff] %vm280_vm4, %v5944_v5 }
  0x52   : > { %5232 = vmatmul.mubr.msk.bf16.gmra.mrb[12].mxu1 %vm224_vm2, %v6308_v46  ;;  %v1831_v54 = vld [vmem:[#allocation2 + $0x112] sm:$0xff]  ;;  %v6492_v55 = vpack.c.bf16 %v1829_v48, %v1828_v47  ;;  %v1832_v60 = vld [vmem:[#allocation2 + $0x122] sm:$0xff]  ;;  %v1833_v61 = vld [vmem:[#allocation2 + $0x12a] sm:$0xff]  ;;  %316 = vst.msk [vmem:[#allocation3 + $0x110] sm:$0xff] %vm280_vm4, %v5944_v5 }
  0x53   : > { %5235 = vmatprep.mubr.msk.bf16.mxu1 %vm224_vm2, %v6314_v52  ;;  %v1834_v1 = vld [vmem:[#allocation2 + $0x13a] sm:$0xff]  ;;  %v1835_v6 = vld [vmem:[#allocation2 + $0x142] sm:$0xff]  ;;  %v1836_v16 = vld [vmem:[#allocation2 + $0x152] sm:$0xff]  ;;  %318 = vst.msk [vmem:[#allocation3 + $0x120] sm:$0xff] %vm280_vm4, %v5944_v5 }
  0x54   : > { %v6508_v15 = vpack.c.bf16 %v1835_v6, %v1834_v1  ;;  %v1837_v17 = vld [vmem:[#allocation2 + $0x15a] sm:$0xff]  ;;  %v1838_v20 = vld [vmem:[#allocation2 + $0x16a] sm:$0xff]  ;;  %319 = vst.msk [vmem:[#allocation3 + $0x128] sm:$0xff] %vm280_vm4, %v5944_v5  ;;  %321 = vst.msk [vmem:[#allocation3 + $0x138] sm:$0xff] %vm280_vm4, %v5944_v5 }
  0x55   : > { %322 = vst.msk [vmem:[#allocation3 + $0x140] sm:$0xff] %vm280_vm4, %v5944_v5  ;;  %324 = vst.msk [vmem:[#allocation3 + $0x150] sm:$0xff] %vm280_vm4, %v5944_v5  ;;  %v3284_v48 = vld [vmem:[#allocation3 + $0x2] sm:$0xff] }
  0x56   : > { %5338 = vmatmul.mubr.msk.bf16.gmra.mrb[16].mxu0 %vm224_vm2, %v6302_v36  ;;  %325 = vst.msk [vmem:[#allocation3 + $0x158] sm:$0xff] %vm280_vm4, %v5944_v5  ;;  %327 = vst.msk [vmem:[#allocation3 + $0x168] sm:$0xff] %vm280_vm4, %v5944_v5  ;;  %v3092_v1 = vld [vmem:[#allocation3 + $0x8] sm:$0xff]  ;;  %v3091_v6 = vld [vmem:[#allocation3] sm:$0xff] }
  0x57   : > { %5341 = vmatprep.mubr.msk.bf16.mxu0 %vm224_vm2, %v6306_v40  ;;  %328 = vst.msk [vmem:[#allocation3 + $0x170] sm:$0xff] %vm280_vm4, %v5944_v5  ;;  %330 = vst.msk [vmem:[#allocation3 + $0x180] sm:$0xff] %vm280_vm4, %v5944_v5 }
  0x58   : > { %331 = vst.msk [vmem:[#allocation3 + $0x188] sm:$0xff] %vm280_vm4, %v5944_v5  ;;  %333 = vst.msk [vmem:[#allocation3 + $0x198] sm:$0xff] %vm280_vm4, %v5944_v5 }
  0x59   : > { %334 = vst.msk [vmem:[#allocation3 + $0x1a0] sm:$0xff] %vm280_vm4, %v5944_v5 }
  0x5a   : > { %5236 = vmatmul.mubr.msk.bf16.gmra.mrb[16].mxu1 %vm224_vm2, %v6324_v58  ;;  %290 = vst.msk [vmem:[#allocation3 + $0x40] sm:$0x3] %vm283_vm5, %v5944_v5  ;;  %284 = vst.msk [vmem:[#allocation3 + $0x10] sm:$0x3] %vm283_vm5, %v5944_v5 }
  0x5b   : > { %5239 = vmatprep.mubr.msk.bf16.mxu1 %vm224_vm2, %v6330_v2  ;;  %287 = vst.msk [vmem:[#allocation3 + $0x28] sm:$0x3] %vm283_vm5, %v5944_v5  ;;  %293 = vst.msk [vmem:[#allocation3 + $0x58] sm:$0x3] %vm283_vm5, %v5944_v5 }
  0x5c   : > { %296 = vst.msk [vmem:[#allocation3 + $0x70] sm:$0x3] %vm283_vm5, %v5944_v5  ;;  %299 = vst.msk [vmem:[#allocation3 + $0x88] sm:$0x3] %vm283_vm5, %v5944_v5 }
  0x5d   : > { %302 = vst.msk [vmem:[#allocation3 + $0xa0] sm:$0x3] %vm283_vm5, %v5944_v5  ;;  %305 = vst.msk [vmem:[#allocation3 + $0xb8] sm:$0x3] %vm283_vm5, %v5944_v5 }
  0x5e   : > { %5342 = vmatmul.mubr.msk.bf16.gmra.mrb[20].mxu0 %vm224_vm2, %v6318_v56  ;;  %308 = vst.msk [vmem:[#allocation3 + $0xd0] sm:$0x3] %vm283_vm5, %v5944_v5  ;;  %311 = vst.msk [vmem:[#allocation3 + $0xe8] sm:$0x3] %vm283_vm5, %v5944_v5 }
  0x5f   : > { %5345 = vmatprep.mubr.msk.bf16.mxu0 %vm224_vm2, %v6322_v57  ;;  %314 = vst.msk [vmem:[#allocation3 + $0x100] sm:$0x3] %vm283_vm5, %v5944_v5  ;;  %317 = vst.msk [vmem:[#allocation3 + $0x118] sm:$0x3] %vm283_vm5, %v5944_v5 }
  0x60   : > { %320 = vst.msk [vmem:[#allocation3 + $0x130] sm:$0x3] %vm283_vm5, %v5944_v5  ;;  %323 = vst.msk [vmem:[#allocation3 + $0x148] sm:$0x3] %vm283_vm5, %v5944_v5 }
  0x61   : > { %326 = vst.msk [vmem:[#allocation3 + $0x160] sm:$0x3] %vm283_vm5, %v5944_v5  ;;  %329 = vst.msk [vmem:[#allocation3 + $0x178] sm:$0x3] %vm283_vm5, %v5944_v5 }
  0x62   : > { %5240 = vmatmul.mubr.msk.bf16.gmra.mrb[20].mxu1 %vm224_vm2, %v6340_v11  ;;  %332 = vst.msk [vmem:[#allocation3 + $0x190] sm:$0x3] %vm283_vm5, %v5944_v5  ;;  %335 = vst.msk [vmem:[#allocation3 + $0x1a8] sm:$0x3] %vm283_vm5, %v5944_v5  ;;  %v5862_v5 = vld [vmem:[%s7637_s3] sm:$0xff]  }
  0x63   : > { %5243 = vmatprep.mubr.msk.bf16.mxu1 %vm224_vm2, %v6346_v18 }
  0x66   : > { %5346 = vmatmul.mubr.msk.bf16.gmra.mrb[24].mxu0 %vm224_vm2, %v6334_v3 }
  0x67   : > { %5349 = vmatprep.mubr.msk.bf16.mxu0 %vm224_vm2, %v6338_v8 }
  0x6a   : > { %5244 = vmatmul.mubr.msk.bf16.gmra.mrb[24].mxu1 %vm224_vm2, %v6357_v25 }
  0x6b   : > { %5247 = vmatprep.mubr.msk.bf16.mxu1 %vm224_vm2, %v6364_v31 }
  0x6e   : > { %5350 = vmatmul.mubr.msk.bf16.gmra.mrb[28].mxu0 %vm224_vm2, %v6350_v19 }
  0x6f   : > { %5355 = vmatprep.mubr.msk.bf16.mxu0 %vm224_vm2, %v6257_v0  ;;  %v6374_v0 = vpack.c.bf16 %v481_v34, %v480_v33  ;;  %v6468_v33 = vpack.c.bf16 %v1821_v29, %v1820_v27  ;;  %v1839_v27 = vld [vmem:[#allocation2 + $0x172] sm:$0xff]  ;;  %v6516_v29 = vpack.c.bf16 %v1837_v17, %v1836_v16  ;;  %v6824_v16 = vld [vmem:[%s7636_s2] ss:$0 sm:$0xff]  ;;  %v3123_v17 = vpack.c.bf16 %v3092_v1, %v3091_v6 }
  0x71   : > { %3139 = vst.msk [vmem:[#allocation4] sm:$0xff] %vm280_vm4, %v3123_v17  ;;  %v5869_v17 = vld [vmem:[%s7637_s3 + $0x60] sm:$0xff]  }
  0x72   : > { %5248 = vmatmul.mubr.msk.bf16.gmra.mrb[28].mxu1 %vm224_vm2, %v6374_v0 }
  0x73   : > { %5253 = vmatprep.mubr.msk.bf16.mxu1 %vm224_vm2, %v433_v45  ;;  %v1827_v45 = vld [vmem:[#allocation2 + $0xe2] sm:$0xff] }
  0x76   : > { %5356 = vmatmul.mubr.msk.bf16.vlgmr.msra.gmra.mrb[0].mxu0 %vm224_vm2, %v6262_v9 }
  0x77   : > { %5388 = vmatpush3.bf16.msra.mxu0 %v6225_v44  ;;  %5359 = vmatprep.mubr.msk.bf16.mxu0 %vm224_vm2, %v6272_v14  ;;  %v1547_v44 = vld [vmem:[#allocation2 + $0x189] sm:$0xff] }
  0x78   : > { %5421 = vmatprep.subr.bf16.mxu0 %v2204_v41 }
  0x7a   : > { %5254 = vmatmul.mubr.msk.bf16.vlgmr.msra.gmra.mrb[0].mxu1 %vm224_vm2, %v6218_v38  ;;  %v1546_v38 = vld [vmem:[#allocation2 + $0x181] sm:$0xff] }
  0x7b   : > { %5257 = vmatprep.mubr.msk.bf16.mxu1 %vm224_vm2, %v6220_v42  ;;  %5286 = vmatpush3.bf16.msra.mxu1 %v1027_v30  ;;  %v6430_v50 = vpack.c.bf16 %v1547_v44, %v1546_v38  ;;  %v1822_v30 = vld [vmem:[#allocation2 + $0xaa] sm:$0xff]  ;;  %v6480_v38 = vpack.c.bf16 %v1825_v39, %v1824_v37 }
  0x7c   : > { %v6472_v34 = vpack.c.bf16 %v1823_v32, %v1822_v30  ;;  %v6520_v30 = vpack.c.bf16 %v1839_v27, %v1838_v20  ;;  %v1840_v32 = vld [vmem:[#allocation2 + $0x182] sm:$0xff]  ;;  %v1841_v37 = vld [vmem:[#allocation2 + $0x18a] sm:$0xff] }
  0x7d   : > { %v6528_v39 = vpack.c.bf16 %v1841_v37, %v1840_v32  ;;  %v5864_v20 = vld [vmem:[%s7637_s3 + $0x8] sm:$0xff]  }
  0x7e   : > { %5360 = vmatmul.mubr.msk.bf16.gmra.mrb[4].mxu0 %vm224_vm2, %v6278_v21 }
  0x7f   : > { %5363 = vmatprep.mubr.msk.bf16.mxu0 %vm224_vm2, %v6292_v28 }
  0x82   : > { %5258 = vmatmul.mubr.msk.bf16.gmra.mrb[4].mxu1 %vm224_vm2, %v6222_v43 }
  0x83   : > { %5261 = vmatprep.mubr.msk.bf16.mxu1 %vm224_vm2, %v6235_v49 }
  0x86   : > { %5364 = vmatmul.mubr.msk.bf16.gmra.mrb[8].mxu0 %vm224_vm2, %v6298_v35 }
  0x87   : > { %5367 = vmatprep.mubr.msk.bf16.mxu0 %vm224_vm2, %v6308_v46 }
  0x8a   : > { %5262 = vmatmul.mubr.msk.bf16.gmra.mrb[8].mxu1 %vm224_vm2, %v6240_v53 }
  0x8b   : > { %5265 = vmatprep.mubr.msk.bf16.mxu1 %vm224_vm2, %v6266_v10 }
  0x8e   : > { %5368 = vmatmul.mubr.msk.bf16.gmra.mrb[12].mxu0 %vm224_vm2, %v6314_v52 }
  0x8f   : > { %5371 = vmatprep.mubr.msk.bf16.mxu0 %vm224_vm2, %v6324_v58 }
  0x92   : > { %5266 = vmatmul.mubr.msk.bf16.gmra.mrb[12].mxu1 %vm224_vm2, %v6270_v13 }
  0x93   : > { %5269 = vmatprep.mubr.msk.bf16.mxu1 %vm224_vm2, %v6282_v22 }
  0x96   : > { %5372 = vmatmul.mubr.msk.bf16.gmra.mrb[16].mxu0 %vm224_vm2, %v6330_v2 }
  0x97   : > { %5375 = vmatprep.mubr.msk.bf16.mxu0 %vm224_vm2, %v6340_v11 }
  0x9a   : > { %5270 = vmatmul.mubr.msk.bf16.gmra.mrb[16].mxu1 %vm224_vm2, %v6289_v26 }
  0x9b   : > { %5273 = vmatprep.mubr.msk.bf16.mxu1 %vm224_vm2, %v6302_v36 }
  0x9e   : > { %5376 = vmatmul.mubr.msk.bf16.gmra.mrb[20].mxu0 %vm224_vm2, %v6346_v18 }
  0x9f   : > { %5379 = vmatprep.mubr.msk.bf16.mxu0 %vm224_vm2, %v6357_v25 }
  0xa2   : > { %5274 = vmatmul.mubr.msk.bf16.gmra.mrb[20].mxu1 %vm224_vm2, %v6306_v40 }
  0xa3   : > { %5277 = vmatprep.mubr.msk.bf16.mxu1 %vm224_vm2, %v6318_v56 }
  0xa6   : > { %5380 = vmatmul.mubr.msk.bf16.gmra.mrb[24].mxu0 %vm224_vm2, %v6364_v31 }
  0xa7   : > { %5383 = vmatprep.mubr.msk.bf16.mxu0 %vm224_vm2, %v6374_v0 }
  0xaa   : > { %5278 = vmatmul.mubr.msk.bf16.gmra.mrb[24].mxu1 %vm224_vm2, %v6322_v57 }
  0xab   : > { %5281 = vmatprep.mubr.msk.bf16.mxu1 %vm224_vm2, %v6334_v3 }
  0xae   : > { %5384 = vmatmul.mubr.msk.bf16.gmra.mrb[28].mxu0 %vm224_vm2, %v6430_v50 }
  0xaf   : > { %5389 = vmatprep.mubr.msk.bf16.mxu0 %vm224_vm2, %v1842_v51 }
  0xb2   : > { %5282 = vmatmul.mubr.msk.bf16.gmra.mrb[28].mxu1 %vm224_vm2, %v6338_v8 }
  0xb3   : > { %5287 = vmatprep.mubr.msk.bf16.mxu1 %vm224_vm2, %v960_v12  ;;  %v6504_v12 = vpack.c.bf16 %v1833_v61, %v1832_v60  ;;  %v5861_v61 = vld [vmem:[%s7637_s3 + $0x40] sm:$0xff]  }
  0xb4   : > { %5087 = vmatprep.subr.bf16.mxu1 %v5861_v61 }
  0xb6   : > { %5390 = vmatmul.mubr.msk.bf16.vlgmr.msra.gmra.mrb[0].mxu0 %vm224_vm2, %v6442_v62 }
  0xb7   : > { %5422 = vmatpush3.bf16.msra.mxu0 %v2204_v41  ;;  %5393 = vmatprep.mubr.msk.bf16.mxu0 %vm224_vm2, %v6446_v63  ;;  %v1826_v41 = vld [vmem:[#allocation2 + $0xda] sm:$0xff] }
  0xb8   : > { %5455 = vmatprep.subr.bf16.mxu0 %v6449_v7  ;;  %v6484_v44 = vpack.c.bf16 %v1827_v45, %v1826_v41  ;;  %v4874_v41 = vld [vmem:[%s7635_s1 + $0x10] sm:$0x3] }
  0xb9   : > { %v2792_v45 = vand.u32 %v4874_v41, %v6038_v4  ;;  %v2135_v4 = vld [vmem:[#allocation2 + $0x198] sm:$0xff] }
  0xba   : > { %5288 = vmatmul.mubr.msk.bf16.vlgmr.msra.gmra.mrb[0].mxu1 %vm224_vm2, %v1842_v51  ;;  %v1830_v51 = vld [vmem:[#allocation2 + $0x10a] sm:$0xff] }
  0xbb   : > { %5291 = vmatprep.mubr.msk.bf16.mxu1 %vm224_vm2, %v6442_v62  ;;  %v6496_v59 = vpack.c.bf16 %v1831_v54, %v1830_v51  ;;  %v3285_v51 = vld [vmem:[#allocation3 + $0xa] sm:$0xff]  ;;  %v3155_v54 = vld [vmem:[#allocation3 + $0x1] sm:$0xff]  ;;  %5088 = vmatpush3.bf16.msra.mxu1 %v5862_v5 }
  0xbe   : > { %5394 = vmatmul.mubr.msk.bf16.gmra.mrb[4].mxu0 %vm224_vm2, %v6458_v23 }
  0xbf   : > { %5397 = vmatprep.mubr.msk.bf16.mxu0 %vm224_vm2, %v6461_v24 }
  0xc2   : > { %5292 = vmatmul.mubr.msk.bf16.gmra.mrb[4].mxu1 %vm224_vm2, %v6446_v63 }
  0xc3   : > { %5295 = vmatprep.mubr.msk.bf16.mxu1 %vm224_vm2, %v6458_v23 }
  0xc6   : > { %5398 = vmatmul.mubr.msk.bf16.gmra.mrb[8].mxu0 %vm224_vm2, %v6468_v33 }
  0xc7   : > { %5401 = vmatprep.mubr.msk.bf16.mxu0 %vm224_vm2, %v6472_v34 }
  0xca   : > { %5296 = vmatmul.mubr.msk.bf16.gmra.mrb[8].mxu1 %vm224_vm2, %v6461_v24 }
  0xcb   : > { %5299 = vmatprep.mubr.msk.bf16.mxu1 %vm224_vm2, %v6468_v33 }
  0xce   : > { %5402 = vmatmul.mubr.msk.bf16.gmra.mrb[12].mxu0 %vm224_vm2, %v6480_v38 }
  0xcf   : > { %5405 = vmatprep.mubr.msk.bf16.mxu0 %vm224_vm2, %v6484_v44 }
  0xd2   : > { %5300 = vmatmul.mubr.msk.bf16.gmra.mrb[12].mxu1 %vm224_vm2, %v6472_v34 }
  0xd3   : > { %5303 = vmatprep.mubr.msk.bf16.mxu1 %vm224_vm2, %v6480_v38 }
  0xd6   : > { %5406 = vmatmul.mubr.msk.bf16.gmra.mrb[16].mxu0 %vm224_vm2, %v6492_v55 }
  0xd7   : > { %5409 = vmatprep.mubr.msk.bf16.mxu0 %vm224_vm2, %v6496_v59 }
  0xda   : > { %5304 = vmatmul.mubr.msk.bf16.gmra.mrb[16].mxu1 %vm224_vm2, %v6484_v44 }
  0xdb   : > { %5307 = vmatprep.mubr.msk.bf16.mxu1 %vm224_vm2, %v6492_v55 }
  0xde   : > { %5410 = vmatmul.mubr.msk.bf16.gmra.mrb[20].mxu0 %vm224_vm2, %v6504_v12 }
  0xdf   : > { %5413 = vmatprep.mubr.msk.bf16.mxu0 %vm224_vm2, %v6508_v15 }
  0xe2   : > { %5308 = vmatmul.mubr.msk.bf16.gmra.mrb[20].mxu1 %vm224_vm2, %v6496_v59 }
  0xe3   : > { %5311 = vmatprep.mubr.msk.bf16.mxu1 %vm224_vm2, %v6504_v12 }
  0xe6   : > { %5414 = vmatmul.mubr.msk.bf16.gmra.mrb[24].mxu0 %vm224_vm2, %v6516_v29 }
  0xe7   : > { %5417 = vmatprep.mubr.msk.bf16.mxu0 %vm224_vm2, %v6520_v30 }
  0xea   : > { %5312 = vmatmul.mubr.msk.bf16.gmra.mrb[24].mxu1 %vm224_vm2, %v6508_v15 }
  0xeb   : > { %5315 = vmatprep.mubr.msk.bf16.mxu1 %vm224_vm2, %v6516_v29 }
  0xee   : > { %5418 = vmatmul.mubr.msk.bf16.gmra.mrb[28].mxu0 %vm224_vm2, %v6528_v39 }
  0xef   : > { %5423 = vmatprep.mubr.msk.bf16.mxu0 %vm224_vm2, %v6220_v42  ;;  %v2136_v42 = vld [vmem:[#allocation2 + $0x1a0] sm:$0xff] }
  0xf2   : > { %5316 = vmatmul.mubr.msk.bf16.gmra.mrb[28].mxu1 %vm224_vm2, %v6520_v30 }
  0xf6   : > { %5424 = vmatmul.mubr.msk.bf16.vlgmr.msra.gmra.mrb[0].mxu0 %vm224_vm2, %v6222_v43  ;;  %v2152_v43 = vpack.c.bf16 %v2136_v42, %v2135_v4 }
  0xf7   : > { %5456 = vmatpush3.bf16.msra.mxu0 %v6449_v7  ;;  %5427 = vmatprep.mubr.msk.bf16.mxu0 %vm224_vm2, %v6235_v49  ;;  %v2429_v49 = vld [vmem:[#allocation2 + $0x199] sm:$0xff] }
  0xf8   : > { %5489 = vmatprep.subr.bf16.mxu0 %v2792_v45 }
  0xfe   : > { %5428 = vmatmul.mubr.msk.bf16.gmra.mrb[4].mxu0 %vm224_vm2, %v6240_v53  ;;  %v2430_v53 = vld [vmem:[#allocation2 + $0x1a1] sm:$0xff] }
  0xff   : > { %5431 = vmatprep.mubr.msk.bf16.mxu0 %vm224_vm2, %v6266_v10 }
 0x106   : > { %5432 = vmatmul.mubr.msk.bf16.gmra.mrb[8].mxu0 %vm224_vm2, %v6270_v13 }
 0x107   : > { %5435 = vmatprep.mubr.msk.bf16.mxu0 %vm224_vm2, %v6282_v22 }
 0x10e   : > { %5436 = vmatmul.mubr.msk.bf16.gmra.mrb[12].mxu0 %vm224_vm2, %v6289_v26 }
 0x10f   : > { %5439 = vmatprep.mubr.msk.bf16.mxu0 %vm224_vm2, %v6302_v36 }
 0x116   : > { %5440 = vmatmul.mubr.msk.bf16.gmra.mrb[16].mxu0 %vm224_vm2, %v6306_v40 }
 0x117   : > { %5443 = vmatprep.mubr.msk.bf16.mxu0 %vm224_vm2, %v6318_v56  ;;  %v2724_v56 = vld [vmem:[#allocation2 + $0x1a2] sm:$0xff] }
 0x11e   : > { %5444 = vmatmul.mubr.msk.bf16.gmra.mrb[20].mxu0 %vm224_vm2, %v6322_v57 }
 0x11f   : > { %5447 = vmatprep.mubr.msk.bf16.mxu0 %vm224_vm2, %v6334_v3 }
 0x126   : > { %5448 = vmatmul.mubr.msk.bf16.gmra.mrb[24].mxu0 %vm224_vm2, %v6338_v8 }
 0x127   : > { %5451 = vmatprep.mubr.msk.bf16.mxu0 %vm224_vm2, %v6350_v19 }
 0x12e   : > { %5452 = vmatmul.mubr.msk.bf16.gmra.mrb[28].mxu0 %vm224_vm2, %v2152_v43 }
 0x12f   : > { %5457 = vmatprep.mubr.msk.bf16.mxu0 %vm224_vm2, %v6262_v9  ;;  %v2446_v9 = vpack.c.bf16 %v2430_v53, %v2429_v49 }
 0x136   : > { %5458 = vmatmul.mubr.msk.bf16.vlgmr.msra.gmra.mrb[0].mxu0 %vm224_vm2, %v6272_v14 }
 0x137   : > { %5490 = vmatpush3.bf16.msra.mxu0 %v2792_v45  ;;  %5461 = vmatprep.mubr.msk.bf16.mxu0 %vm224_vm2, %v6278_v21 }
 0x13e   : > { %5462 = vmatmul.mubr.msk.bf16.gmra.mrb[4].mxu0 %vm224_vm2, %v6292_v28 }
 0x13f   : > { %5465 = vmatprep.mubr.msk.bf16.mxu0 %vm224_vm2, %v6298_v35 }
 0x146   : > { %5466 = vmatmul.mubr.msk.bf16.gmra.mrb[8].mxu0 %vm224_vm2, %v6308_v46 }
 0x147   : > { %5469 = vmatprep.mubr.msk.bf16.mxu0 %vm224_vm2, %v6314_v52  ;;  %v2723_v52 = vld [vmem:[#allocation2 + $0x19a] sm:$0xff] }
 0x14e   : > { %5470 = vmatmul.mubr.msk.bf16.gmra.mrb[12].mxu0 %vm224_vm2, %v6324_v58  ;;  %v2740_v58 = vpack.c.bf16 %v2724_v56, %v2723_v52 }
 0x14f   : > { %5473 = vmatprep.mubr.msk.bf16.mxu0 %vm224_vm2, %v6330_v2 }
 0x156   : > { %5474 = vmatmul.mubr.msk.bf16.gmra.mrb[16].mxu0 %vm224_vm2, %v6340_v11 }
 0x157   : > { %5477 = vmatprep.mubr.msk.bf16.mxu0 %vm224_vm2, %v6346_v18 }
 0x15e   : > { %5478 = vmatmul.mubr.msk.bf16.gmra.mrb[20].mxu0 %vm224_vm2, %v6357_v25 }
 0x15f   : > { %5481 = vmatprep.mubr.msk.bf16.mxu0 %vm224_vm2, %v6364_v31 }
 0x166   : > { %5482 = vmatmul.mubr.msk.bf16.gmra.mrb[24].mxu0 %vm224_vm2, %v6374_v0 }
 0x167   : > { %5485 = vmatprep.mubr.msk.bf16.mxu0 %vm224_vm2, %v6430_v50 }
 0x16e   : > { %5486 = vmatmul.mubr.msk.bf16.gmra.mrb[28].mxu0 %vm224_vm2, %v2446_v9  ;;  %v5865_v9 = vld [vmem:[%s7637_s3 + $0x50] sm:$0xff]  }
 0x16f   : > { %5491 = vmatprep.mubr.msk.bf16.mxu0 %vm224_vm2, %v6442_v62 }
 0x176   : > { %5492 = vmatmul.mubr.msk.bf16.vlgmr.msra.gmra.mrb[0].mxu0 %vm224_vm2, %v6446_v63 }
 0x177   : > { %5495 = vmatprep.mubr.msk.bf16.mxu0 %vm224_vm2, %v6458_v23 }
 0x17e   : > { %5496 = vmatmul.mubr.msk.bf16.gmra.mrb[4].mxu0 %vm224_vm2, %v6461_v24 }
 0x17f   : > { %5499 = vmatprep.mubr.msk.bf16.mxu0 %vm224_vm2, %v6468_v33 }
 0x186   : > { %5500 = vmatmul.mubr.msk.bf16.gmra.mrb[8].mxu0 %vm224_vm2, %v6472_v34 }
 0x187   : > { %5503 = vmatprep.mubr.msk.bf16.mxu0 %vm224_vm2, %v6480_v38 }
 0x18d   : > { %v6697_v10 = vpop.f32.mrb[0].mxu1 }
 0x18e   : > { %5504 = vmatmul.mubr.msk.bf16.gmra.mrb[12].mxu0 %vm224_vm2, %v6484_v44  ;;  %v6699_v13 = vpop.f32.mrb[1].mxu1 }
 0x18f   : > { %5507 = vmatprep.mubr.msk.bf16.mxu0 %vm224_vm2, %v6492_v55  ;;  %v6703_v14 = vpop.f32.mrb[2].mxu1  ;;  %v3316_v55 = vpack.c.bf16 %v3285_v51, %v3284_v48 }
 0x190   : > { %v6707_v21 = vpop.f32.mrb[3].mxu1 }
 0x191   : > { %3348 = vrot.lane.b32.xlu1 %v3316_v55, %s5945_s12  ;;  %v5867_v55 = vld [vmem:[%s7637_s3 + $0x58] sm:$0xff]  }
 0x195   : > { %v6709_v22 = vpop.f32.mrb[4].mxu1 }
 0x196   : > { %5508 = vmatmul.mubr.msk.bf16.gmra.mrb[16].mxu0 %vm224_vm2, %v6496_v59  ;;  %v6711_v26 = vpop.f32.mrb[5].mxu1  ;;  %v3156_v59 = vld [vmem:[#allocation3 + $0x9] sm:$0xff] }
 0x197   : > { %5511 = vmatprep.mubr.msk.bf16.mxu0 %vm224_vm2, %v6504_v12  ;;  %v6715_v28 = vpop.f32.mrb[6].mxu1  ;;  %v3187_v60 = vpack.c.bf16 %v3156_v59, %v3155_v54  ;;  %v5863_v12 = vld [vmem:[%s7637_s3 + $0x48] sm:$0xff]   ;;  %v5868_v59 = vld [vmem:[%s7637_s3 + $0x18] sm:$0xff]  }
 0x198   : > { %v6719_v35 = vpop.f32.mrb[7].mxu1  ;;  %5089 = vmatprep.subr.bf16.mxu1 %v5863_v12 }
 0x199   : > { %3219 = vrot.lane.b32.xlu0 %v3187_v60, %s5946_s13  ;;  %5090 = vmatpush3.bf16.msra.mxu1 %v5864_v20 }
 0x19a   : > { %5091 = vmatprep.subr.bf16.mxu1 %v5865_v9 }
 0x19d   : > { %v6721_v36 = vpop.f32.mrb[8].mxu1 }
 0x19e   : > { %5512 = vmatmul.mubr.msk.bf16.gmra.mrb[20].mxu0 %vm224_vm2, %v6508_v15  ;;  %v6723_v40 = vpop.f32.mrb[9].mxu1 }
 0x19f   : > { %5515 = vmatprep.mubr.msk.bf16.mxu0 %vm224_vm2, %v6516_v29  ;;  %v6727_v46 = vpop.f32.mrb[10].mxu1 }
 0x1a0   : > { %v6731_v57 = vpop.f32.mrb[11].mxu1 }
 0x1a5   : > { %v6733_v2 = vpop.f32.mrb[12].mxu1 }
 0x1a6   : > { %5516 = vmatmul.mubr.msk.bf16.gmra.mrb[24].mxu0 %vm224_vm2, %v6520_v30  ;;  %v6735_v3 = vpop.f32.mrb[13].mxu1 }
 0x1a7   : > { %5519 = vmatprep.mubr.msk.bf16.mxu0 %vm224_vm2, %v6528_v39  ;;  %v6738_v8 = vpop.f32.mrb[14].mxu1 }
 0x1a8   : > { %v6740_v11 = vpop.f32.mrb[15].mxu1 }
 0x1ad   : > { %v6742_v18 = vpop.f32.mrb[16].mxu1 }
 0x1ae   : > { %5520 = vmatmul.mubr.msk.bf16.gmra.mrb[28].mxu0 %vm224_vm2, %v2740_v58  ;;  %v6744_v19 = vpop.f32.mrb[17].mxu1 }
 0x1af   : > { %v6746_v25 = vpop.f32.mrb[18].mxu1 }
 0x1b0   : > { %v6748_v31 = vpop.f32.mrb[19].mxu1 }
 0x1b5   : > { %v6750_v0 = vpop.f32.mrb[20].mxu1 }
 0x1b6   : > { %v6752_v50 = vpop.f32.mrb[21].mxu1 }
 0x1b7   : > { %v6754_v62 = vpop.f32.mrb[22].mxu1 }
 0x1b8   : > { %v6756_v63 = vpop.f32.mrb[23].mxu1 }
 0x1bd   : > { %v6758_v7 = vpop.f32.mrb[24].mxu1 }
 0x1be   : > { %v6760_v23 = vpop.f32.mrb[25].mxu1 }
 0x1bf   : > { %v6762_v24 = vpop.f32.mrb[26].mxu1 }
 0x1c0   : > { %v6764_v33 = vpop.f32.mrb[27].mxu1 }
 0x1c5   : > { %v6766_v34 = vpop.f32.mrb[28].mxu1 }
 0x1c6   : > { %v6768_v38 = vpop.f32.mrb[29].mxu1 }
 0x1c7   : > { %v6770_v44 = vpop.f32.mrb[30].mxu1 }
 0x1c8   : > { %v6808_v47 = vpop.f32.mrb[31].mxu1 }
 0x203   : > { %v3349_v30 = vpop.permute.xlu1 %3348 }
 0x20b   : > { %v3220_v39 = vpop.permute.xlu0 %3219 }
 0x20c   : > { %3268 = vst.msk [vmem:[#allocation4] sm:$0xff] %vm3267_vm6, %v3220_v39 }
 0x20d   : > { %3397 = vst.msk [vmem:[#allocation4] sm:$0xff] %vm3396_vm7, %v3349_v30 }
 0x249   : > { %v5493_v15 = vpop.f32.mrb[0].mxu0 }
 0x24a   : > { %v5559_v27 = vadd.f32 %v5493_v15, %v6697_v10  ;;  %v2828_v29 = vpop.f32.mrb[1].mxu0  ;;  %v5866_v10 = vld [vmem:[%s7637_s3 + $0x10] sm:$0xff]  }
 0x24b   : > { %v5560_v32 = vadd.f32 %v2828_v29, %v6699_v13  ;;  %v5494_v37 = vpop.f32.mrb[2].mxu0  ;;  %5092 = vmatpush3.bf16.msra.mxu1 %v5866_v10 }
 0x24c   : > { %v2996_v41 = vadd.f32 %v5559_v27, %v6824_v16  ;;  %v5561_v45 = vadd.f32 %v5494_v37, %v6703_v14  ;;  %v2831_v4 = vpop.f32.mrb[3].mxu0  ;;  %5093 = vmatprep.subr.bf16.mxu1 %v5867_v55 }
 0x24d   : > { %v2994_v42 = vadd.f32 %v5560_v32, %v6824_v16  ;;  %v5562_v43 = vadd.f32 %v2831_v4, %v6707_v21 }
 0x24e   : > { %v3028_v49 = vmax.f32 %v2996_v41, 0.0  ;;  %v2997_v53 = vadd.f32 %v5561_v45, %v6824_v16 }
 0x24f   : > { %v3026_v13 = vmax.f32 %v2994_v42, 0.0  ;;  %v2995_v14 = vadd.f32 %v5562_v43, %v6824_v16  ;;  %5094 = vmatpush3.bf16.msra.mxu1 %v5868_v59 }
 0x250   : > { %3061 = vst.msk [vmem:[#allocation3 + $0x31] sm:$0xff] %vm280_vm4, %v3028_v49  ;;  %v3029_v21 = vmax.f32 %v2997_v53, 0.0  ;;  %5095 = vmatprep.subr.bf16.mxu1 %v5869_v17 }
 0x251   : > { %3059 = vst.msk [vmem:[#allocation3 + $0x19] sm:$0xff] %vm280_vm4, %v3026_v13  ;;  %v3027_v52 = vmax.f32 %v2995_v14, 0.0  ;;  %v5497_v56 = vpop.f32.mrb[4].mxu0 }
 0x252   : > { %3062 = vst.msk [vmem:[#allocation3 + $0x39] sm:$0xff] %vm280_vm4, %v3029_v21  ;;  %v5563_v58 = vadd.f32 %v5497_v56, %v6709_v22  ;;  %v2844_v48 = vpop.f32.mrb[5].mxu0  ;;  %v5871_v21 = vld [vmem:[%s7637_s3 + $0x68] sm:$0xff]  }
 0x253   : > { %3060 = vst.msk [vmem:[#allocation3 + $0x21] sm:$0xff] %vm280_vm4, %v3027_v52  ;;  %v5564_v51 = vadd.f32 %v2844_v48, %v6711_v26  ;;  %v5498_v54 = vpop.f32.mrb[6].mxu0 }
 0x254   : > { %v3000_v60 = vadd.f32 %v5563_v58, %v6824_v16  ;;  %v5565_v61 = vadd.f32 %v5498_v54, %v6715_v28  ;;  %v2847_v5 = vpop.f32.mrb[7].mxu0 }
 0x255   : > { %v2998_v22 = vadd.f32 %v5564_v51, %v6824_v16  ;;  %v5566_v1 = vadd.f32 %v2847_v5, %v6719_v35  ;;  %v5870_v35 = vld [vmem:[%s7637_s3 + $0x20] sm:$0xff]  }
 0x256   : > { %v3032_v26 = vmax.f32 %v3000_v60, 0.0  ;;  %v3001_v6 = vadd.f32 %v5565_v61, %v6824_v16  ;;  %5096 = vmatpush3.bf16.msra.mxu1 %v5870_v35 }
 0x257   : > { %v3030_v12 = vmax.f32 %v2998_v22, 0.0  ;;  %v2999_v15 = vadd.f32 %v5566_v1, %v6824_v16  ;;  %v3863_v20 = vld [vmem:[#allocation3 + $0x31] sm:$0xff]  ;;  %5097 = vmatprep.subr.bf16.mxu1 %v5871_v21 }
 0x258   : > { %3065 = vst.msk [vmem:[#allocation3 + $0x61] sm:$0xff] %vm280_vm4, %v3032_v26  ;;  %v3033_v28 = vmax.f32 %v3001_v6, 0.0  ;;  %v3735_v27 = vld [vmem:[#allocation3 + $0x30] sm:$0xff]  ;;  %v3413_v39 = vld [vmem:[#allocation3 + $0x18] sm:$0xff] }
 0x259   : > { %3063 = vst.msk [vmem:[#allocation3 + $0x49] sm:$0xff] %vm280_vm4, %v3030_v12  ;;  %v3031_v29 = vmax.f32 %v2999_v15, 0.0  ;;  %v5501_v30 = vpop.f32.mrb[8].mxu0  ;;  %v3864_v32 = vld [vmem:[#allocation3 + $0x39] sm:$0xff] }
 0x25a   : > { %v3736_v37 = vld [vmem:[#allocation3 + $0x38] sm:$0xff]  ;;  %3066 = vst.msk [vmem:[#allocation3 + $0x69] sm:$0xff] %vm280_vm4, %v3033_v28  ;;  %v5567_v41 = vadd.f32 %v5501_v30, %v6721_v36  ;;  %v2860_v45 = vpop.f32.mrb[9].mxu0  ;;  %v6874_v4 = vpack.c.bf16 %v3864_v32, %v3863_v20  ;;  %v3414_v13 = vld [vmem:[#allocation3 + $0x20] sm:$0xff] }
 0x25b   : > { %v3767_v42 = vpack.c.bf16 %v3736_v37, %v3735_v27  ;;  %v3608_v43 = vld [vmem:[#allocation3 + $0x32] sm:$0xff]  ;;  %v3609_v49 = vld [vmem:[#allocation3 + $0x3a] sm:$0xff]  ;;  %3064 = vst.msk [vmem:[#allocation3 + $0x51] sm:$0xff] %vm280_vm4, %v3031_v29  ;;  %v5568_v9 = vadd.f32 %v2860_v45, %v6723_v40  ;;  %v5502_v10 = vpop.f32.mrb[10].mxu0  ;;  %v6886_v58 = vpack.c.bf16 %v3414_v13, %v3413_v39  ;;  %v3607_v6 = vld [vmem:[#allocation3 + $0x22] sm:$0xff] }
 0x25c   : > { %v3157_v53 = vld [vmem:[#allocation3 + $0x19] sm:$0xff]  ;;  %v3158_v14 = vld [vmem:[#allocation3 + $0x21] sm:$0xff]  ;;  %v3004_v36 = vadd.f32 %v5567_v41, %v6824_v16  ;;  %v5569_v52 = vadd.f32 %v5502_v10, %v6727_v46  ;;  %v2863_v56 = vpop.f32.mrb[11].mxu0  ;;  %3927 = vrot.lane.b32.xlu0 %v6874_v4, %s5947_s8  ;;  %3591 = vst.msk [vmem:[#allocation4 + $0x20] sm:$0xff] %vm280_vm4, %v6874_v4  ;;  %v6899_v5 = vpack.c.bf16 %v3609_v49, %v3608_v43 }
 0x25d   : > { %3799 = vrot.lane.b32.xlu1 %v3767_v42, %s5945_s12  ;;  %3141 = vst.msk [vmem:[#allocation4 + $0x30] sm:$0xff] %vm280_vm4, %v3767_v42  ;;  %v5872_v40 = vld [vmem:[%s7637_s3 + $0x28] sm:$0xff]   ;;  %v3002_v51 = vadd.f32 %v5568_v9, %v6824_v16  ;;  %v5570_v54 = vadd.f32 %v2863_v56, %v6731_v57  ;;  %v6896_v55 = vpack.c.bf16 %v3158_v14, %v3157_v53  ;;  %3140 = vst.msk [vmem:[#allocation4 + $0x18] sm:$0xff] %vm280_vm4, %v6886_v58  ;;  %v5873_v57 = vld [vmem:[%s7637_s3 + $0x70] sm:$0xff]  }
 0x25e   : > { %v3991_v48 = vld [vmem:[#allocation3 + $0x32] sm:$0xff]  ;;  %v3992_v46 = vld [vmem:[#allocation3 + $0x3a] sm:$0xff]  ;;  %v3036_v60 = vmax.f32 %v3004_v36, 0.0  ;;  %v3005_v61 = vadd.f32 %v5569_v52, %v6824_v16  ;;  %5098 = vmatpush3.bf16.msra.mxu1 %v5872_v40  ;;  %v5876_v56 = vld [vmem:[%s7637_s3 + $0x38] sm:$0xff]  }
 0x25f   : > { %v4023_v59 = vpack.c.bf16 %v3992_v46, %v3991_v48  ;;  %v3034_v22 = vmax.f32 %v3002_v51, 0.0  ;;  %v3003_v1 = vadd.f32 %v5570_v54, %v6824_v16  ;;  %v3606_v26 = vld [vmem:[#allocation3 + $0x1a] sm:$0xff]  ;;  %3590 = vst.msk [vmem:[#allocation4 + $0x8] sm:$0xff] %vm280_vm4, %v6896_v55  ;;  %5099 = vmatprep.subr.bf16.mxu1 %v5873_v57 }
 0x260   : > { %3069 = vst.msk [vmem:[#allocation3 + $0x91] sm:$0xff] %vm280_vm4, %v3036_v60  ;;  %v3037_v12 = vmax.f32 %v3005_v61, 0.0  ;;  %3672 = vrot.lane.b32.xlu0 %v6899_v5, %s5946_s13  ;;  %v3739_v15 = vld [vmem:[#allocation3 + $0x60] sm:$0xff]  ;;  %v3737_v30 = vld [vmem:[#allocation3 + $0x48] sm:$0xff]  ;;  %v6920_v45 = vpack.c.bf16 %v3607_v6, %v3606_v26 }
 0x261   : > { %4039 = vst.msk [vmem:[#allocation4 + $0x10] sm:$0xff] %vm280_vm4, %v4023_v59  ;;  %3479 = vrot.lane.b32.xlu1 %v3767_v42, %s5947_s8  ;;  %v3867_v17 = vld [vmem:[#allocation3 + $0x61] sm:$0xff]  ;;  %3067 = vst.msk [vmem:[#allocation3 + $0x79] sm:$0xff] %vm280_vm4, %v3034_v22  ;;  %v3035_v20 = vmax.f32 %v3003_v1, 0.0  ;;  %v5505_v27 = vpop.f32.mrb[12].mxu0  ;;  %v3868_v29 = vld [vmem:[#allocation3 + $0x69] sm:$0xff] }
 0x262   : > { %v5874_v28 = vld [vmem:[%s7637_s3 + $0x30] sm:$0xff]   ;;  %v3740_v35 = vld [vmem:[#allocation3 + $0x68] sm:$0xff]  ;;  %v3994_v37 = vld [vmem:[#allocation3 + $0x52] sm:$0xff]  ;;  %3070 = vst.msk [vmem:[#allocation3 + $0x99] sm:$0xff] %vm280_vm4, %v3037_v12  ;;  %v5571_v39 = vadd.f32 %v5505_v27, %v6733_v2  ;;  %v2876_v41 = vpop.f32.mrb[13].mxu0  ;;  %v6924_v43 = vpack.c.bf16 %v3868_v29, %v3867_v17 }
 0x263   : > { %v3993_v32 = vld [vmem:[#allocation3 + $0x4a] sm:$0xff]  ;;  %v6922_v42 = vpack.c.bf16 %v3740_v35, %v3739_v15  ;;  %5100 = vmatpush3.bf16.msra.mxu1 %v5874_v28  ;;  %3068 = vst.msk [vmem:[#allocation3 + $0x81] sm:$0xff] %vm280_vm4, %v3035_v20  ;;  %v5572_v53 = vadd.f32 %v2876_v41, %v6735_v3  ;;  %v5506_v9 = vpop.f32.mrb[14].mxu0 }
 0x264   : > { %v3865_v49 = vld [vmem:[#allocation3 + $0x49] sm:$0xff]  ;;  %v3866_v13 = vld [vmem:[#allocation3 + $0x51] sm:$0xff]  ;;  %v6931_v14 = vpack.c.bf16 %v3994_v37, %v3993_v32  ;;  %v3008_v21 = vadd.f32 %v5571_v39, %v6824_v16  ;;  %v5573_v36 = vadd.f32 %v5506_v9, %v6738_v8  ;;  %v2879_v52 = vpop.f32.mrb[15].mxu0  ;;  %3670 = vrot.lane.b32.xlu0 %v6920_v45, %s5946_s13  ;;  %3593 = vst.msk [vmem:[#allocation4 + $0x50] sm:$0xff] %vm280_vm4, %v6924_v43 }
 0x265   : > { %v3738_v10 = vld [vmem:[#allocation3 + $0x50] sm:$0xff]  ;;  %v5875_v2 = vld [vmem:[%s7637_s3 + $0x78] sm:$0xff]   ;;  %3223 = vrot.lane.b32.xlu1 %v6874_v4, %s5946_s13  ;;  %3143 = vst.msk [vmem:[#allocation4 + $0x60] sm:$0xff] %vm280_vm4, %v6922_v42  ;;  %v3006_v48 = vadd.f32 %v5572_v53, %v6824_v16  ;;  %v5574_v4 = vadd.f32 %v2879_v52, %v6740_v11  ;;  %v6950_v46 = vpack.c.bf16 %v3866_v13, %v3865_v49 }
 0x266   : > { %v6939_v3 = vpack.c.bf16 %v3738_v10, %v3737_v30  ;;  %v3995_v8 = vld [vmem:[#allocation3 + $0x62] sm:$0xff]  ;;  %v3996_v40 = vld [vmem:[#allocation3 + $0x6a] sm:$0xff]  ;;  %5101 = vmatprep.subr.bf16.mxu1 %v5875_v2  ;;  %4040 = vst.msk [vmem:[#allocation4 + $0x28] sm:$0xff] %vm280_vm4, %v6931_v14  ;;  %v3040_v54 = vmax.f32 %v3008_v21, 0.0  ;;  %v3009_v59 = vadd.f32 %v5573_v36, %v6824_v16 }
 0x267   : > { %v4025_v51 = vpack.c.bf16 %v3996_v40, %v3995_v8  ;;  %5102 = vmatpush3.bf16.msra.mxu1 %v5876_v56  ;;  %v3038_v60 = vmax.f32 %v3006_v48, 0.0  ;;  %v3007_v61 = vadd.f32 %v5574_v4, %v6824_v16  ;;  %3592 = vst.msk [vmem:[#allocation4 + $0x38] sm:$0xff] %vm280_vm4, %v6950_v46  ;;  %v3743_v22 = vld [vmem:[#allocation3 + $0x90] sm:$0xff]  ;;  %v3612_v37 = vld [vmem:[#allocation3 + $0x62] sm:$0xff] }
 0x268   : > { %3142 = vst.msk [vmem:[#allocation4 + $0x48] sm:$0xff] %vm280_vm4, %v6939_v3  ;;  %3073 = vst.msk [vmem:[#allocation3 + $0xc1] sm:$0xff] %vm280_vm4, %v3040_v54  ;;  %v3041_v11 = vmax.f32 %v3009_v59, 0.0  ;;  %3803 = vrot.lane.b32.xlu0 %v6922_v42, %s5945_s12  ;;  %v3871_v1 = vld [vmem:[#allocation3 + $0x91] sm:$0xff]  ;;  %v3869_v35 = vld [vmem:[#allocation3 + $0x79] sm:$0xff] }
 0x269   : > { %4041 = vst.msk [vmem:[#allocation4 + $0x40] sm:$0xff] %vm280_vm4, %v4025_v51  ;;  %3352 = vrot.lane.b32.xlu1 %v6899_v5, %s5945_s12  ;;  %3071 = vst.msk [vmem:[#allocation3 + $0xa9] sm:$0xff] %vm280_vm4, %v3038_v60  ;;  %v3039_v26 = vmax.f32 %v3007_v61, 0.0  ;;  %v5509_v6 = vpop.f32.mrb[16].mxu0  ;;  %v3744_v57 = vld [vmem:[#allocation3 + $0x98] sm:$0xff]  ;;  %v3613_v39 = vld [vmem:[#allocation3 + $0x6a] sm:$0xff] }
 0x26a   : > { %v3872_v12 = vld [vmem:[#allocation3 + $0x99] sm:$0xff]  ;;  %3074 = vst.msk [vmem:[#allocation3 + $0xc9] sm:$0xff] %vm280_vm4, %v3041_v11  ;;  %v5575_v17 = vadd.f32 %v5509_v6, %v6742_v18  ;;  %v2892_v28 = vpop.f32.mrb[17].mxu0  ;;  %v6969_v20 = vpack.c.bf16 %v3744_v57, %v3743_v22  ;;  %v3870_v29 = vld [vmem:[#allocation3 + $0x81] sm:$0xff]  ;;  %v6996_v56 = vpack.c.bf16 %v3613_v39, %v3612_v37 }
 0x26b   : > { %v3741_v15 = vld [vmem:[#allocation3 + $0x78] sm:$0xff]  ;;  %v6971_v5 = vpack.c.bf16 %v3872_v12, %v3871_v1  ;;  %v3742_v27 = vld [vmem:[#allocation3 + $0x80] sm:$0xff]  ;;  %3072 = vst.msk [vmem:[#allocation3 + $0xb1] sm:$0xff] %vm280_vm4, %v3039_v26  ;;  %v5576_v30 = vadd.f32 %v2892_v28, %v6744_v19  ;;  %v5510_v32 = vpop.f32.mrb[18].mxu0  ;;  %v6977_v49 = vpack.c.bf16 %v3870_v29, %v3869_v35 }
 0x26c   : > { %v6975_v41 = vpack.c.bf16 %v3742_v27, %v3741_v15  ;;  %v3997_v18 = vld [vmem:[#allocation3 + $0x7a] sm:$0xff]  ;;  %v3012_v53 = vadd.f32 %v5575_v17, %v6824_v16  ;;  %v5577_v9 = vadd.f32 %v5510_v32, %v6746_v25  ;;  %v2895_v10 = vpop.f32.mrb[19].mxu0  ;;  %3931 = vrot.lane.b32.xlu0 %v6924_v43, %s5947_s8  ;;  %3145 = vst.msk [vmem:[#allocation4 + $0x90] sm:$0xff] %vm280_vm4, %v6969_v20  ;;  %v3998_v19 = vld [vmem:[#allocation3 + $0x82] sm:$0xff]  ;;  %v3999_v13 = vld [vmem:[#allocation3 + $0x92] sm:$0xff] }
 0x26d   : > { %3477 = vrot.lane.b32.xlu1 %v6886_v58, %s5947_s8  ;;  %3595 = vst.msk [vmem:[#allocation4 + $0x80] sm:$0xff] %vm280_vm4, %v6971_v5  ;;  %v3010_v2 = vadd.f32 %v5576_v30, %v6824_v16  ;;  %v5578_v21 = vadd.f32 %v2895_v10, %v6748_v31  ;;  %3594 = vst.msk [vmem:[#allocation4 + $0x68] sm:$0xff] %vm280_vm4, %v6977_v49  ;;  %v4026_v25 = vpack.c.bf16 %v3998_v19, %v3997_v18  ;;  %v4000_v58 = vld [vmem:[#allocation3 + $0x9a] sm:$0xff] }
 0x26e   : > { %3144 = vst.msk [vmem:[#allocation4 + $0x78] sm:$0xff] %vm280_vm4, %v6975_v41  ;;  %v3044_v36 = vmax.f32 %v3012_v53, 0.0  ;;  %v3013_v52 = vadd.f32 %v5577_v9, %v6824_v16  ;;  %v4027_v8 = vpack.c.bf16 %v4000_v58, %v3999_v13 }
 0x26f   : > { %v3042_v40 = vmax.f32 %v3010_v2, 0.0  ;;  %v3011_v48 = vadd.f32 %v5578_v21, %v6824_v16  ;;  %4042 = vst.msk [vmem:[#allocation4 + $0x58] sm:$0xff] %vm280_vm4, %v4026_v25  ;;  %v3747_v4 = vld [vmem:[#allocation3 + $0xc0] sm:$0xff] }
 0x270   : > { %3077 = vst.msk [vmem:[#allocation3 + $0xf1] sm:$0xff] %vm280_vm4, %v3044_v36  ;;  %v3045_v31 = vmax.f32 %v3013_v52, 0.0  ;;  %3676 = vrot.lane.b32.xlu0 %v6996_v56, %s5946_s13  ;;  %v3875_v51 = vld [vmem:[#allocation3 + $0xc1] sm:$0xff]  ;;  %4043 = vst.msk [vmem:[#allocation4 + $0x70] sm:$0xff] %vm280_vm4, %v4027_v8  ;;  %v3873_v57 = vld [vmem:[#allocation3 + $0xa9] sm:$0xff] }
 0x271   : > { %3221 = vrot.lane.b32.xlu1 %v6896_v55, %s5946_s13  ;;  %3075 = vst.msk [vmem:[#allocation3 + $0xd9] sm:$0xff] %vm280_vm4, %v3042_v40  ;;  %v3043_v54 = vmax.f32 %v3011_v48, 0.0  ;;  %v5513_v59 = vpop.f32.mrb[20].mxu0  ;;  %v3748_v60 = vld [vmem:[#allocation3 + $0xc8] sm:$0xff] }
 0x272   : > { %v3876_v61 = vld [vmem:[#allocation3 + $0xc9] sm:$0xff]  ;;  %3078 = vst.msk [vmem:[#allocation3 + $0xf9] sm:$0xff] %vm280_vm4, %v3045_v31  ;;  %v5579_v22 = vadd.f32 %v5513_v59, %v6750_v0  ;;  %v2908_v1 = vpop.f32.mrb[21].mxu0  ;;  %v7009_v55 = vpack.c.bf16 %v3748_v60, %v3747_v4  ;;  %v3874_v12 = vld [vmem:[#allocation3 + $0xb1] sm:$0xff] }
 0x273   : > { %v3745_v11 = vld [vmem:[#allocation3 + $0xa8] sm:$0xff]  ;;  %v7011_v26 = vpack.c.bf16 %v3876_v61, %v3875_v51  ;;  %v3746_v6 = vld [vmem:[#allocation3 + $0xb0] sm:$0xff]  ;;  %3076 = vst.msk [vmem:[#allocation3 + $0xe1] sm:$0xff] %vm280_vm4, %v3043_v54  ;;  %v5580_v15 = vadd.f32 %v2908_v1, %v6752_v50  ;;  %v5514_v17 = vpop.f32.mrb[22].mxu0  ;;  %v7017_v27 = vpack.c.bf16 %v3874_v12, %v3873_v57 }
 0x274   : > { %v7015_v28 = vpack.c.bf16 %v3746_v6, %v3745_v11  ;;  %v4001_v35 = vld [vmem:[#allocation3 + $0xaa] sm:$0xff]  ;;  %v3016_v0 = vadd.f32 %v5579_v22, %v6824_v16  ;;  %v5581_v29 = vadd.f32 %v5514_v17, %v6754_v62  ;;  %v2911_v30 = vpop.f32.mrb[23].mxu0  ;;  %3801 = vrot.lane.b32.xlu0 %v6939_v3, %s5945_s12  ;;  %3147 = vst.msk [vmem:[#allocation4 + $0xc0] sm:$0xff] %vm280_vm4, %v7009_v55  ;;  %v4002_v50 = vld [vmem:[#allocation3 + $0xb2] sm:$0xff]  ;;  %v4003_v32 = vld [vmem:[#allocation3 + $0xc2] sm:$0xff] }
 0x275   : > { %3350 = vrot.lane.b32.xlu1 %v6920_v45, %s5945_s12  ;;  %3597 = vst.msk [vmem:[#allocation4 + $0xb0] sm:$0xff] %vm280_vm4, %v7011_v26  ;;  %v4004_v37 = vld [vmem:[#allocation3 + $0xca] sm:$0xff]  ;;  %v3014_v39 = vadd.f32 %v5580_v15, %v6824_v16  ;;  %v5582_v62 = vadd.f32 %v2911_v30, %v6756_v63  ;;  %3596 = vst.msk [vmem:[#allocation4 + $0x98] sm:$0xff] %vm280_vm4, %v7017_v27  ;;  %v4028_v45 = vpack.c.bf16 %v4002_v50, %v4001_v35 }
 0x276   : > { %3146 = vst.msk [vmem:[#allocation4 + $0xa8] sm:$0xff] %vm280_vm4, %v7015_v28  ;;  %v4029_v18 = vpack.c.bf16 %v4004_v37, %v4003_v32  ;;  %v3048_v53 = vmax.f32 %v3016_v0, 0.0  ;;  %v3017_v9 = vadd.f32 %v5581_v29, %v6824_v16 }
 0x277   : > { %v3046_v10 = vmax.f32 %v3014_v39, 0.0  ;;  %v3015_v19 = vadd.f32 %v5582_v62, %v6824_v16  ;;  %4044 = vst.msk [vmem:[#allocation4 + $0x88] sm:$0xff] %vm280_vm4, %v4028_v45  ;;  %v3751_v13 = vld [vmem:[#allocation3 + $0xf0] sm:$0xff] }
 0x278   : > { %4045 = vst.msk [vmem:[#allocation4 + $0xa0] sm:$0xff] %vm280_vm4, %v4029_v18  ;;  %3081 = vst.msk [vmem:[#allocation3 + $0x121] sm:$0xff] %vm280_vm4, %v3048_v53  ;;  %v3049_v63 = vmax.f32 %v3017_v9, 0.0  ;;  %3929 = vrot.lane.b32.xlu0 %v6950_v46, %s5947_s8  ;;  %v3879_v2 = vld [vmem:[#allocation3 + $0xf1] sm:$0xff]  ;;  %v3877_v4 = vld [vmem:[#allocation3 + $0xd9] sm:$0xff] }
 0x279   : > { %3483 = vrot.lane.b32.xlu1 %v6922_v42, %s5947_s8  ;;  %3079 = vst.msk [vmem:[#allocation3 + $0x109] sm:$0xff] %vm280_vm4, %v3046_v10  ;;  %v3047_v21 = vmax.f32 %v3015_v19, 0.0  ;;  %v5517_v25 = vpop.f32.mrb[24].mxu0  ;;  %v3752_v58 = vld [vmem:[#allocation3 + $0xf8] sm:$0xff] }
 0x27a   : > { %v3880_v36 = vld [vmem:[#allocation3 + $0xf9] sm:$0xff]  ;;  %3082 = vst.msk [vmem:[#allocation3 + $0x129] sm:$0xff] %vm280_vm4, %v3049_v63  ;;  %v5583_v8 = vadd.f32 %v5517_v25, %v6758_v7  ;;  %v2924_v40 = vpop.f32.mrb[25].mxu0  ;;  %v7047_v48 = vpack.c.bf16 %v3752_v58, %v3751_v13  ;;  %v3878_v51 = vld [vmem:[#allocation3 + $0xe1] sm:$0xff] }
 0x27b   : > { %v3749_v52 = vld [vmem:[#allocation3 + $0xd8] sm:$0xff]  ;;  %v7049_v42 = vpack.c.bf16 %v3880_v36, %v3879_v2  ;;  %v3750_v31 = vld [vmem:[#allocation3 + $0xe0] sm:$0xff]  ;;  %3080 = vst.msk [vmem:[#allocation3 + $0x111] sm:$0xff] %vm280_vm4, %v3047_v21  ;;  %v5584_v54 = vadd.f32 %v2924_v40, %v6760_v23  ;;  %v5518_v59 = vpop.f32.mrb[26].mxu0  ;;  %v7055_v61 = vpack.c.bf16 %v3878_v51, %v3877_v4 }
 0x27c   : > { %v7053_v60 = vpack.c.bf16 %v3750_v31, %v3749_v52  ;;  %v4005_v11 = vld [vmem:[#allocation3 + $0xda] sm:$0xff]  ;;  %v3020_v7 = vadd.f32 %v5583_v8, %v6824_v16  ;;  %v5585_v22 = vadd.f32 %v5518_v59, %v6762_v24  ;;  %v2927_v1 = vpop.f32.mrb[27].mxu0  ;;  %3674 = vrot.lane.b32.xlu0 %v6931_v14, %s5946_s13  ;;  %3149 = vst.msk [vmem:[#allocation4 + $0xf0] sm:$0xff] %vm280_vm4, %v7047_v48  ;;  %v4006_v23 = vld [vmem:[#allocation3 + $0xe2] sm:$0xff]  ;;  %v4007_v6 = vld [vmem:[#allocation3 + $0xf2] sm:$0xff] }
 0x27d   : > { %3227 = vrot.lane.b32.xlu1 %v6924_v43, %s5946_s13  ;;  %3599 = vst.msk [vmem:[#allocation4 + $0xe0] sm:$0xff] %vm280_vm4, %v7049_v42  ;;  %v4008_v57 = vld [vmem:[#allocation3 + $0xfa] sm:$0xff]  ;;  %v3018_v12 = vadd.f32 %v5584_v54, %v6824_v16  ;;  %v5586_v24 = vadd.f32 %v2927_v1, %v6764_v33  ;;  %3598 = vst.msk [vmem:[#allocation4 + $0xc8] sm:$0xff] %vm280_vm4, %v7055_v61  ;;  %v4030_v43 = vpack.c.bf16 %v4006_v23, %v4005_v11  ;;  %v3616_v21 = vld [vmem:[#allocation3 + $0x92] sm:$0xff] }
 0x27e   : > { %3148 = vst.msk [vmem:[#allocation4 + $0xd8] sm:$0xff] %vm280_vm4, %v7053_v60  ;;  %v4031_v15 = vpack.c.bf16 %v4008_v57, %v4007_v6  ;;  %v3052_v17 = vmax.f32 %v3020_v7, 0.0  ;;  %v3021_v35 = vadd.f32 %v5585_v22, %v6824_v16  ;;  %v3617_v25 = vld [vmem:[#allocation3 + $0x9a] sm:$0xff] }
 0x27f   : > { %v3050_v0 = vmax.f32 %v3018_v12, 0.0  ;;  %v3019_v29 = vadd.f32 %v5586_v24, %v6824_v16  ;;  %4046 = vst.msk [vmem:[#allocation4 + $0xb8] sm:$0xff] %vm280_vm4, %v4030_v43  ;;  %v3755_v30 = vld [vmem:[#allocation3 + $0x120] sm:$0xff]  ;;  %v7112_v7 = vpack.c.bf16 %v3617_v25, %v3616_v21 }
 0x280   : > { %4047 = vst.msk [vmem:[#allocation4 + $0xd0] sm:$0xff] %vm280_vm4, %v4031_v15  ;;  %3085 = vst.msk [vmem:[#allocation3 + $0x151] sm:$0xff] %vm280_vm4, %v3052_v17  ;;  %v3053_v33 = vmax.f32 %v3021_v35, 0.0  ;;  %3807 = vrot.lane.b32.xlu0 %v6969_v20, %s5945_s12  ;;  %v3883_v50 = vld [vmem:[#allocation3 + $0x121] sm:$0xff]  ;;  %v3881_v19 = vld [vmem:[#allocation3 + $0x109] sm:$0xff] }
 0x281   : > { %3356 = vrot.lane.b32.xlu1 %v6996_v56, %s5945_s12  ;;  %3083 = vst.msk [vmem:[#allocation3 + $0x139] sm:$0xff] %vm280_vm4, %v3050_v0  ;;  %v3051_v32 = vmax.f32 %v3019_v29, 0.0  ;;  %v5521_v37 = vpop.f32.mrb[28].mxu0  ;;  %v3756_v39 = vld [vmem:[#allocation3 + $0x128] sm:$0xff] }
 0x282   : > { %v3884_v62 = vld [vmem:[#allocation3 + $0x129] sm:$0xff]  ;;  %3086 = vst.msk [vmem:[#allocation3 + $0x159] sm:$0xff] %vm280_vm4, %v3053_v33  ;;  %v5587_v18 = vadd.f32 %v5521_v37, %v6766_v34  ;;  %v2940_v53 = vpop.f32.mrb[29].mxu0  ;;  %v7085_v9 = vpack.c.bf16 %v3756_v39, %v3755_v30  ;;  %v3882_v63 = vld [vmem:[#allocation3 + $0x111] sm:$0xff] }
 0x283   : > { %v3753_v45 = vld [vmem:[#allocation3 + $0x108] sm:$0xff]  ;;  %v7087_v56 = vpack.c.bf16 %v3884_v62, %v3883_v50  ;;  %v3754_v10 = vld [vmem:[#allocation3 + $0x110] sm:$0xff]  ;;  %3084 = vst.msk [vmem:[#allocation3 + $0x141] sm:$0xff] %vm280_vm4, %v3051_v32  ;;  %v5588_v13 = vadd.f32 %v2940_v53, %v6768_v38  ;;  %v5522_v2 = vpop.f32.mrb[30].mxu0  ;;  %v7093_v36 = vpack.c.bf16 %v3882_v63, %v3881_v19 }
 0x284   : > { %v7091_v58 = vpack.c.bf16 %v3754_v10, %v3753_v45  ;;  %v4009_v34 = vld [vmem:[#allocation3 + $0x10a] sm:$0xff]  ;;  %v3024_v52 = vadd.f32 %v5587_v18, %v6824_v16  ;;  %v5589_v8 = vadd.f32 %v5522_v2, %v6770_v44  ;;  %v2943_v40 = vpop.f32.mrb[31].mxu0  ;;  %3935 = vrot.lane.b32.xlu0 %v6971_v5, %s5947_s8  ;;  %3151 = vst.msk [vmem:[#allocation4 + $0x120] sm:$0xff] %vm280_vm4, %v7085_v9  ;;  %v4010_v38 = vld [vmem:[#allocation3 + $0x112] sm:$0xff]  ;;  %v4011_v31 = vld [vmem:[#allocation3 + $0x122] sm:$0xff] }
 0x285   : > { %3481 = vrot.lane.b32.xlu1 %v6939_v3, %s5947_s8  ;;  %3601 = vst.msk [vmem:[#allocation4 + $0x110] sm:$0xff] %vm280_vm4, %v7087_v56  ;;  %v4012_v4 = vld [vmem:[#allocation3 + $0x12a] sm:$0xff]  ;;  %v3022_v51 = vadd.f32 %v5588_v13, %v6824_v16  ;;  %v5590_v44 = vadd.f32 %v2943_v40, %v6808_v47  ;;  %3600 = vst.msk [vmem:[#allocation4 + $0xf8] sm:$0xff] %vm280_vm4, %v7093_v36  ;;  %v4032_v3 = vpack.c.bf16 %v4010_v38, %v4009_v34  ;;  %v3615_v62 = vld [vmem:[#allocation3 + $0x82] sm:$0xff] }
 0x286   : > { %3150 = vst.msk [vmem:[#allocation4 + $0x108] sm:$0xff] %vm280_vm4, %v7091_v58  ;;  %v4033_v54 = vpack.c.bf16 %v4012_v4, %v4011_v31  ;;  %v3056_v59 = vmax.f32 %v3024_v52, 0.0  ;;  %v3025_v11 = vadd.f32 %v5589_v8, %v6824_v16  ;;  %v3620_v31 = vld [vmem:[#allocation3 + $0xc2] sm:$0xff]  ;;  %v3621_v4 = vld [vmem:[#allocation3 + $0xca] sm:$0xff] }
 0x287   : > { %v3054_v22 = vmax.f32 %v3022_v51, 0.0  ;;  %v3023_v1 = vadd.f32 %v5590_v44, %v6824_v16  ;;  %v3759_v23 = vld [vmem:[#allocation3 + $0x150] sm:$0xff]  ;;  %4048 = vst.msk [vmem:[#allocation4 + $0xe8] sm:$0xff] %vm280_vm4, %v4032_v3  ;;  %v3645_v51 = vpack.c.bf16 %v3621_v4, %v3620_v31  ;;  %v3765_v4 = vld [vmem:[#allocation3 + $0x198] sm:$0xff] }
 0x288   : > { %4049 = vst.msk [vmem:[#allocation4 + $0x100] sm:$0xff] %vm280_vm4, %v4033_v54  ;;  %3089 = vst.msk [vmem:[#allocation3 + $0x181] sm:$0xff] %vm280_vm4, %v3056_v59  ;;  %v3057_v47 = vmax.f32 %v3025_v11, 0.0  ;;  %3680 = vrot.lane.b32.xlu0 %v7112_v7, %s5946_s13  ;;  %v3887_v6 = vld [vmem:[#allocation3 + $0x151] sm:$0xff]  ;;  %v3885_v12 = vld [vmem:[#allocation3 + $0x139] sm:$0xff] }
 0x289   : > { %3225 = vrot.lane.b32.xlu1 %v6950_v46, %s5946_s13  ;;  %v3757_v57 = vld [vmem:[#allocation3 + $0x138] sm:$0xff]  ;;  %3087 = vst.msk [vmem:[#allocation3 + $0x169] sm:$0xff] %vm280_vm4, %v3054_v22  ;;  %v3055_v16 = vmax.f32 %v3023_v1, 0.0  ;;  %v3618_v44 = vld [vmem:[#allocation3 + $0xaa] sm:$0xff]  ;;  %v3623_v59 = vld [vmem:[#allocation3 + $0xe2] sm:$0xff] }
 0x28a   : > { %v3760_v24 = vld [vmem:[#allocation3 + $0x158] sm:$0xff]  ;;  %3090 = vst.msk [vmem:[#allocation3 + $0x189] sm:$0xff] %vm280_vm4, %v3057_v47  ;;  %v3758_v46 = vld [vmem:[#allocation3 + $0x140] sm:$0xff]  ;;  %v3629_v11 = vld [vmem:[#allocation3 + $0x12a] sm:$0xff] }
 0x28b   : > { %v3888_v43 = vld [vmem:[#allocation3 + $0x159] sm:$0xff]  ;;  %v7124_v17 = vpack.c.bf16 %v3760_v24, %v3759_v23  ;;  %v3886_v29 = vld [vmem:[#allocation3 + $0x141] sm:$0xff]  ;;  %3088 = vst.msk [vmem:[#allocation3 + $0x171] sm:$0xff] %vm280_vm4, %v3055_v16  ;;  %v7131_v30 = vpack.c.bf16 %v3758_v46, %v3757_v57  ;;  %v3626_v47 = vld [vmem:[#allocation3 + $0x10a] sm:$0xff] }
 0x28c   : > { %v3632_v15 = vld [vmem:[#allocation3 + $0x152] sm:$0xff]  ;;  %v7126_v35 = vpack.c.bf16 %v3888_v43, %v3887_v6  ;;  %v3633_v0 = vld [vmem:[#allocation3 + $0x15a] sm:$0xff]  ;;  %v7133_v50 = vpack.c.bf16 %v3886_v29, %v3885_v12  ;;  %v3631_v37 = vld [vmem:[#allocation3 + $0x142] sm:$0xff]  ;;  %3805 = vrot.lane.b32.xlu0 %v6975_v41, %s5945_s12 }
 0x28d   : > { %v7129_v33 = vpack.c.bf16 %v3633_v0, %v3632_v15  ;;  %v3630_v32 = vld [vmem:[#allocation3 + $0x13a] sm:$0xff]  ;;  %3354 = vrot.lane.b32.xlu1 %v6931_v14, %s5945_s12  ;;  %3153 = vst.msk [vmem:[#allocation4 + $0x150] sm:$0xff] %vm280_vm4, %v7124_v17  ;;  %3152 = vst.msk [vmem:[#allocation4 + $0x138] sm:$0xff] %vm280_vm4, %v7131_v30  ;;  %v3619_v3 = vld [vmem:[#allocation3 + $0xb2] sm:$0xff] }
 0x28e   : > { %v7139_v39 = vpack.c.bf16 %v3631_v37, %v3630_v32  ;;  %3603 = vst.msk [vmem:[#allocation4 + $0x140] sm:$0xff] %vm280_vm4, %v7126_v35  ;;  %3602 = vst.msk [vmem:[#allocation4 + $0x128] sm:$0xff] %vm280_vm4, %v7133_v50  ;;  %v3614_v14 = vld [vmem:[#allocation3 + $0x7a] sm:$0xff] }
 0x28f   : > { %4051 = vst.msk [vmem:[#allocation4 + $0x130] sm:$0xff] %vm280_vm4, %v7129_v33  ;;  %v3891_v45 = vld [vmem:[#allocation3 + $0x181] sm:$0xff]  ;;  %v3642_v63 = vpack.c.bf16 %v3615_v62, %v3614_v14  ;;  %v5878_v29 = vld [vmem:[%s7637_s3 + $0x88] sm:$0xff]  }
 0x290   : > { %4050 = vst.msk [vmem:[#allocation4 + $0x118] sm:$0xff] %vm280_vm4, %v7139_v39  ;;  %3933 = vrot.lane.b32.xlu0 %v6977_v49, %s5947_s8  ;;  %v3761_v18 = vld [vmem:[#allocation3 + $0x168] sm:$0xff]  ;;  %v3625_v54 = vld [vmem:[#allocation3 + $0xfa] sm:$0xff] }
 0x291   : > { %3487 = vrot.lane.b32.xlu1 %v6969_v20, %s5947_s8  ;;  %v3892_v53 = vld [vmem:[#allocation3 + $0x189] sm:$0xff] }
 0x292   : > { %v3889_v10 = vld [vmem:[#allocation3 + $0x169] sm:$0xff]  ;;  %v7157_v13 = vpack.c.bf16 %v3892_v53, %v3891_v45  ;;  %v3890_v21 = vld [vmem:[#allocation3 + $0x171] sm:$0xff] }
 0x293   : > { %v3636_v19 = vld [vmem:[#allocation3 + $0x182] sm:$0xff]  ;;  %v3762_v2 = vld [vmem:[#allocation3 + $0x170] sm:$0xff]  ;;  %v7161_v52 = vpack.c.bf16 %v3890_v21, %v3889_v10 }
 0x294   : > { %v3634_v25 = vld [vmem:[#allocation3 + $0x16a] sm:$0xff]  ;;  %v7159_v34 = vpack.c.bf16 %v3762_v2, %v3761_v18  ;;  %v3635_v8 = vld [vmem:[#allocation3 + $0x172] sm:$0xff]  ;;  %3678 = vrot.lane.b32.xlu0 %v3642_v63, %s5946_s13  ;;  %3605 = vst.msk [vmem:[#allocation4 + $0x170] sm:$0xff] %vm280_vm4, %v7157_v13 }
 0x295   : > { %v3637_v20 = vld [vmem:[#allocation3 + $0x18a] sm:$0xff]  ;;  %3231 = vrot.lane.b32.xlu1 %v6971_v5, %s5946_s13  ;;  %v7166_v40 = vpack.c.bf16 %v3635_v8, %v3634_v25  ;;  %3604 = vst.msk [vmem:[#allocation4 + $0x158] sm:$0xff] %vm280_vm4, %v7161_v52 }
 0x296   : > { %v7168_v38 = vpack.c.bf16 %v3637_v20, %v3636_v19  ;;  %3154 = vst.msk [vmem:[#allocation4 + $0x168] sm:$0xff] %vm280_vm4, %v7159_v34  ;;  %v7187_v5 = vld [vmem:[%s7637_s3 + $0x80] sm:$0xff]   ;;  %v3764_v53 = vld [vmem:[#allocation3 + $0x188] sm:$0xff]  ;;  %v3763_v19 = vld [vmem:[#allocation3 + $0x180] sm:$0xff] }
 0x297   : > { %4052 = vst.msk [vmem:[#allocation4 + $0x148] sm:$0xff] %vm280_vm4, %v7166_v40  ;;  %5523 = vmatprep.subr.bf16.mxu1 %v7187_v5 }
 0x298   : > { %4053 = vst.msk [vmem:[#allocation4 + $0x160] sm:$0xff] %vm280_vm4, %v7168_v38  ;;  %3811 = vrot.lane.b32.xlu0 %v7009_v55, %s5945_s12 }
 0x299   : > { %3360 = vrot.lane.b32.xlu1 %v7112_v7, %s5945_s12 }
 0x29c   : > { %3939 = vrot.lane.b32.xlu0 %v7011_v26, %s5947_s8 }
 0x29d   : > { %3485 = vrot.lane.b32.xlu1 %v6975_v41, %s5947_s8  ;;  %v3644_v41 = vpack.c.bf16 %v3619_v3, %v3618_v44 }
 0x2a0   : > { %3684 = vrot.lane.b32.xlu0 %v3645_v51, %s5946_s13 }
 0x2a1   : > { %3229 = vrot.lane.b32.xlu1 %v6977_v49, %s5946_s13  ;;  %v3624_v49 = vld [vmem:[#allocation3 + $0xf2] sm:$0xff] }
 0x2a4   : > { %3809 = vrot.lane.b32.xlu0 %v7015_v28, %s5945_s12 }
 0x2a5   : > { %3358 = vrot.lane.b32.xlu1 %v3642_v63, %s5945_s12  ;;  %v3781_v63 = vpack.c.bf16 %v3764_v53, %v3763_v19 }
 0x2a8   : > { %3937 = vrot.lane.b32.xlu0 %v7017_v27, %s5947_s8 }
 0x2a9   : > { %3491 = vrot.lane.b32.xlu1 %v7009_v55, %s5947_s8  ;;  %v3647_v55 = vpack.c.bf16 %v3625_v54, %v3624_v49  ;;  %v3893_v49 = vld [vmem:[#allocation3 + $0x199] sm:$0xff]  ;;  %v3894_v54 = vld [vmem:[#allocation3 + $0x1a1] sm:$0xff] }
 0x2ac   : > { %3682 = vrot.lane.b32.xlu0 %v3644_v41, %s5946_s13 }
 0x2ad   : > { %3235 = vrot.lane.b32.xlu1 %v7011_v26, %s5946_s13  ;;  %v3622_v26 = vld [vmem:[#allocation3 + $0xda] sm:$0xff] }
 0x2b0   : > { %3815 = vrot.lane.b32.xlu0 %v7047_v48, %s5945_s12 }
 0x2b1   : > { %3364 = vrot.lane.b32.xlu1 %v3645_v51, %s5945_s12  ;;  %v3766_v51 = vld [vmem:[#allocation3 + $0x1a0] sm:$0xff] }
 0x2b4   : > { %3943 = vrot.lane.b32.xlu0 %v7049_v42, %s5947_s8 }
 0x2b5   : > { %3489 = vrot.lane.b32.xlu1 %v7015_v28, %s5947_s8  ;;  %v3646_v28 = vpack.c.bf16 %v3623_v59, %v3622_v26  ;;  %v3910_v26 = vpack.c.bf16 %v3894_v54, %v3893_v49 }
 0x2b8   : > { %3688 = vrot.lane.b32.xlu0 %v3647_v55, %s5946_s13 }
 0x2b9   : > { %3233 = vrot.lane.b32.xlu1 %v7017_v27, %s5946_s13  ;;  %v3628_v27 = vld [vmem:[#allocation3 + $0x122] sm:$0xff] }
 0x2ba   : > { %v3649_v22 = vpack.c.bf16 %v3629_v11, %v3628_v27 }
 0x2bc   : > { %3813 = vrot.lane.b32.xlu0 %v7053_v60, %s5945_s12 }
 0x2bd   : > { %3362 = vrot.lane.b32.xlu1 %v3644_v41, %s5945_s12 }
 0x2c0   : > { %3941 = vrot.lane.b32.xlu0 %v7055_v61, %s5947_s8 }
 0x2c1   : > { %3495 = vrot.lane.b32.xlu1 %v7047_v48, %s5947_s8 }
 0x2c4   : > { %3686 = vrot.lane.b32.xlu0 %v3646_v28, %s5946_s13 }
 0x2c5   : > { %3239 = vrot.lane.b32.xlu1 %v7049_v42, %s5946_s13 }
 0x2c8   : > { %3819 = vrot.lane.b32.xlu0 %v7085_v9, %s5945_s12 }
 0x2c9   : > { %3368 = vrot.lane.b32.xlu1 %v3647_v55, %s5945_s12 }
 0x2cc   : > { %3947 = vrot.lane.b32.xlu0 %v7087_v56, %s5947_s8 }
 0x2cd   : > { %3493 = vrot.lane.b32.xlu1 %v7053_v60, %s5947_s8 }
 0x2ce   : > { %v3928_v48 = vpop.permute.xlu0 %3927 }
 0x2cf   : > { %v3800_v7 = vpop.permute.xlu1 %3799 }
 0x2d0   : > { %3692 = vrot.lane.b32.xlu0 %v3649_v22, %s5946_s13 }
 0x2d1   : > { %3237 = vrot.lane.b32.xlu1 %v7055_v61, %s5946_s13  ;;  %v3627_v61 = vld [vmem:[#allocation3 + $0x112] sm:$0xff] }
 0x2d2   : > { %v3673_v42 = vpop.permute.xlu0 %3672  ;;  %v3648_v12 = vpack.c.bf16 %v3627_v61, %v3626_v47 }
 0x2d3   : > { %v3480_v1 = vpop.permute.xlu1 %3479  ;;  %3719 = vst.msk [vmem:[#allocation4 + $0x20] sm:$0xff] %vm3267_vm6, %v3673_v42 }
 0x2d4   : > { %3817 = vrot.lane.b32.xlu0 %v7091_v58, %s5945_s12 }
 0x2d5   : > { %3366 = vrot.lane.b32.xlu1 %v3646_v28, %s5945_s12 }
 0x2d6   : > { %v3671_v23 = vpop.permute.xlu0 %3670 }
 0x2d7   : > { %v3224_v60 = vpop.permute.xlu1 %3223  ;;  %3718 = vst.msk [vmem:[#allocation4 + $0x8] sm:$0xff] %vm3267_vm6, %v3671_v23 }
 0x2d8   : > { %3270 = vst.msk [vmem:[#allocation4 + $0x30] sm:$0xff] %vm3267_vm6, %v3224_v60  ;;  %3945 = vrot.lane.b32.xlu0 %v7093_v36, %s5947_s8 }
 0x2d9   : > { %3847 = vst.msk [vmem:[#allocation4 + $0x8] sm:$0xff] %vm3396_vm7, %v3800_v7  ;;  %3499 = vrot.lane.b32.xlu1 %v7085_v9, %s5947_s8 }
 0x2da   : > { %3975 = vst.msk [vmem:[#allocation4 + $0x8] sm:$0xff] %vm3525_vm8, %v3928_v48  ;;  %v3804_v57 = vpop.permute.xlu0 %3803 }
 0x2db   : > { %v3353_v6 = vpop.permute.xlu1 %3352 }
 0x2dc   : > { %3399 = vst.msk [vmem:[#allocation4 + $0x30] sm:$0xff] %vm3396_vm7, %v3353_v6  ;;  %3690 = vrot.lane.b32.xlu0 %v3648_v12, %s5946_s13 }
 0x2dd   : > { %3243 = vrot.lane.b32.xlu1 %v7087_v56, %s5946_s13 }
 0x2de   : > { %v3932_v24 = vpop.permute.xlu0 %3931 }
 0x2df   : > { %v3478_v16 = vpop.permute.xlu1 %3477 }
 0x2e0   : > { %3526 = vst.msk [vmem:[#allocation4] sm:$0xff] %vm3525_vm8, %v3478_v16  ;;  %3823 = vrot.lane.b32.xlu0 %v7124_v17, %s5945_s12 }
 0x2e1   : > { %3372 = vrot.lane.b32.xlu1 %v3649_v22, %s5945_s12  ;;  %v4056_v9 = vld [vmem:[#allocation4 + $0x8] sm:$0xff] }
 0x2e2   : > { %4334 = vmatprep.mubr.bf16.mxu1 %v4056_v9  ;;  %v3677_v15 = vpop.permute.xlu0 %3676 }
 0x2e3   : > { %v3222_v43 = vpop.permute.xlu1 %3221  ;;  %3721 = vst.msk [vmem:[#allocation4 + $0x50] sm:$0xff] %vm3267_vm6, %v3677_v15 }
 0x2e4   : > { %3269 = vst.msk [vmem:[#allocation4 + $0x18] sm:$0xff] %vm3267_vm6, %v3222_v43  ;;  %3951 = vrot.lane.b32.xlu0 %v7126_v35, %s5947_s8 }
 0x2e5   : > { %3497 = vrot.lane.b32.xlu1 %v7091_v58, %s5947_s8 }
 0x2e6   : > { %v3802_v0 = vpop.permute.xlu0 %3801 }
 0x2e7   : > { %v3351_v56 = vpop.permute.xlu1 %3350  ;;  %v4055_v46 = vld [vmem:[#allocation4] sm:$0xff]  ;;  %3848 = vst.msk [vmem:[#allocation4 + $0x20] sm:$0xff] %vm3396_vm7, %v3802_v0 }
 0x2e8   : > { %3398 = vst.msk [vmem:[#allocation4 + $0x18] sm:$0xff] %vm3396_vm7, %v3351_v56  ;;  %4335 = vmatmul.mubr.bf16.vlgmr.msra.gmra.mrb[32].mxu1 %v4055_v46  ;;  %3696 = vrot.lane.b32.xlu0 %v7129_v33, %s5946_s13 }
 0x2e9   : > { %3527 = vst.msk [vmem:[#allocation4 + $0x18] sm:$0xff] %vm3525_vm8, %v3480_v1  ;;  %3241 = vrot.lane.b32.xlu1 %v7093_v36, %s5946_s13  ;;  %5524 = vmatpush3.bf16.msra.mxu1 %v7187_v5 }
 0x2ea   : > { %v3930_v32 = vpop.permute.xlu0 %3929  ;;  %5525 = vmatprep.subr.bf16.mxu1 %v5878_v29 }
 0x2eb   : > { %v3484_v58 = vpop.permute.xlu1 %3483  ;;  %3976 = vst.msk [vmem:[#allocation4 + $0x20] sm:$0xff] %vm3525_vm8, %v3930_v32 }
 0x2ec   : > { %3821 = vrot.lane.b32.xlu0 %v7131_v30, %s5945_s12 }
 0x2ed   : > { %3370 = vrot.lane.b32.xlu1 %v3648_v12, %s5945_s12  ;;  %5526 = vmatpush3.bf16.msra.mxu1 %v5878_v29 }
 0x2ee   : > { %v3675_v14 = vpop.permute.xlu0 %3674 }
 0x2ef   : > { %v3228_v37 = vpop.permute.xlu1 %3227  ;;  %3720 = vst.msk [vmem:[#allocation4 + $0x38] sm:$0xff] %vm3267_vm6, %v3675_v14 }
 0x2f0   : > { %3272 = vst.msk [vmem:[#allocation4 + $0x60] sm:$0xff] %vm3267_vm6, %v3228_v37  ;;  %3949 = vrot.lane.b32.xlu0 %v7133_v50, %s5947_s8  ;;  %v4058_v18 = vld [vmem:[#allocation4 + $0x18] sm:$0xff] }
 0x2f1   : > { %3849 = vst.msk [vmem:[#allocation4 + $0x38] sm:$0xff] %vm3396_vm7, %v3804_v57  ;;  %3503 = vrot.lane.b32.xlu1 %v7124_v17, %s5947_s8 }
 0x2f2   : > { %3977 = vst.msk [vmem:[#allocation4 + $0x38] sm:$0xff] %vm3525_vm8, %v3932_v24  ;;  %v3808_v62 = vpop.permute.xlu0 %3807  ;;  %v4059_v45 = vld [vmem:[#allocation4 + $0x20] sm:$0xff] }
 0x2f3   : > { %v3357_v36 = vpop.permute.xlu1 %3356  ;;  %4342 = vmatprep.mubr.bf16.mxu1 %v4059_v45 }
 0x2f4   : > { %3401 = vst.msk [vmem:[#allocation4 + $0x60] sm:$0xff] %vm3396_vm7, %v3357_v36  ;;  %4343 = vmatmul.mubr.bf16.gmra.mrb[36].mxu1 %v4058_v18  ;;  %3694 = vrot.lane.b32.xlu0 %v7139_v39, %s5946_s13 }
 0x2f5   : > { %3247 = vrot.lane.b32.xlu1 %v7126_v35, %s5946_s13 }
 0x2f6   : > { %v3936_v10 = vpop.permute.xlu0 %3935 }
 0x2f7   : > { %v3482_v17 = vpop.permute.xlu1 %3481 }
 0x2f8   : > { %3528 = vst.msk [vmem:[#allocation4 + $0x30] sm:$0xff] %vm3525_vm8, %v3482_v17  ;;  %3827 = vrot.lane.b32.xlu0 %v3781_v63, %s5945_s12  ;;  %v4021_v17 = vld [vmem:[#allocation3 + $0x19a] sm:$0xff] }
 0x2f9   : > { %3501 = vrot.lane.b32.xlu1 %v7131_v30, %s5947_s8  ;;  %v4062_v2 = vld [vmem:[#allocation4 + $0x38] sm:$0xff] }
 0x2fa   : > { %4350 = vmatprep.mubr.bf16.mxu1 %v4062_v2  ;;  %v3681_v25 = vpop.permute.xlu0 %3680 }
 0x2fb   : > { %v3226_v21 = vpop.permute.xlu1 %3225  ;;  %3723 = vst.msk [vmem:[#allocation4 + $0x80] sm:$0xff] %vm3267_vm6, %v3681_v25 }
 0x2fc   : > { %3271 = vst.msk [vmem:[#allocation4 + $0x48] sm:$0xff] %vm3267_vm6, %v3226_v21  ;;  %3955 = vrot.lane.b32.xlu0 %v7157_v13, %s5947_s8 }
 0x2fd   : > { %3245 = vrot.lane.b32.xlu1 %v7133_v50, %s5946_s13 }
 0x2fe   : > { %v3806_v8 = vpop.permute.xlu0 %3805 }
 0x2ff   : > { %v3355_v35 = vpop.permute.xlu1 %3354  ;;  %v4061_v20 = vld [vmem:[#allocation4 + $0x30] sm:$0xff]  ;;  %3850 = vst.msk [vmem:[#allocation4 + $0x50] sm:$0xff] %vm3396_vm7, %v3806_v8 }
 0x300   : > { %3400 = vst.msk [vmem:[#allocation4 + $0x48] sm:$0xff] %vm3396_vm7, %v3355_v35  ;;  %4351 = vmatmul.mubr.bf16.gmra.mrb[40].mxu1 %v4061_v20  ;;  %3825 = vrot.lane.b32.xlu0 %v7159_v34, %s5945_s12 }
 0x301   : > { %3529 = vst.msk [vmem:[#allocation4 + $0x48] sm:$0xff] %vm3525_vm8, %v3484_v58  ;;  %3374 = vrot.lane.b32.xlu1 %v7139_v39, %s5945_s12 }
 0x302   : > { %v3934_v50 = vpop.permute.xlu0 %3933 }
 0x303   : > { %v3488_v30 = vpop.permute.xlu1 %3487  ;;  %3978 = vst.msk [vmem:[#allocation4 + $0x50] sm:$0xff] %vm3525_vm8, %v3934_v50 }
 0x304   : > { %3953 = vrot.lane.b32.xlu0 %v7161_v52, %s5947_s8 }
 0x305   : > { %3376 = vrot.lane.b32.xlu1 %v7129_v33, %s5945_s12 }
 0x306   : > { %v3679_v5 = vpop.permute.xlu0 %3678 }
 0x307   : > { %v3232_v13 = vpop.permute.xlu1 %3231  ;;  %3722 = vst.msk [vmem:[#allocation4 + $0x68] sm:$0xff] %vm3267_vm6, %v3679_v5 }
 0x308   : > { %3274 = vst.msk [vmem:[#allocation4 + $0x90] sm:$0xff] %vm3267_vm6, %v3232_v13  ;;  %3698 = vrot.lane.b32.xlu0 %v7166_v40, %s5946_s13  ;;  %v4064_v44 = vld [vmem:[#allocation4 + $0x48] sm:$0xff] }
 0x309   : > { %3851 = vst.msk [vmem:[#allocation4 + $0x68] sm:$0xff] %vm3396_vm7, %v3808_v62  ;;  %3505 = vrot.lane.b32.xlu1 %v7159_v34, %s5947_s8  ;;  %v3782_v34 = vpack.c.bf16 %v3766_v51, %v3765_v4 }
 0x30a   : > { %3979 = vst.msk [vmem:[#allocation4 + $0x68] sm:$0xff] %vm3525_vm8, %v3936_v10  ;;  %v3812_v39 = vpop.permute.xlu0 %3811  ;;  %v4065_v31 = vld [vmem:[#allocation4 + $0x50] sm:$0xff] }
 0x30b   : > { %v3361_v33 = vpop.permute.xlu1 %3360  ;;  %4358 = vmatprep.mubr.bf16.mxu1 %v4065_v31  ;;  %v4022_v10 = vld [vmem:[#allocation3 + $0x1a2] sm:$0xff] }
 0x30c   : > { %3403 = vst.msk [vmem:[#allocation4 + $0x90] sm:$0xff] %vm3396_vm7, %v3361_v33  ;;  %4359 = vmatmul.mubr.bf16.gmra.mrb[44].mxu1 %v4064_v44  ;;  %3700 = vrot.lane.b32.xlu0 %v7168_v38, %s5946_s13  ;;  %v4038_v2 = vpack.c.bf16 %v4022_v10, %v4021_v17 }
 0x30d   : > { %3249 = vrot.lane.b32.xlu1 %v7161_v52, %s5946_s13 }
 0x30e   : > { %v3940_v41 = vpop.permute.xlu0 %3939  ;;  %4054 = vst.msk [vmem:[#allocation4 + $0x178] sm:$0xff] %vm280_vm4, %v4038_v2 }
 0x30f   : > { %v3486_v3 = vpop.permute.xlu1 %3485 }
 0x310   : > { %3530 = vst.msk [vmem:[#allocation4 + $0x60] sm:$0xff] %vm3525_vm8, %v3486_v3  ;;  %3829 = vrot.lane.b32.xlu0 %v3782_v34, %s5945_s12 }
 0x311   : > { %3378 = vrot.lane.b32.xlu1 %v7166_v40, %s5945_s12  ;;  %v4068_v55 = vld [vmem:[#allocation4 + $0x68] sm:$0xff]  ;;  %s215_s12 = sand.u32 1, %s5933_s19  }
 0x312   : > { %4366 = vmatprep.mubr.bf16.mxu1 %v4068_v55  ;;  %v3685_v52 = vpop.permute.xlu0 %3684  ;;  %s4736_s13 = sshll.u32 %s215_s12, 8  ;;  %s7593_s23 = scalar_lea.sflag [#allocation6], %s215_s12 }
 0x313   : > { %v3230_v59 = vpop.permute.xlu1 %3229  ;;  %3725 = vst.msk [vmem:[#allocation4 + $0xb0] sm:$0xff] %vm3267_vm6, %v3685_v52  ;;  %s7492_s11 = scalar_lea.vmem [#allocation5], %s4736_s13 }
 0x314   : > { %3273 = vst.msk [vmem:[#allocation4 + $0x78] sm:$0xff] %vm3267_vm6, %v3230_v59  ;;  %3957 = vrot.lane.b32.xlu0 %v3910_v26, %s5947_s8  ;;  %s4670_s15 = sshll.u32 %s7492_s11, 4  ;;  %s7586_s15 = int_to_ptr.vmem [resolvable:$true] %s4670_s15 }
 0x315   : > { %3507 = vrot.lane.b32.xlu1 %v3781_v63, %s5947_s8  ;;  %s5879_s25 = scalar_lea.vmem %s7586_s15, 4096  ;;  %p5886_p0 = scmp.lt.s32.totalorder %s7586_s15, %s5884_s30 }
 0x316   : > { %v3810_v28 = vpop.permute.xlu0 %3809  ;;  %p5880_p11 = scmp.ne.s32.totalorder %s7586_s15, %s5879_s25  ;;  %p5887_p1 = scmp.lt.s32.totalorder %s5885_s6, %s5879_s25 }
 0x317   : > { %v3359_v38 = vpop.permute.xlu1 %3358  ;;  %v4067_v27 = vld [vmem:[#allocation4 + $0x60] sm:$0xff]  ;;  %3852 = vst.msk [vmem:[#allocation4 + $0x80] sm:$0xff] %vm3396_vm7, %v3810_v28 }
 0x318   : > { %3402 = vst.msk [vmem:[#allocation4 + $0x78] sm:$0xff] %vm3396_vm7, %v3359_v38  ;;  %4367 = vmatmul.mubr.bf16.gmra.mrb[48].mxu1 %v4067_v27  ;;  %p5881_p12 = pnand %p5880_p11, %p6019_p5  ;;  %p5888_p2 = por %p5887_p1, %p5886_p0 }
 0x319   : > { %3531 = vst.msk [vmem:[#allocation4 + $0x78] sm:$0xff] %vm3525_vm8, %v3488_v30 }
 0x31a   : > { %v3938_v11 = vpop.permute.xlu0 %3937  ;;  %p5882_p13 = pneg %p5881_p12 }
 0x31b   : > { %v3492_v40 = vpop.permute.xlu1 %3491  ;;  %3980 = vst.msk [vmem:[#allocation4 + $0x80] sm:$0xff] %vm3525_vm8, %v3938_v11 }
 0x31c   : > { %p5889_p3 = pnand %p5888_p2, %p5882_p13 }
 0x31e   : > { %v3683_v7 = vpop.permute.xlu0 %3682 }
 0x31f   : > { %v3236_v48 = vpop.permute.xlu1 %3235  ;;  %3724 = vst.msk [vmem:[#allocation4 + $0x98] sm:$0xff] %vm3267_vm6, %v3683_v7 }
 0x320   : > { %3276 = vst.msk [vmem:[#allocation4 + $0xc0] sm:$0xff] %vm3267_vm6, %v3236_v48  ;;  %v4070_v60 = vld [vmem:[#allocation4 + $0x78] sm:$0xff] }
 0x321   : > { %3853 = vst.msk [vmem:[#allocation4 + $0x98] sm:$0xff] %vm3396_vm7, %v3812_v39 }
 0x322   : > { %3981 = vst.msk [vmem:[#allocation4 + $0x98] sm:$0xff] %vm3525_vm8, %v3940_v41  ;;  %v3816_v42 = vpop.permute.xlu0 %3815  ;;  %v4071_v1 = vld [vmem:[#allocation4 + $0x80] sm:$0xff] }
 0x323   : > { %v3365_v22 = vpop.permute.xlu1 %3364  ;;  %4374 = vmatprep.mubr.bf16.mxu1 %v4071_v1 }
 0x324   : > { %3405 = vst.msk [vmem:[#allocation4 + $0xc0] sm:$0xff] %vm3396_vm7, %v3365_v22  ;;  %4375 = vmatmul.mubr.bf16.gmra.mrb[52].mxu1 %v4070_v60 }
 0x326   : > { %v3944_v47 = vpop.permute.xlu0 %3943 }
 0x327   : > { %v3490_v23 = vpop.permute.xlu1 %3489 }
 0x328   : > { %3532 = vst.msk [vmem:[#allocation4 + $0x90] sm:$0xff] %vm3525_vm8, %v3490_v23 }
 0x329   : > { %v4074_v61 = vld [vmem:[#allocation4 + $0x98] sm:$0xff] }
 0x32a   : > { %4382 = vmatprep.mubr.bf16.mxu1 %v4074_v61  ;;  %v3689_v57 = vpop.permute.xlu0 %3688 }
 0x32b   : > { %v3234_v6 = vpop.permute.xlu1 %3233  ;;  %3727 = vst.msk [vmem:[#allocation4 + $0xe0] sm:$0xff] %vm3267_vm6, %v3689_v57 }
 0x32c   : > { %3275 = vst.msk [vmem:[#allocation4 + $0xa8] sm:$0xff] %vm3267_vm6, %v3234_v6 }
 0x32e   : > { %v3814_v16 = vpop.permute.xlu0 %3813 }
 0x32f   : > { %v3363_v12 = vpop.permute.xlu1 %3362  ;;  %v4073_v24 = vld [vmem:[#allocation4 + $0x90] sm:$0xff]  ;;  %3854 = vst.msk [vmem:[#allocation4 + $0xb0] sm:$0xff] %vm3396_vm7, %v3814_v16 }
 0x330   : > { %3404 = vst.msk [vmem:[#allocation4 + $0xa8] sm:$0xff] %vm3396_vm7, %v3363_v12  ;;  %4383 = vmatmul.mubr.bf16.gmra.mrb[56].mxu1 %v4073_v24 }
 0x331   : > { %3533 = vst.msk [vmem:[#allocation4 + $0xa8] sm:$0xff] %vm3525_vm8, %v3492_v40 }
 0x332   : > { %v3942_v43 = vpop.permute.xlu0 %3941 }
 0x333   : > { %v3496_v9 = vpop.permute.xlu1 %3495  ;;  %3982 = vst.msk [vmem:[#allocation4 + $0xb0] sm:$0xff] %vm3525_vm8, %v3942_v43  ;;  %v4057_v43 = vld [vmem:[#allocation4 + $0x10] sm:$0xff] }
 0x336   : > { %v3687_v56 = vpop.permute.xlu0 %3686 }
 0x337   : > { %v3240_v15 = vpop.permute.xlu1 %3239  ;;  %3726 = vst.msk [vmem:[#allocation4 + $0xc8] sm:$0xff] %vm3267_vm6, %v3687_v56  ;;  %v4063_v56 = vld [vmem:[#allocation4 + $0x40] sm:$0xff] }
 0x338   : > { %3278 = vst.msk [vmem:[#allocation4 + $0xf0] sm:$0xff] %vm3267_vm6, %v3240_v15  ;;  %v4076_v58 = vld [vmem:[#allocation4 + $0xa8] sm:$0xff] }
 0x339   : > { %3855 = vst.msk [vmem:[#allocation4 + $0xc8] sm:$0xff] %vm3396_vm7, %v3816_v42  ;;  %v4060_v15 = vld [vmem:[#allocation4 + $0x28] sm:$0xff] }
 0x33a   : > { %3983 = vst.msk [vmem:[#allocation4 + $0xc8] sm:$0xff] %vm3525_vm8, %v3944_v47  ;;  %v3820_v46 = vpop.permute.xlu0 %3819  ;;  %v4077_v29 = vld [vmem:[#allocation4 + $0xb0] sm:$0xff] }
 0x33b   : > { %v3369_v0 = vpop.permute.xlu1 %3368  ;;  %4390 = vmatprep.mubr.bf16.mxu1 %v4077_v29  ;;  %v4072_v29 = vld [vmem:[#allocation4 + $0x88] sm:$0xff] }
 0x33c   : > { %3407 = vst.msk [vmem:[#allocation4 + $0xf0] sm:$0xff] %vm3396_vm7, %v3369_v0  ;;  %4391 = vmatmul.mubr.bf16.gmra.mrb[60].mxu1 %v4076_v58  ;;  %v4066_v0 = vld [vmem:[#allocation4 + $0x58] sm:$0xff]  ;;  %v4075_v58 = vld [vmem:[#allocation4 + $0xa0] sm:$0xff] }
 0x33e   : > { %v3948_v37 = vpop.permute.xlu0 %3947 }
 0x33f   : > { %v3494_v32 = vpop.permute.xlu1 %3493 }
 0x340   : > { %3534 = vst.msk [vmem:[#allocation4 + $0xc0] sm:$0xff] %vm3525_vm8, %v3494_v32  ;;  %v4078_v32 = vld [vmem:[#allocation4 + $0xb8] sm:$0xff] }
 0x341   : > { %v4080_v14 = vld [vmem:[#allocation4 + $0xc8] sm:$0xff] }
 0x342   : > { %4398 = vmatprep.mubr.bf16.mxu1 %v4080_v14  ;;  %v3693_v62 = vpop.permute.xlu0 %3692  ;;  %v4084_v14 = vld [vmem:[#allocation4 + $0xe8] sm:$0xff] }
 0x343   : > { %v3238_v36 = vpop.permute.xlu1 %3237  ;;  %3729 = vst.msk [vmem:[#allocation4 + $0x110] sm:$0xff] %vm3267_vm6, %v3693_v62 }
 0x344   : > { %3277 = vst.msk [vmem:[#allocation4 + $0xd8] sm:$0xff] %vm3267_vm6, %v3238_v36  ;;  %v4087_v36 = vld [vmem:[#allocation4 + $0x100] sm:$0xff] }
 0x346   : > { %v3818_v18 = vpop.permute.xlu0 %3817 }
 0x347   : > { %v3367_v45 = vpop.permute.xlu1 %3366  ;;  %v4079_v53 = vld [vmem:[#allocation4 + $0xc0] sm:$0xff]  ;;  %3856 = vst.msk [vmem:[#allocation4 + $0xe0] sm:$0xff] %vm3396_vm7, %v3818_v18 }
 0x348   : > { %3406 = vst.msk [vmem:[#allocation4 + $0xd8] sm:$0xff] %vm3396_vm7, %v3367_v45  ;;  %4399 = vmatmul.mubr.bf16.gmra.mrb[64].mxu1 %v4079_v53 }
 0x349   : > { %3535 = vst.msk [vmem:[#allocation4 + $0xd8] sm:$0xff] %vm3525_vm8, %v3496_v9 }
 0x34a   : > { %v3946_v63 = vpop.permute.xlu0 %3945 }
 0x34b   : > { %v3500_v19 = vpop.permute.xlu1 %3499  ;;  %3984 = vst.msk [vmem:[#allocation4 + $0xe0] sm:$0xff] %vm3525_vm8, %v3946_v63  ;;  %v4093_v63 = vld [vmem:[#allocation4 + $0x130] sm:$0xff] }
 0x34e   : > { %v3691_v25 = vpop.permute.xlu0 %3690 }
 0x34f   : > { %v3244_v21 = vpop.permute.xlu1 %3243  ;;  %3728 = vst.msk [vmem:[#allocation4 + $0xf8] sm:$0xff] %vm3267_vm6, %v3691_v25  ;;  %v4096_v25 = vld [vmem:[#allocation4 + $0x148] sm:$0xff] }
 0x350   : > { %3280 = vst.msk [vmem:[#allocation4 + $0x120] sm:$0xff] %vm3267_vm6, %v3244_v21  ;;  %v4082_v30 = vld [vmem:[#allocation4 + $0xd8] sm:$0xff] }
 0x351   : > { %3857 = vst.msk [vmem:[#allocation4 + $0xf8] sm:$0xff] %vm3396_vm7, %v3820_v46  ;;  %v4069_v46 = vld [vmem:[#allocation4 + $0x70] sm:$0xff] }
 0x352   : > { %3985 = vst.msk [vmem:[#allocation4 + $0xf8] sm:$0xff] %vm3525_vm8, %v3948_v37  ;;  %v3824_v8 = vpop.permute.xlu0 %3823  ;;  %v4083_v20 = vld [vmem:[#allocation4 + $0xe0] sm:$0xff]  ;;  %v4081_v37 = vld [vmem:[#allocation4 + $0xd0] sm:$0xff] }
 0x353   : > { %v3373_v35 = vpop.permute.xlu1 %3372  ;;  %4406 = vmatprep.mubr.bf16.mxu1 %v4083_v20  ;;  %v4099_v20 = vld [vmem:[#allocation4 + $0x160] sm:$0xff] }
 0x354   : > { %3409 = vst.msk [vmem:[#allocation4 + $0x120] sm:$0xff] %vm3396_vm7, %v3373_v35  ;;  %4407 = vmatmul.mubr.bf16.gmra.mrb[68].mxu1 %v4082_v30 }
 0x356   : > { %v3952_v13 = vpop.permute.xlu0 %3951 }
 0x357   : > { %v3498_v50 = vpop.permute.xlu1 %3497 }
 0x358   : > { %3536 = vst.msk [vmem:[#allocation4 + $0xf0] sm:$0xff] %vm3525_vm8, %v3498_v50 }
 0x359   : > { %v4086_v5 = vld [vmem:[#allocation4 + $0xf8] sm:$0xff] }
 0x35a   : > { %4414 = vmatprep.mubr.bf16.mxu1 %v4086_v5  ;;  %v3697_v39 = vpop.permute.xlu0 %3696 }
 0x35b   : > { %v3242_v33 = vpop.permute.xlu1 %3241  ;;  %3731 = vst.msk [vmem:[#allocation4 + $0x140] sm:$0xff] %vm3267_vm6, %v3697_v39 }
 0x35c   : > { %3279 = vst.msk [vmem:[#allocation4 + $0x108] sm:$0xff] %vm3267_vm6, %v3242_v33 }
 0x35e   : > { %v3822_v4 = vpop.permute.xlu0 %3821 }
 0x35f   : > { %v3371_v31 = vpop.permute.xlu1 %3370  ;;  %v4085_v51 = vld [vmem:[#allocation4 + $0xf0] sm:$0xff]  ;;  %3858 = vst.msk [vmem:[#allocation4 + $0x110] sm:$0xff] %vm3396_vm7, %v3822_v4 }
 0x360   : > { %3408 = vst.msk [vmem:[#allocation4 + $0x108] sm:$0xff] %vm3396_vm7, %v3371_v31  ;;  %4415 = vmatmul.mubr.bf16.gmra.mrb[72].mxu1 %v4085_v51 }
 0x361   : > { %3537 = vst.msk [vmem:[#allocation4 + $0x108] sm:$0xff] %vm3525_vm8, %v3500_v19  ;;  %v4090_v19 = vld [vmem:[#allocation4 + $0x118] sm:$0xff] }
 0x362   : > { %v3950_v34 = vpop.permute.xlu0 %3949 }
 0x363   : > { %v3504_v44 = vpop.permute.xlu1 %3503  ;;  %3986 = vst.msk [vmem:[#allocation4 + $0x110] sm:$0xff] %vm3525_vm8, %v3950_v34 }
 0x366   : > { %v3695_v41 = vpop.permute.xlu0 %3694 }
 0x367   : > { %v3248_v3 = vpop.permute.xlu1 %3247  ;;  %3730 = vst.msk [vmem:[#allocation4 + $0x128] sm:$0xff] %vm3267_vm6, %v3695_v41 }
 0x368   : > { %3282 = vst.msk [vmem:[#allocation4 + $0x150] sm:$0xff] %vm3267_vm6, %v3248_v3  ;;  %v4088_v26 = vld [vmem:[#allocation4 + $0x108] sm:$0xff] }
 0x369   : > { %3859 = vst.msk [vmem:[#allocation4 + $0x128] sm:$0xff] %vm3396_vm7, %v3824_v8 }
 0x36a   : > { %3987 = vst.msk [vmem:[#allocation4 + $0x128] sm:$0xff] %vm3525_vm8, %v3952_v13  ;;  %v4089_v54 = vld [vmem:[#allocation4 + $0x110] sm:$0xff]  ;;  %v3828_v55 = vpop.permute.xlu0 %3827  ;;  %v4102_v13 = vld [vmem:[#allocation4 + $0x178] sm:$0xff] }
 0x36b   : > { %v3502_v49 = vpop.permute.xlu1 %3501  ;;  %4422 = vmatprep.mubr.bf16.mxu1 %v4089_v54 }
 0x36c   : > { %3538 = vst.msk [vmem:[#allocation4 + $0x120] sm:$0xff] %vm3525_vm8, %v3502_v49  ;;  %4423 = vmatmul.mubr.bf16.gmra.mrb[76].mxu1 %v4088_v26 }
 0x36e   : > { %v3956_v52 = vpop.permute.xlu0 %3955 }
 0x36f   : > { %v3246_v59 = vpop.permute.xlu1 %3245 }
 0x370   : > { %3281 = vst.msk [vmem:[#allocation4 + $0x138] sm:$0xff] %vm3267_vm6, %v3246_v59 }
 0x371   : > { %v4092_v38 = vld [vmem:[#allocation4 + $0x128] sm:$0xff] }
 0x372   : > { %4430 = vmatprep.mubr.bf16.mxu1 %v4092_v38  ;;  %v3826_v40 = vpop.permute.xlu0 %3825 }
 0x373   : > { %v3375_v28 = vpop.permute.xlu1 %3374  ;;  %v4091_v27 = vld [vmem:[#allocation4 + $0x120] sm:$0xff]  ;;  %3860 = vst.msk [vmem:[#allocation4 + $0x140] sm:$0xff] %vm3396_vm7, %v3826_v40 }
 0x374   : > { %3410 = vst.msk [vmem:[#allocation4 + $0x138] sm:$0xff] %vm3396_vm7, %v3375_v28  ;;  %4431 = vmatmul.mubr.bf16.gmra.mrb[80].mxu1 %v4091_v27 }
 0x375   : > { %3539 = vst.msk [vmem:[#allocation4 + $0x138] sm:$0xff] %vm3525_vm8, %v3504_v44 }
 0x376   : > { %v3954_v48 = vpop.permute.xlu0 %3953 }
 0x377   : > { %v3377_v11 = vpop.permute.xlu1 %3376  ;;  %3988 = vst.msk [vmem:[#allocation4 + $0x140] sm:$0xff] %vm3525_vm8, %v3954_v48 }
 0x378   : > { %3411 = vst.msk [vmem:[#allocation4 + $0x150] sm:$0xff] %vm3396_vm7, %v3377_v11 }
 0x37a   : > { %v3699_v22 = vpop.permute.xlu0 %3698 }
 0x37b   : > { %v3506_v7 = vpop.permute.xlu1 %3505  ;;  %3732 = vst.msk [vmem:[#allocation4 + $0x158] sm:$0xff] %vm3267_vm6, %v3699_v22 }
 0x37c   : > { %3540 = vst.msk [vmem:[#allocation4 + $0x150] sm:$0xff] %vm3525_vm8, %v3506_v7  ;;  %v4094_v23 = vld [vmem:[#allocation4 + $0x138] sm:$0xff] }
 0x37d   : > { %3861 = vst.msk [vmem:[#allocation4 + $0x158] sm:$0xff] %vm3396_vm7, %v3828_v55 }
 0x37e   : > { %3989 = vst.msk [vmem:[#allocation4 + $0x158] sm:$0xff] %vm3525_vm8, %v3956_v52  ;;  %v3701_v1 = vpop.permute.xlu0 %3700  ;;  %v4095_v60 = vld [vmem:[#allocation4 + $0x140] sm:$0xff] }
 0x37f   : > { %v3250_v42 = vpop.permute.xlu1 %3249  ;;  %3733 = vst.msk [vmem:[#allocation4 + $0x170] sm:$0xff] %vm3267_vm6, %v3701_v1  ;;  %4438 = vmatprep.mubr.bf16.mxu1 %v4095_v60 }
 0x380   : > { %3283 = vst.msk [vmem:[#allocation4 + $0x168] sm:$0xff] %vm3267_vm6, %v3250_v42  ;;  %4439 = vmatmul.mubr.bf16.gmra.mrb[84].mxu1 %v4094_v23 }
 0x382   : > { %v3830_v61 = vpop.permute.xlu0 %3829 }
 0x383   : > { %v3379_v47 = vpop.permute.xlu1 %3378  ;;  %3862 = vst.msk [vmem:[#allocation4 + $0x170] sm:$0xff] %vm3396_vm7, %v3830_v61  ;;  %v4097_v16 = vld [vmem:[#allocation4 + $0x150] sm:$0xff] }
 0x384   : > { %3412 = vst.msk [vmem:[#allocation4 + $0x168] sm:$0xff] %vm3396_vm7, %v3379_v47 }
 0x385   : > { %v4098_v6 = vld [vmem:[#allocation4 + $0x158] sm:$0xff] }
 0x386   : > { %4446 = vmatprep.mubr.bf16.mxu1 %v4098_v6  ;;  %v3958_v12 = vpop.permute.xlu0 %3957 }
 0x387   : > { %v3508_v57 = vpop.permute.xlu1 %3507  ;;  %3990 = vst.msk [vmem:[#allocation4 + $0x170] sm:$0xff] %vm3525_vm8, %v3958_v12 }
 0x388   : > { %3541 = vst.msk [vmem:[#allocation4 + $0x168] sm:$0xff] %vm3525_vm8, %v3508_v57  ;;  %4447 = vmatmul.mubr.bf16.gmra.mrb[88].mxu1 %v4097_v16 }
 0x38e   : > { %v4101_v9 = vld [vmem:[#allocation4 + $0x170] sm:$0xff] }
 0x38f   : > { %v4100_v24 = vld [vmem:[#allocation4 + $0x168] sm:$0xff]  ;;  %4454 = vmatprep.mubr.bf16.mxu1 %v4101_v9 }
 0x390   : > { %4455 = vmatmul.mubr.bf16.gmra.mrb[92].mxu1 %v4100_v24 }
 0x391   : > { %5527 = vmatprep.mubr.msk.bf16.mxu1 %vm280_vm4, %v4057_v43 }
 0x398   : > { %5528 = vmatmul.mubr.msk.bf16.vlgmr.msra.gmra.mrb[96].mxu1 %vm280_vm4, %v4060_v15 }
 0x399   : > { %5531 = vmatprep.mubr.msk.bf16.mxu1 %vm280_vm4, %v4063_v56 }
 0x3a0   : > { %5532 = vmatmul.mubr.msk.bf16.gmra.mrb[100].mxu1 %vm280_vm4, %v4066_v0 }
 0x3a1   : > { %5535 = vmatprep.mubr.msk.bf16.mxu1 %vm280_vm4, %v4069_v46 }
 0x3a8   : > { %5536 = vmatmul.mubr.msk.bf16.gmra.mrb[104].mxu1 %vm280_vm4, %v4072_v29 }
 0x3a9   : > { %5539 = vmatprep.mubr.msk.bf16.mxu1 %vm280_vm4, %v4075_v58 }
 0x3b0   : > { %5540 = vmatmul.mubr.msk.bf16.gmra.mrb[108].mxu1 %vm280_vm4, %v4078_v32 }
 0x3b1   : > { %5543 = vmatprep.mubr.msk.bf16.mxu1 %vm280_vm4, %v4081_v37 }
 0x3b8   : > { %5544 = vmatmul.mubr.msk.bf16.gmra.mrb[112].mxu1 %vm280_vm4, %v4084_v14 }
 0x3b9   : > { %5547 = vmatprep.mubr.msk.bf16.mxu1 %vm280_vm4, %v4087_v36 }
 0x3bb   : > { %v5103_v62 = vpop.f32.mrb[32].mxu1 }
 0x3bc   : > { %v5104_v45 = vpop.f32.mrb[33].mxu1 }
 0x3bd   : > { %v7407_v18 = vadd.f32 %v5104_v45, %v5103_v62  ;;  %v5106_v53 = vpop.f32.mrb[34].mxu1 }
 0x3be   : > { %v5107_v17 = vpop.f32.mrb[35].mxu1 }
 0x3bf   : > { %v7409_v10 = vadd.f32 %v5107_v17, %v5106_v53 }
 0x3c0   : > { %5548 = vmatmul.mubr.msk.bf16.gmra.mrb[116].mxu1 %vm280_vm4, %v4090_v19 }
 0x3c1   : > { %5551 = vmatprep.mubr.msk.bf16.mxu1 %vm280_vm4, %v4093_v63 }
 0x3c7   : > { %v5109_v2 = vpop.f32.mrb[36].mxu1 }
 0x3c8   : > { %v5110_v21 = vpop.f32.mrb[37].mxu1  ;;  %5552 = vmatmul.mubr.msk.bf16.gmra.mrb[120].mxu1 %vm280_vm4, %v4096_v25 }
 0x3c9   : > { %v7413_v35 = vadd.f32 %v5110_v21, %v5109_v2  ;;  %v5112_v8 = vpop.f32.mrb[38].mxu1  ;;  %5555 = vmatprep.mubr.msk.bf16.mxu1 %vm280_vm4, %v4099_v20 }
 0x3ca   : > { %v5113_v30 = vpop.f32.mrb[39].mxu1 }
 0x3cb   : > { %v7417_v50 = vadd.f32 %v5113_v30, %v5112_v8 }
 0x3d0   : > { %5556 = vmatmul.mubr.msk.bf16.gmra.mrb[124].mxu1 %vm280_vm4, %v4102_v13 }
 0x3d3   : > { %v5115_v5 = vpop.f32.mrb[40].mxu1 }
 0x3d4   : > { %v5116_v33 = vpop.f32.mrb[41].mxu1 }
 0x3d5   : > { %v7420_v39 = vadd.f32 %v5116_v33, %v5115_v5  ;;  %v5118_v31 = vpop.f32.mrb[42].mxu1 }
 0x3d6   : > { %v5119_v4 = vpop.f32.mrb[43].mxu1 }
 0x3d7   : > { %v7422_v51 = vadd.f32 %v5119_v4, %v5118_v31 }
 0x3df   : > { %v5121_v44 = vpop.f32.mrb[44].mxu1 }
 0x3e0   : > { %v5122_v34 = vpop.f32.mrb[45].mxu1 }
 0x3e1   : > { %v7424_v3 = vadd.f32 %v5122_v34, %v5121_v44  ;;  %v5124_v41 = vpop.f32.mrb[46].mxu1 }
 0x3e2   : > { %v5125_v49 = vpop.f32.mrb[47].mxu1 }
 0x3e3   : > { %v7426_v54 = vadd.f32 %v5125_v49, %v5124_v41 }
 0x3eb   : > { %v5127_v55 = vpop.f32.mrb[48].mxu1 }
 0x3ec   : > { %v5128_v26 = vpop.f32.mrb[49].mxu1 }
 0x3ed   : > { %v7428_v59 = vadd.f32 %v5128_v26, %v5127_v55  ;;  %v5130_v52 = vpop.f32.mrb[50].mxu1 }
 0x3ee   : > { %v5131_v38 = vpop.f32.mrb[51].mxu1 }
 0x3ef   : > { %v7430_v28 = vadd.f32 %v5131_v38, %v5130_v52 }
 0x3f7   : > { %v5133_v27 = vpop.f32.mrb[52].mxu1 }
 0x3f8   : > { %v5134_v40 = vpop.f32.mrb[53].mxu1 }
 0x3f9   : > { %v7432_v11 = vadd.f32 %v5134_v40, %v5133_v27  ;;  %v5136_v48 = vpop.f32.mrb[54].mxu1 }
 0x3fa   : > { %v5137_v7 = vpop.f32.mrb[55].mxu1 }
 0x3fb   : > { %v7434_v22 = vadd.f32 %v5137_v7, %v5136_v48 }
 0x403   : > { %v5139_v42 = vpop.f32.mrb[56].mxu1 }
 0x404   : > { %v5140_v1 = vpop.f32.mrb[57].mxu1 }
 0x405   : > { %v7436_v60 = vadd.f32 %v5140_v1, %v5139_v42  ;;  %v5142_v23 = vpop.f32.mrb[58].mxu1 }
 0x406   : > { %v5143_v47 = vpop.f32.mrb[59].mxu1 }
 0x407   : > { %v7438_v61 = vadd.f32 %v5143_v47, %v5142_v23 }
 0x40f   : > { %v5145_v6 = vpop.f32.mrb[60].mxu1 }
 0x410   : > { %v5146_v57 = vpop.f32.mrb[61].mxu1 }
 0x411   : > { %v7440_v12 = vadd.f32 %v5146_v57, %v5145_v6  ;;  %v5148_v16 = vpop.f32.mrb[62].mxu1 }
 0x412   : > { %v5149_v24 = vpop.f32.mrb[63].mxu1 }
 0x413   : > { %v7442_v9 = vadd.f32 %v5149_v24, %v5148_v16 }
 0x41b   : > { %v5151_v43 = vpop.f32.mrb[64].mxu1 }
 0x41c   : > { %v5152_v15 = vpop.f32.mrb[65].mxu1 }
 0x41d   : > { %v7444_v56 = vadd.f32 %v5152_v15, %v5151_v43  ;;  %v5154_v0 = vpop.f32.mrb[66].mxu1  ;;  %v7482_v43 = vld [vmem:[%s7638_s4] ss:$0 sm:$0xff] }
 0x41e   : > { %v5155_v46 = vpop.f32.mrb[67].mxu1  ;;  %v4345_v15 = vadd.f32 %v7413_v35, %v7482_v43 }
 0x41f   : > { %v7446_v29 = vadd.f32 %v5155_v46, %v5154_v0  ;;  %v4337_v46 = vadd.f32 %v7407_v18, %v7482_v43 }
 0x427   : > { %v5157_v58 = vpop.f32.mrb[68].mxu1 }
 0x428   : > { %v5158_v32 = vpop.f32.mrb[69].mxu1 }
 0x429   : > { %v7448_v37 = vadd.f32 %v5158_v32, %v5157_v58  ;;  %v5160_v14 = vpop.f32.mrb[70].mxu1 }
 0x42a   : > { %v5161_v36 = vpop.f32.mrb[71].mxu1 }
 0x42b   : > { %v7450_v62 = vadd.f32 %v5161_v36, %v5160_v14  ;;  %v4348_v14 = vadd.f32 %v7417_v50, %v7482_v43 }
 0x433   : > { %v5163_v45 = vpop.f32.mrb[72].mxu1 }
 0x434   : > { %v5164_v53 = vpop.f32.mrb[73].mxu1 }
 0x435   : > { %v7452_v17 = vadd.f32 %v5164_v53, %v5163_v45  ;;  %v5166_v19 = vpop.f32.mrb[74].mxu1  ;;  %v4340_v53 = vadd.f32 %v7409_v10, %v7482_v43  ;;  %v4361_v10 = vadd.f32 %v7424_v3, %v7482_v43 }
 0x436   : > { %v5167_v63 = vpop.f32.mrb[75].mxu1 }
 0x437   : > { %v7454_v2 = vadd.f32 %v5167_v63, %v5166_v19  ;;  %v4353_v63 = vadd.f32 %v7420_v39, %v7482_v43  ;;  %v4377_v39 = vadd.f32 %v7432_v11, %v7482_v43 }
 0x43f   : > { %v5169_v21 = vpop.f32.mrb[76].mxu1 }
 0x440   : > { %v5170_v25 = vpop.f32.mrb[77].mxu1 }
 0x441   : > { %v7456_v8 = vadd.f32 %v5170_v25, %v5169_v21  ;;  %v5172_v20 = vpop.f32.mrb[78].mxu1 }
 0x442   : > { %v5173_v30 = vpop.f32.mrb[79].mxu1 }
 0x443   : > { %v7458_v13 = vadd.f32 %v5173_v30, %v5172_v20  ;;  %v4364_v20 = vadd.f32 %v7426_v54, %v7482_v43 }
 0x447   : > { %v5175_v5 = vpop.f32.mrb[80].mxu1 }
 0x448   : > { %v5176_v33 = vpop.f32.mrb[81].mxu1 }
 0x449   : > { %v7460_v31 = vadd.f32 %v5176_v33, %v5175_v5  ;;  %v5178_v4 = vpop.f32.mrb[82].mxu1  ;;  %v4356_v33 = vadd.f32 %v7422_v51, %v7482_v43 }
 0x44a   : > { %v5179_v44 = vpop.f32.mrb[83].mxu1 }
 0x44b   : > { %v7462_v34 = vadd.f32 %v5179_v44, %v5178_v4 }
 0x453   : > { %v5181_v41 = vpop.f32.mrb[84].mxu1 }
 0x454   : > { %v5182_v49 = vpop.f32.mrb[85].mxu1 }
 0x455   : > { %v7464_v55 = vadd.f32 %v5182_v49, %v5181_v41  ;;  %v5184_v26 = vpop.f32.mrb[86].mxu1  ;;  %v4369_v41 = vadd.f32 %v7428_v59, %v7482_v43  ;;  %v4393_v59 = vadd.f32 %v7440_v12, %v7482_v43 }
 0x456   : > { %v5185_v52 = vpop.f32.mrb[87].mxu1 }
 0x457   : > { %v7466_v38 = vadd.f32 %v5185_v52, %v5184_v26  ;;  %v4380_v26 = vadd.f32 %v7434_v22, %v7482_v43 }
 0x45b   : > { %v5187_v27 = vpop.f32.mrb[88].mxu1 }
 0x45c   : > { %v5188_v40 = vpop.f32.mrb[89].mxu1 }
 0x45d   : > { %v7468_v48 = vadd.f32 %v5188_v40, %v5187_v27  ;;  %v5190_v7 = vpop.f32.mrb[90].mxu1  ;;  %v4372_v40 = vadd.f32 %v7430_v28, %v7482_v43 }
 0x45e   : > { %v5191_v42 = vpop.f32.mrb[91].mxu1 }
 0x45f   : > { %v7470_v1 = vadd.f32 %v5191_v42, %v5190_v7 }
 0x463   : > { %v5193_v23 = vpop.f32.mrb[92].mxu1 }
 0x464   : > { %v5194_v47 = vpop.f32.mrb[93].mxu1 }
 0x465   : > { %v7472_v6 = vadd.f32 %v5194_v47, %v5193_v23  ;;  %v5196_v57 = vpop.f32.mrb[94].mxu1  ;;  %v4385_v23 = vadd.f32 %v7436_v60, %v7482_v43  ;;  %v4409_v60 = vadd.f32 %v7448_v37, %v7482_v43 }
 0x466   : > { %v5197_v16 = vpop.f32.mrb[95].mxu1 }
 0x467   : > { %v7475_v24 = vadd.f32 %v5197_v16, %v5196_v57  ;;  %v4396_v57 = vadd.f32 %v7442_v9, %v7482_v43 }
 0x46b   : > { %v5529_v0 = vpop.f32.mrb[96].mxu1 }
 0x46c   : > { %v4506_v58 = vadd.f32 %v5529_v0, %v4345_v15  ;;  %v4497_v32 = vpop.f32.mrb[97].mxu1  ;;  %v4388_v0 = vadd.f32 %v7438_v61, %v7482_v43 }
 0x46d   : > { %v4498_v36 = vadd.f32 %v4497_v32, %v4337_v46  ;;  %v5530_v45 = vpop.f32.mrb[98].mxu1  ;;  %v4401_v32 = vadd.f32 %v7444_v56, %v7482_v43  ;;  %v4425_v56 = vadd.f32 %v7456_v8, %v7482_v43 }
 0x46e   : > { %4626 = vst [vmem:[%s7492_s11 + $0x10] sm:$0xff] %v4506_v58  ;;  %v4509_v35 = vadd.f32 %v5530_v45, %v4348_v14  ;;  %v4500_v18 = vpop.f32.mrb[99].mxu1 }
 0x46f   : > { %4624 = vst [vmem:[%s7492_s11] sm:$0xff] %v4498_v36  ;;  %v4501_v19 = vadd.f32 %v4500_v18, %v4340_v53  ;;  %v4412_v36 = vadd.f32 %v7450_v62, %v7482_v43 }
 0x470   : > { %4627 = vst [vmem:[%s7492_s11 + $0x18] sm:$0xff] %v4509_v35  ;;  %v4404_v35 = vadd.f32 %v7446_v29, %v7482_v43 }
 0x471   : > { %4625 = vst [vmem:[%s7492_s11 + $0x8] sm:$0xff] %v4501_v19 }
 0x473   : > { %v5533_v50 = vpop.f32.mrb[100].mxu1 }
 0x474   : > { %v4522_v21 = vadd.f32 %v5533_v50, %v4361_v10  ;;  %v4513_v25 = vpop.f32.mrb[101].mxu1  ;;  %v4417_v10 = vadd.f32 %v7452_v17, %v7482_v43  ;;  %v4441_v17 = vadd.f32 %v7464_v55, %v7482_v43 }
 0x475   : > { %v4514_v30 = vadd.f32 %v4513_v25, %v4353_v63  ;;  %v5534_v5 = vpop.f32.mrb[102].mxu1  ;;  %v4428_v63 = vadd.f32 %v7458_v13, %v7482_v43 }
 0x476   : > { %4630 = vst [vmem:[%s7492_s11 + $0x30] sm:$0xff] %v4522_v21  ;;  %v4525_v4 = vadd.f32 %v5534_v5, %v4364_v20  ;;  %v4516_v44 = vpop.f32.mrb[103].mxu1  ;;  %v4420_v20 = vadd.f32 %v7454_v2, %v7482_v43 }
 0x477   : > { %4628 = vst [vmem:[%s7492_s11 + $0x20] sm:$0xff] %v4514_v30  ;;  %v4517_v3 = vadd.f32 %v4516_v44, %v4356_v33  ;;  %v4433_v33 = vadd.f32 %v7460_v31, %v7482_v43  ;;  %v4444_v44 = vadd.f32 %v7466_v38, %v7482_v43  ;;  %v4457_v31 = vadd.f32 %v7472_v6, %v7482_v43 }
 0x478   : > { %4631 = vst [vmem:[%s7492_s11 + $0x38] sm:$0xff] %v4525_v4  ;;  %v4449_v38 = vadd.f32 %v7468_v48, %v7482_v43  ;;  %v4452_v6 = vadd.f32 %v7470_v1, %v7482_v43 }
 0x479   : > { %4629 = vst [vmem:[%s7492_s11 + $0x28] sm:$0xff] %v4517_v3 }
 0x47b   : > { %v5537_v54 = vpop.f32.mrb[104].mxu1 }
 0x47c   : > { %v4538_v49 = vadd.f32 %v5537_v54, %v4377_v39  ;;  %v4529_v51 = vpop.f32.mrb[105].mxu1  ;;  %v4436_v54 = vadd.f32 %v7462_v34, %v7482_v43 }
 0x47d   : > { %v4530_v52 = vadd.f32 %v4529_v51, %v4369_v41  ;;  %v5538_v27 = vpop.f32.mrb[106].mxu1 }
 0x47e   : > { %4634 = vst [vmem:[%s7492_s11 + $0x50] sm:$0xff] %v4538_v49  ;;  %v4541_v7 = vadd.f32 %v5538_v27, %v4380_v26  ;;  %v4532_v42 = vpop.f32.mrb[107].mxu1 }
 0x47f   : > { %4632 = vst [vmem:[%s7492_s11 + $0x40] sm:$0xff] %v4530_v52  ;;  %v4533_v11 = vadd.f32 %v4532_v42, %v4372_v40  ;;  %v4460_v52 = vadd.f32 %v7475_v24, %v7482_v43 }
 0x480   : > { %4635 = vst [vmem:[%s7492_s11 + $0x58] sm:$0xff] %v4541_v7 }
 0x481   : > { %4633 = vst [vmem:[%s7492_s11 + $0x48] sm:$0xff] %v4533_v11 }
 0x483   : > { %v5541_v22 = vpop.f32.mrb[108].mxu1 }
 0x484   : > { %v4554_v47 = vadd.f32 %v5541_v22, %v4393_v59  ;;  %v4545_v28 = vpop.f32.mrb[109].mxu1 }
 0x485   : > { %v4546_v16 = vadd.f32 %v4545_v28, %v4385_v23  ;;  %v5542_v15 = vpop.f32.mrb[110].mxu1 }
 0x486   : > { %4638 = vst [vmem:[%s7492_s11 + $0x70] sm:$0xff] %v4554_v47  ;;  %v4557_v46 = vadd.f32 %v5542_v15, %v4396_v57  ;;  %v4548_v58 = vpop.f32.mrb[111].mxu1 }
 0x487   : > { %4636 = vst [vmem:[%s7492_s11 + $0x60] sm:$0xff] %v4546_v16  ;;  %v4549_v12 = vadd.f32 %v4548_v58, %v4388_v0 }
 0x488   : > { %4639 = vst [vmem:[%s7492_s11 + $0x78] sm:$0xff] %v4557_v46 }
 0x489   : > { %4637 = vst [vmem:[%s7492_s11 + $0x68] sm:$0xff] %v4549_v12 }
 0x48b   : > { %v5545_v9 = vpop.f32.mrb[112].mxu1 }
 0x48c   : > { %v4570_v14 = vadd.f32 %v5545_v9, %v4409_v60  ;;  %v4561_v61 = vpop.f32.mrb[113].mxu1 }
 0x48d   : > { %v4562_v45 = vadd.f32 %v4561_v61, %v4401_v32  ;;  %v5546_v53 = vpop.f32.mrb[114].mxu1 }
 0x48e   : > { %4642 = vst [vmem:[%s7492_s11 + $0x90] sm:$0xff] %v4570_v14  ;;  %v4573_v18 = vadd.f32 %v5546_v53, %v4412_v36  ;;  %v4564_v19 = vpop.f32.mrb[115].mxu1 }
 0x48f   : > { %4640 = vst [vmem:[%s7492_s11 + $0x80] sm:$0xff] %v4562_v45  ;;  %v4565_v37 = vadd.f32 %v4564_v19, %v4404_v35 }
 0x490   : > { %4643 = vst [vmem:[%s7492_s11 + $0x98] sm:$0xff] %v4573_v18 }
 0x491   : > { %4641 = vst [vmem:[%s7492_s11 + $0x88] sm:$0xff] %v4565_v37 }
 0x493   : > { %v5549_v62 = vpop.f32.mrb[116].mxu1 }
 0x494   : > { %v4586_v50 = vadd.f32 %v5549_v62, %v4425_v56  ;;  %v4577_v29 = vpop.f32.mrb[117].mxu1 }
 0x495   : > { %v4578_v21 = vadd.f32 %v4577_v29, %v4417_v10  ;;  %v5550_v25 = vpop.f32.mrb[118].mxu1 }
 0x496   : > { %4646 = vst [vmem:[%s7492_s11 + $0xb0] sm:$0xff] %v4586_v50  ;;  %v4589_v30 = vadd.f32 %v5550_v25, %v4428_v63  ;;  %v4580_v5 = vpop.f32.mrb[119].mxu1 }
 0x497   : > { %4644 = vst [vmem:[%s7492_s11 + $0xa0] sm:$0xff] %v4578_v21  ;;  %v4581_v8 = vadd.f32 %v4580_v5, %v4420_v20 }
 0x498   : > { %4647 = vst [vmem:[%s7492_s11 + $0xb8] sm:$0xff] %v4589_v30 }
 0x499   : > { %4645 = vst [vmem:[%s7492_s11 + $0xa8] sm:$0xff] %v4581_v8 }
 0x49b   : > { %v5553_v13 = vpop.f32.mrb[120].mxu1 }
 0x49c   : > { %v4602_v4 = vadd.f32 %v5553_v13, %v4441_v17  ;;  %v4593_v2 = vpop.f32.mrb[121].mxu1 }
 0x49d   : > { %v4594_v3 = vadd.f32 %v4593_v2, %v4433_v33  ;;  %v5554_v39 = vpop.f32.mrb[122].mxu1 }
 0x49e   : > { %4650 = vst [vmem:[%s7492_s11 + $0xd0] sm:$0xff] %v4602_v4  ;;  %v4605_v41 = vadd.f32 %v5554_v39, %v4444_v44  ;;  %v4596_v49 = vpop.f32.mrb[123].mxu1 }
 0x49f   : > { %4648 = vst [vmem:[%s7492_s11 + $0xc0] sm:$0xff] %v4594_v3  ;;  %v4597_v55 = vadd.f32 %v4596_v49, %v4436_v54 }
 0x4a0   : > { %4651 = vst [vmem:[%s7492_s11 + $0xd8] sm:$0xff] %v4605_v41 }
 0x4a1   : > { %4649 = vst [vmem:[%s7492_s11 + $0xc8] sm:$0xff] %v4597_v55 }
 0x4a3   : > { %v5557_v51 = vpop.f32.mrb[124].mxu1 }
 0x4a4   : > { %v4618_v34 = vadd.f32 %v5557_v51, %v4457_v31  ;;  %v4609_v26 = vpop.f32.mrb[125].mxu1 }
 0x4a5   : > { %v4610_v27 = vadd.f32 %v4609_v26, %v4449_v38  ;;  %v5558_v40 = vpop.f32.mrb[126].mxu1 }
 0x4a6   : > { %4654 = vst [vmem:[%s7492_s11 + $0xf0] sm:$0xff] %v4618_v34  ;;  %v4621_v7 = vadd.f32 %v5558_v40, %v4460_v52  ;;  %v4612_v42 = vpop.f32.mrb[127].mxu1 }
 0x4a7   : > { %4652 = vst [vmem:[%s7492_s11 + $0xe0] sm:$0xff] %v4610_v27  ;;  %v4613_v48 = vadd.f32 %v4612_v42, %v4452_v6 }
 0x4a8   : > { %4655 = vst [vmem:[%s7492_s11 + $0xf8] sm:$0xff] %v4621_v7 }
 0x4a9   : > { %4653 = vst [vmem:[%s7492_s11 + $0xe8] sm:$0xff] %v4613_v48 }
 0x4aa   : > { %5892 = shalt.err (!%p5889_p3)
}
 0x4ab   : > { %s5893_s7 = scalar_lea.hbm %s7584_s22, 4096  ;;  %s5897_s13 = scalar_lea.hbm %s7639_s5, 8192 }
 0x4ac   : > { %p5894_p4 = scmp.ne.s32.totalorder %s7584_s22, %s5893_s7  ;;  %p5898_p9 = scmp.lt.u32.totalorder %s7584_s22, %s7639_s5 }
 0x4ad   : > { %p5899_p10 = scmp.lt.u32.totalorder %s5897_s13, %s5893_s7  ;;  %p5901_p12 = scmp.lt.u32.totalorder %s5893_s7, %s7584_s22 }
 0x4ae   : > { %p5895_p7 = pnand %p5894_p4, %p6019_p5 }
 0x4af   : > { %p5900_p11 = por %p5899_p10, %p5898_p9 }
 0x4b0   : > { %p5896_p8 = pneg %p5895_p7 }
 0x4b1   : > { %p5902_p13 = por %p5901_p12, %p5900_p11 }
 0x4b3   : > { %p5903_p0 = pnand %p5902_p13, %p5896_p8 }
 0x4b5   : > { %5906 = shalt.err (!%p5903_p0)
}
 0x4b6   : > { %s5949_s11 = smov 128   ;;  %s5950_s14 = smov 8  }
 0x4b7   : > { %5815 = dma.vmem_to_hbm [thread:$0]  (%p6019_p5), %s7586_s15, 4096, %s7584_s22, %s7593_s23, %s5949_s11, %s5949_s11, %s5950_s14  }
 0x4b8 PF: > { %p5821_p1 = scmp.ge.s32.totalorder %s5941_s21, 2  ;;  %s4685_s16 = sand.u32 1, %s5929_s18  }
 0x4b9   : > { %s4686_s17 = scalar_lea.sflag [#allocation6], %s4685_s16 }
 0x4ba   : > { %p5818_p2 = pnand %p5821_p1, %p6023_p6 }
 0x4bc   : > { %5924 = dma.done.wait (!%p5818_p2), %s4686_s17, 4096  }
 0x4bd   : > { %5926 = vsyncadd (!%p5818_p2), %s4686_s17, 4294963200  ;;  %p15_p3 = scmp.ge.s32.totalorder %s6006_s24, 4   ;;  %s7642_s18 = smov %s5933_s19 }
 0x4be   : > { %s7643_s19 = smov %s5937_s20  ;;  %s7644_s20 = smov %s6017_s27 }
 0x4bf   : > { %s7645_s21 = smov %s6006_s24  ;;  %17 = sbr.rel (!%p15_p3) target bundleno = 3 (0x3), region = 87 }
 0x4c6   :  { %4691 = vsyncpa [#allocation6], 1 }
 0x4c7   :  { %4693 = vsyncpa [#allocation6 + $0x1], 1 }

</bundles_post_ra>
